<compile_context>
chip_gen: v6e
topology: v6e:2x2x1
jax: 0.10.0
libtpu: 0.0.40
codegen_flags: <defaults>
</compile_context>

<pallas_src>
import functools

import jax
import jax.numpy as jnp
from jax.experimental import pallas as pl
from jax.experimental.pallas import tpu as pltpu


# ---------------------------------------------------------------------------
# Fused forward kernel: one grid step == one block of B_blk batch elements.
# ---------------------------------------------------------------------------
def _fused_kernel(x_ref,
                  w1_ref, b1_ref, w2_ref, b2_ref, w3_ref, b3_ref, w4_ref, b4_ref,
                  wq_ref, wk_ref, wv_ref, gamma_ref, mask_ref,
                  wih_ref, whh_ref, bih_ref, bhh_ref,
                  taw_ref, tab_ref,
                  o_ref, *, S, fs, H, T, B_blk):
    f32 = jnp.float32
    L = T * S                       # lanes per batch element (kept constant through the convs)
    T4 = T - 4 * (fs - 1)           # time steps surviving the four valid convs
    N = T4 * S                      # valid lanes per element after conv4

    # --- 4 x [Conv2d((fs,1)) + bias + ReLU]: one matmul per layer (im2col over taps) --------
    def shift_lanes(a, amt):
        # out[:, j] = a[:, j + amt]; the wrapped tail only lands in lanes that are never read.
        return a if amt == 0 else jnp.concatenate([a[:, amt:], a[:, :amt]], axis=1)

    def conv_relu(a, w_ref, b_ref):
        taps = [shift_lanes(a, k * S) for k in range(fs)]
        im2col = taps[0] if fs == 1 else jnp.concatenate(taps, axis=0)   # (fs*C, B_blk*L)
        y = jnp.dot(w_ref[...], im2col, preferred_element_type=f32) + b_ref[...]
        return jax.nn.relu(y)

    h = x_ref[0]                                     # (C_in, B_blk*L)
    h = conv_relu(h, w1_ref, b1_ref)
    h = conv_relu(h, w2_ref, b2_ref)
    h = conv_relu(h, w3_ref, b3_ref)
    h = conv_relu(h, w4_ref, b4_ref)                 # (F, B_blk*L); valid lanes [e*L, e*L+N)
    F_ = h.shape[0]

    # --- SelfAttention --------------------------------------------------------------------
    # Q/K/V projections batched over the whole block; per batch element, all T4 time steps
    # are handled by ONE (N,N) block-diagonal masked softmax instead of T4 tiny softmaxes.
    gamma = gamma_ref[0, 0]
    mask = mask_ref[...]                                                  # (N, N) additive
    fq = jnp.dot(wq_ref[...], h, preferred_element_type=f32)             # (Fd, B_blk*L)
    gk = jnp.dot(wk_ref[...], h, preferred_element_type=f32)             # (Fd, B_blk*L)
    vv = jnp.dot(wv_ref[...], h, preferred_element_type=f32)             # (F , B_blk*L)

    o_sa = []
    for e in range(B_blk):
        lo = e * L
        fe = fq[:, lo:lo + N]
        ge = gk[:, lo:lo + N]
        ve = vv[:, lo:lo + N]
        xe = h[:, lo:lo + N]
        # logits[i, j] = sum_d fe[d, i] * ge[d, j]  (== torch.bmm(f^T, g), block-diag in time)
        logits = jax.lax.dot_general(fe, ge, (((0,), (0,)), ((), ())),
                                     preferred_element_type=f32)          # (N, N)
        beta = jax.nn.softmax(logits + mask, axis=0)                      # torch softmax(dim=1)
        o_sa.append(gamma * jnp.dot(ve, beta, preferred_element_type=f32) + xe)   # (F, N)

    # --- GRU input sequence: (T4*B_blk, F*S), time-major, batch rows within each step -------
    blocks = []
    for t in range(T4):
        sl = [o_sa[e][:, t * S:(t + 1) * S] for e in range(B_blk)]        # (F, S) each
        blocks.append(jnp.stack(sl, axis=0).reshape(B_blk, F_ * S))       # (B_blk, F*S)
    X = blocks[0] if T4 == 1 else jnp.concatenate(blocks, axis=0)         # (T4*B_blk, F*S)

    # --- GRU (1 layer, unidirectional, h0 = 0), batched over the B_blk rows ------------------
    wih = wih_ref[...]
    whh = whh_ref[...]
    bih = bih_ref[...]
    bhh = bhh_ref[...]
    gi_all = jnp.dot(X, wih, preferred_element_type=f32) + bih            # (T4*B_blk, 3H)
    hs = jnp.zeros((B_blk, H), f32)
    hs_list = []
    for t in range(T4):
        gi = gi_all[t * B_blk:(t + 1) * B_blk, :]                         # (B_blk, 3H)
        gh = jnp.dot(hs, whh, preferred_element_type=f32) + bhh           # (B_blk, 3H)
        rz = jax.nn.sigmoid(gi[:, :2 * H] + gh[:, :2 * H])                # merged r|z sigmoid
        r = rz[:, :H]
        z = rz[:, H:]
        n = jnp.tanh(gi[:, 2 * H:] + r * gh[:, 2 * H:])
        hs = (1.0 - z) * n + z * hs
        hs_list.append(hs)                                                # (B_blk, H)

    # --- TemporalAttention (vectorized over time and batch) ---------------------------------
    O = jnp.stack(hs_list, axis=0)                                        # (T4, B_blk, H)
    taw = taw_ref[...]                                                    # (1, H)
    tab = tab_ref[0, 0]
    scores = jnp.sum(O * taw, axis=2, keepdims=True) + tab                # (T4, B_blk, 1)
    w_att = jax.nn.softmax(scores, axis=0)                                # softmax over time
    o_ref[0] = jnp.sum(O * w_att, axis=0)                                 # (B_blk, H)


# ---------------------------------------------------------------------------
# Wrapper: prepack weights / layouts and launch the fused call.
# ---------------------------------------------------------------------------
def feature_extractor_forward(x, p):
    B, C_in, T, S = x.shape
    F_, _, fs = p["c1"].shape
    Fd = p["wq"].shape[0]
    H = p["whh"].shape[1]
    Din = p["wih"].shape[1]
    T4 = T - 4 * (fs - 1)
    N = T4 * S
    L = T * S
    assert Din == F_ * S and T4 >= 1

    # Batch blocking: >=2 parallel grid steps when possible (both v7x TensorCores busy),
    # up to ~8 batch rows per block so the serial GRU and grid overhead amortize.
    G = max(2, pl.cdiv(B, 8)) if B >= 2 else 1
    B_blk = pl.cdiv(B, G)
    Bp = G * B_blk

    # Input packed lane-dense: (G, C_in, B_blk * T*S); per element e, lanes [e*L, (e+1)*L).
    xl = x.reshape(B, C_in, L).transpose(1, 0, 2)                          # (C_in, B, L)
    if Bp != B:
        xl = jnp.pad(xl, ((0, 0), (0, Bp - B), (0, 0)))
    xg = xl.reshape(C_in, G, B_blk * L).transpose(1, 0, 2)                 # (G, C_in, B_blk*L)

    def pack_conv(w):                                                      # (Fo,Ci,fs)->(Fo,fs*Ci)
        return jnp.transpose(w, (0, 2, 1)).reshape(w.shape[0], -1)

    # Block-diagonal additive mask for the fused per-element self-attention softmax.
    tt = jnp.arange(N, dtype=jnp.int32) // S
    sa_mask = jnp.where(tt[:, None] == tt[None, :], 0.0, -1e30).astype(jnp.float32)

    args = (
        xg,
        pack_conv(p["c1"]), p["cb1"].reshape(F_, 1),
        pack_conv(p["c2"]), p["cb2"].reshape(F_, 1),
        pack_conv(p["c3"]), p["cb3"].reshape(F_, 1),
        pack_conv(p["c4"]), p["cb4"].reshape(F_, 1),
        p["wq"], p["wk"], p["wv"], p["gamma"], sa_mask,
        p["wih"].T, p["whh"].T, p["bih"], p["bhh"],
        p["taw"], p["tab"],
    )

    def full(shape):
        return pl.BlockSpec(shape, lambda g: (0,) * len(shape))

    in_specs = [
        pl.BlockSpec((1, C_in, B_blk * L), lambda g: (g, 0, 0)),           # x block
        full((F_, fs * C_in)), full((F_, 1)),                              # conv1 w, b
        full((F_, fs * F_)), full((F_, 1)),                                # conv2 w, b
        full((F_, fs * F_)), full((F_, 1)),                                # conv3 w, b
        full((F_, fs * F_)), full((F_, 1)),                                # conv4 w, b
        full((Fd, F_)), full((Fd, F_)), full((F_, F_)),                    # wq, wk, wv
        pl.BlockSpec(memory_space=pltpu.MemorySpace.SMEM),                 # gamma (scalar)
        full((N, N)),                                                      # SA block-diag mask
        full((Din, 3 * H)), full((H, 3 * H)),                              # W_ih^T, W_hh^T
        full((1, 3 * H)), full((1, 3 * H)),                                # b_ih, b_hh
        full((1, H)),                                                      # temporal-attn weight
        pl.BlockSpec(memory_space=pltpu.MemorySpace.SMEM),                 # temporal-attn bias
    ]

    out = pl.pallas_call(
        functools.partial(_fused_kernel, S=S, fs=fs, H=H, T=T, B_blk=B_blk),
        out_shape=jax.ShapeDtypeStruct((G, B_blk, H), jnp.float32),
        grid=(G,),
        in_specs=in_specs,
        out_specs=pl.BlockSpec((1, B_blk, H), lambda g: (g, 0, 0)),
        compiler_params=pltpu.CompilerParams(dimension_semantics=("parallel",)),
    )(*args)
    return out.reshape(Bp, H)[:B]


# ---------------------------------------------------------------------------
# Pure-JAX reference (high precision) for the correctness check.
# ---------------------------------------------------------------------------
def reference_forward(x, p):
    hi = jax.lax.Precision.HIGHEST
    h = x
    for wk_, bk_ in (("c1", "cb1"), ("c2", "cb2"), ("c3", "cb3"), ("c4", "cb4")):
        w, b = p[wk_], p[bk_]
        fs = w.shape[2]
        Tout = h.shape[2] - fs + 1
        y = jnp.zeros((h.shape[0], w.shape[0], Tout, h.shape[3]), jnp.float32)
        for k in range(fs):
            y = y + jnp.einsum("fc,bcts->bfts", w[:, :, k], h[:, :, k:k + Tout, :],
                               precision=hi)
        h = jax.nn.relu(y + b[None, :, None, None])
    B, F_, T, S = h.shape
    outs = []
    for t in range(T):
        xt = h[:, :, t, :]
        f = jnp.einsum("qf,bfs->bqs", p["wq"], xt, precision=hi)
        g = jnp.einsum("qf,bfs->bqs", p["wk"], xt, precision=hi)
        v = jnp.einsum("of,bfs->bos", p["wv"], xt, precision=hi)
        logits = jnp.einsum("bqi,bqj->bij", f, g, precision=hi)
        beta = jax.nn.softmax(logits, axis=1)
        outs.append(p["gamma"][0, 0] * jnp.einsum("bfi,bij->bfj", v, beta, precision=hi) + xt)
    seq = jnp.stack(outs, axis=0).reshape(T, B, F_ * S)
    H = p["whh"].shape[1]
    hs = jnp.zeros((B, H), jnp.float32)
    ys = []
    for t in range(T):
        gi = jnp.dot(seq[t], p["wih"].T, precision=hi) + p["bih"][0]
        gh = jnp.dot(hs, p["whh"].T, precision=hi) + p["bhh"][0]
        r = jax.nn.sigmoid(gi[:, :H] + gh[:, :H])
        z = jax.nn.sigmoid(gi[:, H:2 * H] + gh[:, H:2 * H])
        n = jnp.tanh(gi[:, 2 * H:] + r * gh[:, 2 * H:])
        hs = (1.0 - z) * n + z * hs
        ys.append(hs)
    outputs = jnp.stack(ys, axis=0)
    scores = jnp.einsum("tbh,h->tb", outputs, p["taw"][0], precision=hi) + p["tab"][0, 0]
    w_att = jax.nn.softmax(scores, axis=0)
    return jnp.sum(w_att[:, :, None] * outputs, axis=0)


if __name__ == "__main__":
    # Shapes consistent with the module:
    #   input_shape = (B, C_in, T, S) = (4, 4, 16, 8), filter_num=8, filter_size=3,
    #   hidden_dim=16, enc_num_layers=1, unidirectional, activation='ReLU', sa_div=2
    B, C_in, T, S = 4, 4, 16, 8
    F_, fs, H, sa_div = 8, 3, 16, 2
    Fd = F_ // sa_div
    Din = F_ * S

    key = jax.random.PRNGKey(0)
    ks = jax.random.split(key, 20)

    def nrm(k, shape, scale):
        return (scale * jax.random.normal(k, shape)).astype(jnp.float32)

    def uni(k, shape, bound):
        return (bound * jax.random.uniform(k, shape, minval=-1.0, maxval=1.0)).astype(jnp.float32)

    params = {
        # Conv2d weights (F_out, F_in, fs) + biases (nn.Conv2d default bias=True).
        "c1": nrm(ks[0], (F_, C_in, fs), (2.0 / (C_in * fs)) ** 0.5),
        "cb1": uni(ks[1], (F_,), (1.0 / (C_in * fs)) ** 0.5),
        "c2": nrm(ks[2], (F_, F_, fs), (2.0 / (F_ * fs)) ** 0.5),
        "cb2": uni(ks[3], (F_,), (1.0 / (F_ * fs)) ** 0.5),
        "c3": nrm(ks[4], (F_, F_, fs), (2.0 / (F_ * fs)) ** 0.5),
        "cb3": uni(ks[5], (F_,), (1.0 / (F_ * fs)) ** 0.5),
        "c4": nrm(ks[6], (F_, F_, fs), (2.0 / (F_ * fs)) ** 0.5),
        "cb4": uni(ks[7], (F_,), (1.0 / (F_ * fs)) ** 0.5),
        # SelfAttention 1x1 convs (bias=False).
        "wq": nrm(ks[8], (Fd, F_), (2.0 / F_) ** 0.5),
        "wk": nrm(ks[9], (Fd, F_), (2.0 / F_) ** 0.5),
        "wv": nrm(ks[10], (F_, F_), (2.0 / F_) ** 0.5),
        # gamma is a learnable scalar (torch init 0.0); nonzero here so the SA path
        # is actually exercised by the correctness check.
        "gamma": jnp.full((1, 1), 0.25, jnp.float32),
        # GRU weights (r|z|n stacked rows), PyTorch-style uniform(-1/sqrt(H), 1/sqrt(H)).
        "wih": uni(ks[11], (3 * H, Din), 1.0 / H ** 0.5),
        "whh": uni(ks[12], (3 * H, H), 1.0 / H ** 0.5),
        "bih": uni(ks[13], (1, 3 * H), 1.0 / H ** 0.5),
        "bhh": uni(ks[14], (1, 3 * H), 1.0 / H ** 0.5),
        # TemporalAttention fc: Linear(H, 1).
        "taw": uni(ks[15], (1, H), 1.0 / H ** 0.5),
        "tab": uni(ks[16], (1, 1), 1.0 / H ** 0.5),
    }

    x = jax.random.normal(ks[17], (B, C_in, T, S), dtype=jnp.float32)

    fwd = jax.jit(feature_extractor_forward)
    out = jax.block_until_ready(fwd(x, params))
    assert out.shape == (B, H), out.shape
    assert bool(jnp.all(jnp.isfinite(out)))

    ref = jax.block_until_ready(reference_forward(x, params))
    max_err = float(jnp.max(jnp.abs(out - ref)))
    assert max_err < 2e-2, f"mismatch vs reference: {max_err}"

    print("KERNEL_OK")
</pallas_src>

<mosaic_0001>
module attributes {stable_mosaic.version = 11 : i64} {
  func.func @_fused_kernel(%arg0: i32, %arg1: memref<1x4x256xf32, #tpu.memory_space<vmem>>, %arg2: memref<8x12xf32, #tpu.memory_space<vmem>>, %arg3: memref<8x1xf32, #tpu.memory_space<vmem>>, %arg4: memref<8x24xf32, #tpu.memory_space<vmem>>, %arg5: memref<8x1xf32, #tpu.memory_space<vmem>>, %arg6: memref<8x24xf32, #tpu.memory_space<vmem>>, %arg7: memref<8x1xf32, #tpu.memory_space<vmem>>, %arg8: memref<8x24xf32, #tpu.memory_space<vmem>>, %arg9: memref<8x1xf32, #tpu.memory_space<vmem>>, %arg10: memref<4x8xf32, #tpu.memory_space<vmem>>, %arg11: memref<4x8xf32, #tpu.memory_space<vmem>>, %arg12: memref<8x8xf32, #tpu.memory_space<vmem>>, %arg13: memref<1x1xf32, #tpu.memory_space<smem>>, %arg14: memref<64x64xf32, #tpu.memory_space<vmem>>, %arg15: memref<64x48xf32, #tpu.memory_space<vmem>>, %arg16: memref<16x48xf32, #tpu.memory_space<vmem>>, %arg17: memref<1x48xf32, #tpu.memory_space<vmem>>, %arg18: memref<1x48xf32, #tpu.memory_space<vmem>>, %arg19: memref<1x16xf32, #tpu.memory_space<vmem>>, %arg20: memref<1x1xf32, #tpu.memory_space<smem>>, %arg21: memref<1x2x16xf32, #tpu.memory_space<vmem>>) attributes {dimension_semantics = [#tpu.dimension_semantics<parallel>], iteration_bounds = array<i64: 2>, scalar_prefetch = 0 : i64, scratch_operands = 0 : i64, tpu.core_type = #tpu.core_type<tc>, window_params = [{transform_indices = @transform_0, window_bounds = array<i64: 1, 4, 256>}, {pipeline_mode = #tpu.pipeline_mode<synchronous>, transform_indices = @transform_1, window_bounds = array<i64: 8, 12>}, {pipeline_mode = #tpu.pipeline_mode<synchronous>, transform_indices = @transform_2, window_bounds = array<i64: 8, 1>}, {pipeline_mode = #tpu.pipeline_mode<synchronous>, transform_indices = @transform_3, window_bounds = array<i64: 8, 24>}, {pipeline_mode = #tpu.pipeline_mode<synchronous>, transform_indices = @transform_4, window_bounds = array<i64: 8, 1>}, {pipeline_mode = #tpu.pipeline_mode<synchronous>, transform_indices = @transform_5, window_bounds = array<i64: 8, 24>}, {pipeline_mode = #tpu.pipeline_mode<synchronous>, transform_indices = @transform_6, window_bounds = array<i64: 8, 1>}, {pipeline_mode = #tpu.pipeline_mode<synchronous>, transform_indices = @transform_7, window_bounds = array<i64: 8, 24>}, {pipeline_mode = #tpu.pipeline_mode<synchronous>, transform_indices = @transform_8, window_bounds = array<i64: 8, 1>}, {pipeline_mode = #tpu.pipeline_mode<synchronous>, transform_indices = @transform_9, window_bounds = array<i64: 4, 8>}, {pipeline_mode = #tpu.pipeline_mode<synchronous>, transform_indices = @transform_10, window_bounds = array<i64: 4, 8>}, {pipeline_mode = #tpu.pipeline_mode<synchronous>, transform_indices = @transform_11, window_bounds = array<i64: 8, 8>}, {transform_indices = @transform_12, window_bounds = array<i64: 1, 1>}, {pipeline_mode = #tpu.pipeline_mode<synchronous>, transform_indices = @transform_13, window_bounds = array<i64: 64, 64>}, {pipeline_mode = #tpu.pipeline_mode<synchronous>, transform_indices = @transform_14, window_bounds = array<i64: 64, 48>}, {pipeline_mode = #tpu.pipeline_mode<synchronous>, transform_indices = @transform_15, window_bounds = array<i64: 16, 48>}, {pipeline_mode = #tpu.pipeline_mode<synchronous>, transform_indices = @transform_16, window_bounds = array<i64: 1, 48>}, {pipeline_mode = #tpu.pipeline_mode<synchronous>, transform_indices = @transform_17, window_bounds = array<i64: 1, 48>}, {pipeline_mode = #tpu.pipeline_mode<synchronous>, transform_indices = @transform_18, window_bounds = array<i64: 1, 16>}, {transform_indices = @transform_19, window_bounds = array<i64: 1, 1>}, {transform_indices = @transform_20, window_bounds = array<i64: 1, 2, 16>}]} {
    %c0 = arith.constant 0 : index
    %c0_0 = arith.constant 0 : index
    %c0_1 = arith.constant 0 : index
    %0 = vector.load %arg1[%c0, %c0_0, %c0_1] : memref<1x4x256xf32, #tpu.memory_space<vmem>>, vector<1x4x256xf32>
    %1 = vector.shape_cast %0 : vector<1x4x256xf32> to vector<4x256xf32>
    %2 = vector.extract_strided_slice %1 {offsets = [0, 8], sizes = [4, 248], strides = [1, 1]} : vector<4x256xf32> to vector<4x248xf32>
    %3 = vector.extract_strided_slice %1 {offsets = [0, 0], sizes = [4, 8], strides = [1, 1]} : vector<4x256xf32> to vector<4x8xf32>
    %4 = tpu.concatenate %2, %3 in 1 : vector<4x248xf32>, vector<4x8xf32> -> vector<4x256xf32>
    %5 = vector.extract_strided_slice %1 {offsets = [0, 16], sizes = [4, 240], strides = [1, 1]} : vector<4x256xf32> to vector<4x240xf32>
    %6 = vector.extract_strided_slice %1 {offsets = [0, 0], sizes = [4, 16], strides = [1, 1]} : vector<4x256xf32> to vector<4x16xf32>
    %7 = tpu.concatenate %5, %6 in 1 : vector<4x240xf32>, vector<4x16xf32> -> vector<4x256xf32>
    %8 = tpu.concatenate %1, %4, %7 in 0 : vector<4x256xf32>, vector<4x256xf32>, vector<4x256xf32> -> vector<12x256xf32>
    %c0_2 = arith.constant 0 : index
    %c0_3 = arith.constant 0 : index
    %9 = vector.load %arg2[%c0_2, %c0_3] : memref<8x12xf32, #tpu.memory_space<vmem>>, vector<8x12xf32>
    %cst = arith.constant dense<0.000000e+00> : vector<8x256xf32>
    %10 = tpu.matmul %9, %8, %cst {dimension_numbers = #tpu.dot_dimension_numbers<[1], [0], [0], [1], [0, 0, 1, 1], [], []>} : vector<8x12xf32>, vector<12x256xf32>, vector<8x256xf32> -> vector<8x256xf32>
    %c0_4 = arith.constant 0 : index
    %c0_5 = arith.constant 0 : index
    %11 = vector.load %arg3[%c0_4, %c0_5] : memref<8x1xf32, #tpu.memory_space<vmem>>, vector<8x1xf32>
    %12 = vector.broadcast %11 : vector<8x1xf32> to vector<8x256xf32>
    %13 = arith.addf %10, %12 : vector<8x256xf32>
    %cst_6 = arith.constant 0.000000e+00 : f32
    %14 = vector.broadcast %cst_6 : f32 to vector<8x256xf32>
    %15 = arith.maximumf %13, %14 : vector<8x256xf32>
    %16 = vector.extract_strided_slice %15 {offsets = [0, 8], sizes = [8, 248], strides = [1, 1]} : vector<8x256xf32> to vector<8x248xf32>
    %17 = vector.extract_strided_slice %15 {offsets = [0, 0], sizes = [8, 8], strides = [1, 1]} : vector<8x256xf32> to vector<8x8xf32>
    %18 = tpu.concatenate %16, %17 in 1 : vector<8x248xf32>, vector<8x8xf32> -> vector<8x256xf32>
    %19 = vector.extract_strided_slice %15 {offsets = [0, 16], sizes = [8, 240], strides = [1, 1]} : vector<8x256xf32> to vector<8x240xf32>
    %20 = vector.extract_strided_slice %15 {offsets = [0, 0], sizes = [8, 16], strides = [1, 1]} : vector<8x256xf32> to vector<8x16xf32>
    %21 = tpu.concatenate %19, %20 in 1 : vector<8x240xf32>, vector<8x16xf32> -> vector<8x256xf32>
    %22 = tpu.concatenate %15, %18, %21 in 0 : vector<8x256xf32>, vector<8x256xf32>, vector<8x256xf32> -> vector<24x256xf32>
    %c0_7 = arith.constant 0 : index
    %c0_8 = arith.constant 0 : index
    %23 = vector.load %arg4[%c0_7, %c0_8] : memref<8x24xf32, #tpu.memory_space<vmem>>, vector<8x24xf32>
    %cst_9 = arith.constant dense<0.000000e+00> : vector<8x256xf32>
    %24 = tpu.matmul %23, %22, %cst_9 {dimension_numbers = #tpu.dot_dimension_numbers<[1], [0], [0], [1], [0, 0, 1, 1], [], []>} : vector<8x24xf32>, vector<24x256xf32>, vector<8x256xf32> -> vector<8x256xf32>
    %c0_10 = arith.constant 0 : index
    %c0_11 = arith.constant 0 : index
    %25 = vector.load %arg5[%c0_10, %c0_11] : memref<8x1xf32, #tpu.memory_space<vmem>>, vector<8x1xf32>
    %26 = vector.broadcast %25 : vector<8x1xf32> to vector<8x256xf32>
    %27 = arith.addf %24, %26 : vector<8x256xf32>
    %cst_12 = arith.constant 0.000000e+00 : f32
    %28 = vector.broadcast %cst_12 : f32 to vector<8x256xf32>
    %29 = arith.maximumf %27, %28 : vector<8x256xf32>
    %30 = vector.extract_strided_slice %29 {offsets = [0, 8], sizes = [8, 248], strides = [1, 1]} : vector<8x256xf32> to vector<8x248xf32>
    %31 = vector.extract_strided_slice %29 {offsets = [0, 0], sizes = [8, 8], strides = [1, 1]} : vector<8x256xf32> to vector<8x8xf32>
    %32 = tpu.concatenate %30, %31 in 1 : vector<8x248xf32>, vector<8x8xf32> -> vector<8x256xf32>
    %33 = vector.extract_strided_slice %29 {offsets = [0, 16], sizes = [8, 240], strides = [1, 1]} : vector<8x256xf32> to vector<8x240xf32>
    %34 = vector.extract_strided_slice %29 {offsets = [0, 0], sizes = [8, 16], strides = [1, 1]} : vector<8x256xf32> to vector<8x16xf32>
    %35 = tpu.concatenate %33, %34 in 1 : vector<8x240xf32>, vector<8x16xf32> -> vector<8x256xf32>
    %36 = tpu.concatenate %29, %32, %35 in 0 : vector<8x256xf32>, vector<8x256xf32>, vector<8x256xf32> -> vector<24x256xf32>
    %c0_13 = arith.constant 0 : index
    %c0_14 = arith.constant 0 : index
    %37 = vector.load %arg6[%c0_13, %c0_14] : memref<8x24xf32, #tpu.memory_space<vmem>>, vector<8x24xf32>
    %cst_15 = arith.constant dense<0.000000e+00> : vector<8x256xf32>
    %38 = tpu.matmul %37, %36, %cst_15 {dimension_numbers = #tpu.dot_dimension_numbers<[1], [0], [0], [1], [0, 0, 1, 1], [], []>} : vector<8x24xf32>, vector<24x256xf32>, vector<8x256xf32> -> vector<8x256xf32>
    %c0_16 = arith.constant 0 : index
    %c0_17 = arith.constant 0 : index
    %39 = vector.load %arg7[%c0_16, %c0_17] : memref<8x1xf32, #tpu.memory_space<vmem>>, vector<8x1xf32>
    %40 = vector.broadcast %39 : vector<8x1xf32> to vector<8x256xf32>
    %41 = arith.addf %38, %40 : vector<8x256xf32>
    %cst_18 = arith.constant 0.000000e+00 : f32
    %42 = vector.broadcast %cst_18 : f32 to vector<8x256xf32>
    %43 = arith.maximumf %41, %42 : vector<8x256xf32>
    %44 = vector.extract_strided_slice %43 {offsets = [0, 8], sizes = [8, 248], strides = [1, 1]} : vector<8x256xf32> to vector<8x248xf32>
    %45 = vector.extract_strided_slice %43 {offsets = [0, 0], sizes = [8, 8], strides = [1, 1]} : vector<8x256xf32> to vector<8x8xf32>
    %46 = tpu.concatenate %44, %45 in 1 : vector<8x248xf32>, vector<8x8xf32> -> vector<8x256xf32>
    %47 = vector.extract_strided_slice %43 {offsets = [0, 16], sizes = [8, 240], strides = [1, 1]} : vector<8x256xf32> to vector<8x240xf32>
    %48 = vector.extract_strided_slice %43 {offsets = [0, 0], sizes = [8, 16], strides = [1, 1]} : vector<8x256xf32> to vector<8x16xf32>
    %49 = tpu.concatenate %47, %48 in 1 : vector<8x240xf32>, vector<8x16xf32> -> vector<8x256xf32>
    %50 = tpu.concatenate %43, %46, %49 in 0 : vector<8x256xf32>, vector<8x256xf32>, vector<8x256xf32> -> vector<24x256xf32>
    %c0_19 = arith.constant 0 : index
    %c0_20 = arith.constant 0 : index
    %51 = vector.load %arg8[%c0_19, %c0_20] : memref<8x24xf32, #tpu.memory_space<vmem>>, vector<8x24xf32>
    %cst_21 = arith.constant dense<0.000000e+00> : vector<8x256xf32>
    %52 = tpu.matmul %51, %50, %cst_21 {dimension_numbers = #tpu.dot_dimension_numbers<[1], [0], [0], [1], [0, 0, 1, 1], [], []>} : vector<8x24xf32>, vector<24x256xf32>, vector<8x256xf32> -> vector<8x256xf32>
    %c0_22 = arith.constant 0 : index
    %c0_23 = arith.constant 0 : index
    %53 = vector.load %arg9[%c0_22, %c0_23] : memref<8x1xf32, #tpu.memory_space<vmem>>, vector<8x1xf32>
    %54 = vector.broadcast %53 : vector<8x1xf32> to vector<8x256xf32>
    %55 = arith.addf %52, %54 : vector<8x256xf32>
    %cst_24 = arith.constant 0.000000e+00 : f32
    %56 = vector.broadcast %cst_24 : f32 to vector<8x256xf32>
    %57 = arith.maximumf %55, %56 : vector<8x256xf32>
    %c0_25 = arith.constant 0 : index
    %c0_26 = arith.constant 0 : index
    %58 = memref.load %arg13[%c0_25, %c0_26] : memref<1x1xf32, #tpu.memory_space<smem>>
    %c0_27 = arith.constant 0 : index
    %c0_28 = arith.constant 0 : index
    %59 = vector.load %arg14[%c0_27, %c0_28] : memref<64x64xf32, #tpu.memory_space<vmem>>, vector<64x64xf32>
    %c0_29 = arith.constant 0 : index
    %c0_30 = arith.constant 0 : index
    %60 = vector.load %arg10[%c0_29, %c0_30] : memref<4x8xf32, #tpu.memory_space<vmem>>, vector<4x8xf32>
    %cst_31 = arith.constant dense<0.000000e+00> : vector<4x256xf32>
    %61 = tpu.matmul %60, %57, %cst_31 {dimension_numbers = #tpu.dot_dimension_numbers<[1], [0], [0], [1], [0, 0, 1, 1], [], []>} : vector<4x8xf32>, vector<8x256xf32>, vector<4x256xf32> -> vector<4x256xf32>
    %c0_32 = arith.constant 0 : index
    %c0_33 = arith.constant 0 : index
    %62 = vector.load %arg11[%c0_32, %c0_33] : memref<4x8xf32, #tpu.memory_space<vmem>>, vector<4x8xf32>
    %cst_34 = arith.constant dense<0.000000e+00> : vector<4x256xf32>
    %63 = tpu.matmul %62, %57, %cst_34 {dimension_numbers = #tpu.dot_dimension_numbers<[1], [0], [0], [1], [0, 0, 1, 1], [], []>} : vector<4x8xf32>, vector<8x256xf32>, vector<4x256xf32> -> vector<4x256xf32>
    %c0_35 = arith.constant 0 : index
    %c0_36 = arith.constant 0 : index
    %64 = vector.load %arg12[%c0_35, %c0_36] : memref<8x8xf32, #tpu.memory_space<vmem>>, vector<8x8xf32>
    %cst_37 = arith.constant dense<0.000000e+00> : vector<8x256xf32>
    %65 = tpu.matmul %64, %57, %cst_37 {dimension_numbers = #tpu.dot_dimension_numbers<[1], [0], [0], [1], [0, 0, 1, 1], [], []>} : vector<8x8xf32>, vector<8x256xf32>, vector<8x256xf32> -> vector<8x256xf32>
    %66 = vector.extract_strided_slice %61 {offsets = [0, 0], sizes = [4, 64], strides = [1, 1]} : vector<4x256xf32> to vector<4x64xf32>
    %67 = vector.extract_strided_slice %63 {offsets = [0, 0], sizes = [4, 64], strides = [1, 1]} : vector<4x256xf32> to vector<4x64xf32>
    %68 = vector.extract_strided_slice %65 {offsets = [0, 0], sizes = [8, 64], strides = [1, 1]} : vector<8x256xf32> to vector<8x64xf32>
    %69 = vector.extract_strided_slice %57 {offsets = [0, 0], sizes = [8, 64], strides = [1, 1]} : vector<8x256xf32> to vector<8x64xf32>
    %cst_38 = arith.constant dense<0.000000e+00> : vector<64x64xf32>
    %70 = tpu.matmul %66, %67, %cst_38 {dimension_numbers = #tpu.dot_dimension_numbers<[0], [0], [1], [1], [0, 1, 1, 1], [], []>} : vector<4x64xf32>, vector<4x64xf32>, vector<64x64xf32> -> vector<64x64xf32>
    %71 = arith.addf %70, %59 : vector<64x64xf32>
    %cst_39 = arith.constant dense<0xFF800000> : vector<64xf32>
    %72 = vector.multi_reduction <maximumf>, %71, %cst_39 [0] : vector<64x64xf32> to vector<64xf32>
    %cst_40 = arith.constant 0xFF800000 : f32
    %73 = vector.broadcast %cst_40 : f32 to vector<64xf32>
    %74 = arith.maximumf %73, %72 : vector<64xf32>
    %75 = vector.shape_cast %74 : vector<64xf32> to vector<1x64xf32>
    %76 = vector.broadcast %75 : vector<1x64xf32> to vector<64x64xf32>
    %77 = arith.subf %71, %76 : vector<64x64xf32>
    %78 = math.exp %77 : vector<64x64xf32>
    %cst_41 = arith.constant dense<0.000000e+00> : vector<64xf32>
    %79 = vector.multi_reduction <add>, %78, %cst_41 [0] : vector<64x64xf32> to vector<64xf32>
    %80 = vector.shape_cast %79 : vector<64xf32> to vector<1x64xf32>
    %81 = vector.broadcast %80 : vector<1x64xf32> to vector<64x64xf32>
    %82 = arith.divf %78, %81 : vector<64x64xf32>
    %cst_42 = arith.constant dense<0.000000e+00> : vector<8x64xf32>
    %83 = tpu.matmul %68, %82, %cst_42 {dimension_numbers = #tpu.dot_dimension_numbers<[1], [0], [0], [1], [0, 0, 1, 1], [], []>} : vector<8x64xf32>, vector<64x64xf32>, vector<8x64xf32> -> vector<8x64xf32>
    %84 = vector.broadcast %58 : f32 to vector<8x64xf32>
    %85 = arith.mulf %84, %83 : vector<8x64xf32>
    %86 = arith.addf %85, %69 : vector<8x64xf32>
    %87 = vector.extract_strided_slice %61 {offsets = [0, 128], sizes = [4, 64], strides = [1, 1]} : vector<4x256xf32> to vector<4x64xf32>
    %88 = vector.extract_strided_slice %63 {offsets = [0, 128], sizes = [4, 64], strides = [1, 1]} : vector<4x256xf32> to vector<4x64xf32>
    %89 = vector.extract_strided_slice %65 {offsets = [0, 128], sizes = [8, 64], strides = [1, 1]} : vector<8x256xf32> to vector<8x64xf32>
    %90 = vector.extract_strided_slice %57 {offsets = [0, 128], sizes = [8, 64], strides = [1, 1]} : vector<8x256xf32> to vector<8x64xf32>
    %cst_43 = arith.constant dense<0.000000e+00> : vector<64x64xf32>
    %91 = tpu.matmul %87, %88, %cst_43 {dimension_numbers = #tpu.dot_dimension_numbers<[0], [0], [1], [1], [0, 1, 1, 1], [], []>} : vector<4x64xf32>, vector<4x64xf32>, vector<64x64xf32> -> vector<64x64xf32>
    %92 = arith.addf %91, %59 : vector<64x64xf32>
    %cst_44 = arith.constant dense<0xFF800000> : vector<64xf32>
    %93 = vector.multi_reduction <maximumf>, %92, %cst_44 [0] : vector<64x64xf32> to vector<64xf32>
    %cst_45 = arith.constant 0xFF800000 : f32
    %94 = vector.broadcast %cst_45 : f32 to vector<64xf32>
    %95 = arith.maximumf %94, %93 : vector<64xf32>
    %96 = vector.shape_cast %95 : vector<64xf32> to vector<1x64xf32>
    %97 = vector.broadcast %96 : vector<1x64xf32> to vector<64x64xf32>
    %98 = arith.subf %92, %97 : vector<64x64xf32>
    %99 = math.exp %98 : vector<64x64xf32>
    %cst_46 = arith.constant dense<0.000000e+00> : vector<64xf32>
    %100 = vector.multi_reduction <add>, %99, %cst_46 [0] : vector<64x64xf32> to vector<64xf32>
    %101 = vector.shape_cast %100 : vector<64xf32> to vector<1x64xf32>
    %102 = vector.broadcast %101 : vector<1x64xf32> to vector<64x64xf32>
    %103 = arith.divf %99, %102 : vector<64x64xf32>
    %cst_47 = arith.constant dense<0.000000e+00> : vector<8x64xf32>
    %104 = tpu.matmul %89, %103, %cst_47 {dimension_numbers = #tpu.dot_dimension_numbers<[1], [0], [0], [1], [0, 0, 1, 1], [], []>} : vector<8x64xf32>, vector<64x64xf32>, vector<8x64xf32> -> vector<8x64xf32>
    %105 = vector.broadcast %58 : f32 to vector<8x64xf32>
    %106 = arith.mulf %105, %104 : vector<8x64xf32>
    %107 = arith.addf %106, %90 : vector<8x64xf32>
    %108 = vector.extract_strided_slice %86 {offsets = [0, 0], sizes = [8, 8], strides = [1, 1]} : vector<8x64xf32> to vector<8x8xf32>
    %109 = vector.extract_strided_slice %107 {offsets = [0, 0], sizes = [8, 8], strides = [1, 1]} : vector<8x64xf32> to vector<8x8xf32>
    %110 = vector.shape_cast %108 : vector<8x8xf32> to vector<1x8x8xf32>
    %111 = vector.shape_cast %109 : vector<8x8xf32> to vector<1x8x8xf32>
    %112 = tpu.concatenate %110, %111 in 0 : vector<1x8x8xf32>, vector<1x8x8xf32> -> vector<2x8x8xf32>
    %113 = vector.shape_cast %112 : vector<2x8x8xf32> to vector<2x64xf32>
    %114 = vector.extract_strided_slice %86 {offsets = [0, 8], sizes = [8, 8], strides = [1, 1]} : vector<8x64xf32> to vector<8x8xf32>
    %115 = vector.extract_strided_slice %107 {offsets = [0, 8], sizes = [8, 8], strides = [1, 1]} : vector<8x64xf32> to vector<8x8xf32>
    %116 = vector.shape_cast %114 : vector<8x8xf32> to vector<1x8x8xf32>
    %117 = vector.shape_cast %115 : vector<8x8xf32> to vector<1x8x8xf32>
    %118 = tpu.concatenate %116, %117 in 0 : vector<1x8x8xf32>, vector<1x8x8xf32> -> vector<2x8x8xf32>
    %119 = vector.shape_cast %118 : vector<2x8x8xf32> to vector<2x64xf32>
    %120 = vector.extract_strided_slice %86 {offsets = [0, 16], sizes = [8, 8], strides = [1, 1]} : vector<8x64xf32> to vector<8x8xf32>
    %121 = vector.extract_strided_slice %107 {offsets = [0, 16], sizes = [8, 8], strides = [1, 1]} : vector<8x64xf32> to vector<8x8xf32>
    %122 = vector.shape_cast %120 : vector<8x8xf32> to vector<1x8x8xf32>
    %123 = vector.shape_cast %121 : vector<8x8xf32> to vector<1x8x8xf32>
    %124 = tpu.concatenate %122, %123 in 0 : vector<1x8x8xf32>, vector<1x8x8xf32> -> vector<2x8x8xf32>
    %125 = vector.shape_cast %124 : vector<2x8x8xf32> to vector<2x64xf32>
    %126 = vector.extract_strided_slice %86 {offsets = [0, 24], sizes = [8, 8], strides = [1, 1]} : vector<8x64xf32> to vector<8x8xf32>
    %127 = vector.extract_strided_slice %107 {offsets = [0, 24], sizes = [8, 8], strides = [1, 1]} : vector<8x64xf32> to vector<8x8xf32>
    %128 = vector.shape_cast %126 : vector<8x8xf32> to vector<1x8x8xf32>
    %129 = vector.shape_cast %127 : vector<8x8xf32> to vector<1x8x8xf32>
    %130 = tpu.concatenate %128, %129 in 0 : vector<1x8x8xf32>, vector<1x8x8xf32> -> vector<2x8x8xf32>
    %131 = vector.shape_cast %130 : vector<2x8x8xf32> to vector<2x64xf32>
    %132 = vector.extract_strided_slice %86 {offsets = [0, 32], sizes = [8, 8], strides = [1, 1]} : vector<8x64xf32> to vector<8x8xf32>
    %133 = vector.extract_strided_slice %107 {offsets = [0, 32], sizes = [8, 8], strides = [1, 1]} : vector<8x64xf32> to vector<8x8xf32>
    %134 = vector.shape_cast %132 : vector<8x8xf32> to vector<1x8x8xf32>
    %135 = vector.shape_cast %133 : vector<8x8xf32> to vector<1x8x8xf32>
    %136 = tpu.concatenate %134, %135 in 0 : vector<1x8x8xf32>, vector<1x8x8xf32> -> vector<2x8x8xf32>
    %137 = vector.shape_cast %136 : vector<2x8x8xf32> to vector<2x64xf32>
    %138 = vector.extract_strided_slice %86 {offsets = [0, 40], sizes = [8, 8], strides = [1, 1]} : vector<8x64xf32> to vector<8x8xf32>
    %139 = vector.extract_strided_slice %107 {offsets = [0, 40], sizes = [8, 8], strides = [1, 1]} : vector<8x64xf32> to vector<8x8xf32>
    %140 = vector.shape_cast %138 : vector<8x8xf32> to vector<1x8x8xf32>
    %141 = vector.shape_cast %139 : vector<8x8xf32> to vector<1x8x8xf32>
    %142 = tpu.concatenate %140, %141 in 0 : vector<1x8x8xf32>, vector<1x8x8xf32> -> vector<2x8x8xf32>
    %143 = vector.shape_cast %142 : vector<2x8x8xf32> to vector<2x64xf32>
    %144 = vector.extract_strided_slice %86 {offsets = [0, 48], sizes = [8, 8], strides = [1, 1]} : vector<8x64xf32> to vector<8x8xf32>
    %145 = vector.extract_strided_slice %107 {offsets = [0, 48], sizes = [8, 8], strides = [1, 1]} : vector<8x64xf32> to vector<8x8xf32>
    %146 = vector.shape_cast %144 : vector<8x8xf32> to vector<1x8x8xf32>
    %147 = vector.shape_cast %145 : vector<8x8xf32> to vector<1x8x8xf32>
    %148 = tpu.concatenate %146, %147 in 0 : vector<1x8x8xf32>, vector<1x8x8xf32> -> vector<2x8x8xf32>
    %149 = vector.shape_cast %148 : vector<2x8x8xf32> to vector<2x64xf32>
    %150 = vector.extract_strided_slice %86 {offsets = [0, 56], sizes = [8, 8], strides = [1, 1]} : vector<8x64xf32> to vector<8x8xf32>
    %151 = vector.extract_strided_slice %107 {offsets = [0, 56], sizes = [8, 8], strides = [1, 1]} : vector<8x64xf32> to vector<8x8xf32>
    %152 = vector.shape_cast %150 : vector<8x8xf32> to vector<1x8x8xf32>
    %153 = vector.shape_cast %151 : vector<8x8xf32> to vector<1x8x8xf32>
    %154 = tpu.concatenate %152, %153 in 0 : vector<1x8x8xf32>, vector<1x8x8xf32> -> vector<2x8x8xf32>
    %155 = vector.shape_cast %154 : vector<2x8x8xf32> to vector<2x64xf32>
    %156 = tpu.concatenate %113, %119, %125, %131, %137, %143, %149, %155 in 0 : vector<2x64xf32>, vector<2x64xf32>, vector<2x64xf32>, vector<2x64xf32>, vector<2x64xf32>, vector<2x64xf32>, vector<2x64xf32>, vector<2x64xf32> -> vector<16x64xf32>
    %c0_48 = arith.constant 0 : index
    %c0_49 = arith.constant 0 : index
    %157 = vector.load %arg15[%c0_48, %c0_49] : memref<64x48xf32, #tpu.memory_space<vmem>>, vector<64x48xf32>
    %c0_50 = arith.constant 0 : index
    %c0_51 = arith.constant 0 : index
    %158 = vector.load %arg16[%c0_50, %c0_51] : memref<16x48xf32, #tpu.memory_space<vmem>>, vector<16x48xf32>
    %c0_52 = arith.constant 0 : index
    %c0_53 = arith.constant 0 : index
    %159 = vector.load %arg17[%c0_52, %c0_53] : memref<1x48xf32, #tpu.memory_space<vmem>>, vector<1x48xf32>
    %c0_54 = arith.constant 0 : index
    %c0_55 = arith.constant 0 : index
    %160 = vector.load %arg18[%c0_54, %c0_55] : memref<1x48xf32, #tpu.memory_space<vmem>>, vector<1x48xf32>
    %cst_56 = arith.constant dense<0.000000e+00> : vector<16x48xf32>
    %161 = tpu.matmul %156, %157, %cst_56 {dimension_numbers = #tpu.dot_dimension_numbers<[1], [0], [0], [1], [0, 0, 1, 1], [], []>} : vector<16x64xf32>, vector<64x48xf32>, vector<16x48xf32> -> vector<16x48xf32>
    %162 = vector.broadcast %159 : vector<1x48xf32> to vector<16x48xf32>
    %163 = arith.addf %161, %162 : vector<16x48xf32>
    %cst_57 = arith.constant 0.000000e+00 : f32
    %164 = vector.broadcast %cst_57 : f32 to vector<2x16xf32>
    %165 = vector.extract_strided_slice %163 {offsets = [0, 0], sizes = [2, 48], strides = [1, 1]} : vector<16x48xf32> to vector<2x48xf32>
    %cst_58 = arith.constant dense<0.000000e+00> : vector<2x48xf32>
    %166 = tpu.matmul %164, %158, %cst_58 {dimension_numbers = #tpu.dot_dimension_numbers<[1], [0], [0], [1], [0, 0, 1, 1], [], []>} : vector<2x16xf32>, vector<16x48xf32>, vector<2x48xf32> -> vector<2x48xf32>
    %167 = vector.broadcast %160 : vector<1x48xf32> to vector<2x48xf32>
    %168 = arith.addf %166, %167 : vector<2x48xf32>
    %169 = vector.extract_strided_slice %165 {offsets = [0, 0], sizes = [2, 32], strides = [1, 1]} : vector<2x48xf32> to vector<2x32xf32>
    %170 = vector.extract_strided_slice %168 {offsets = [0, 0], sizes = [2, 32], strides = [1, 1]} : vector<2x48xf32> to vector<2x32xf32>
    %171 = arith.addf %169, %170 : vector<2x32xf32>
    %172 = arith.negf %171 : vector<2x32xf32>
    %173 = math.exp %172 : vector<2x32xf32>
    %cst_59 = arith.constant 1.000000e+00 : f32
    %174 = vector.broadcast %cst_59 : f32 to vector<2x32xf32>
    %175 = arith.addf %174, %173 : vector<2x32xf32>
    %176 = arith.divf %174, %175 : vector<2x32xf32>
    %177 = vector.extract_strided_slice %176 {offsets = [0, 0], sizes = [2, 16], strides = [1, 1]} : vector<2x32xf32> to vector<2x16xf32>
    %178 = vector.extract_strided_slice %176 {offsets = [0, 16], sizes = [2, 16], strides = [1, 1]} : vector<2x32xf32> to vector<2x16xf32>
    %179 = vector.extract_strided_slice %165 {offsets = [0, 32], sizes = [2, 16], strides = [1, 1]} : vector<2x48xf32> to vector<2x16xf32>
    %180 = vector.extract_strided_slice %168 {offsets = [0, 32], sizes = [2, 16], strides = [1, 1]} : vector<2x48xf32> to vector<2x16xf32>
    %181 = arith.mulf %177, %180 : vector<2x16xf32>
    %182 = arith.addf %179, %181 : vector<2x16xf32>
    %183 = math.tanh %182 : vector<2x16xf32>
    %cst_60 = arith.constant 1.000000e+00 : f32
    %184 = vector.broadcast %cst_60 : f32 to vector<2x16xf32>
    %185 = arith.subf %184, %178 : vector<2x16xf32>
    %186 = arith.mulf %185, %183 : vector<2x16xf32>
    %187 = arith.mulf %178, %164 : vector<2x16xf32>
    %188 = arith.addf %186, %187 : vector<2x16xf32>
    %189 = vector.extract_strided_slice %163 {offsets = [2, 0], sizes = [2, 48], strides = [1, 1]} : vector<16x48xf32> to vector<2x48xf32>
    %cst_61 = arith.constant dense<0.000000e+00> : vector<2x48xf32>
    %190 = tpu.matmul %188, %158, %cst_61 {dimension_numbers = #tpu.dot_dimension_numbers<[1], [0], [0], [1], [0, 0, 1, 1], [], []>} : vector<2x16xf32>, vector<16x48xf32>, vector<2x48xf32> -> vector<2x48xf32>
    %191 = vector.broadcast %160 : vector<1x48xf32> to vector<2x48xf32>
    %192 = arith.addf %190, %191 : vector<2x48xf32>
    %193 = vector.extract_strided_slice %189 {offsets = [0, 0], sizes = [2, 32], strides = [1, 1]} : vector<2x48xf32> to vector<2x32xf32>
    %194 = vector.extract_strided_slice %192 {offsets = [0, 0], sizes = [2, 32], strides = [1, 1]} : vector<2x48xf32> to vector<2x32xf32>
    %195 = arith.addf %193, %194 : vector<2x32xf32>
    %196 = arith.negf %195 : vector<2x32xf32>
    %197 = math.exp %196 : vector<2x32xf32>
    %cst_62 = arith.constant 1.000000e+00 : f32
    %198 = vector.broadcast %cst_62 : f32 to vector<2x32xf32>
    %199 = arith.addf %198, %197 : vector<2x32xf32>
    %200 = arith.divf %198, %199 : vector<2x32xf32>
    %201 = vector.extract_strided_slice %200 {offsets = [0, 0], sizes = [2, 16], strides = [1, 1]} : vector<2x32xf32> to vector<2x16xf32>
    %202 = vector.extract_strided_slice %200 {offsets = [0, 16], sizes = [2, 16], strides = [1, 1]} : vector<2x32xf32> to vector<2x16xf32>
    %203 = vector.extract_strided_slice %189 {offsets = [0, 32], sizes = [2, 16], strides = [1, 1]} : vector<2x48xf32> to vector<2x16xf32>
    %204 = vector.extract_strided_slice %192 {offsets = [0, 32], sizes = [2, 16], strides = [1, 1]} : vector<2x48xf32> to vector<2x16xf32>
    %205 = arith.mulf %201, %204 : vector<2x16xf32>
    %206 = arith.addf %203, %205 : vector<2x16xf32>
    %207 = math.tanh %206 : vector<2x16xf32>
    %cst_63 = arith.constant 1.000000e+00 : f32
    %208 = vector.broadcast %cst_63 : f32 to vector<2x16xf32>
    %209 = arith.subf %208, %202 : vector<2x16xf32>
    %210 = arith.mulf %209, %207 : vector<2x16xf32>
    %211 = arith.mulf %202, %188 : vector<2x16xf32>
    %212 = arith.addf %210, %211 : vector<2x16xf32>
    %213 = vector.extract_strided_slice %163 {offsets = [4, 0], sizes = [2, 48], strides = [1, 1]} : vector<16x48xf32> to vector<2x48xf32>
    %cst_64 = arith.constant dense<0.000000e+00> : vector<2x48xf32>
    %214 = tpu.matmul %212, %158, %cst_64 {dimension_numbers = #tpu.dot_dimension_numbers<[1], [0], [0], [1], [0, 0, 1, 1], [], []>} : vector<2x16xf32>, vector<16x48xf32>, vector<2x48xf32> -> vector<2x48xf32>
    %215 = vector.broadcast %160 : vector<1x48xf32> to vector<2x48xf32>
    %216 = arith.addf %214, %215 : vector<2x48xf32>
    %217 = vector.extract_strided_slice %213 {offsets = [0, 0], sizes = [2, 32], strides = [1, 1]} : vector<2x48xf32> to vector<2x32xf32>
    %218 = vector.extract_strided_slice %216 {offsets = [0, 0], sizes = [2, 32], strides = [1, 1]} : vector<2x48xf32> to vector<2x32xf32>
    %219 = arith.addf %217, %218 : vector<2x32xf32>
    %220 = arith.negf %219 : vector<2x32xf32>
    %221 = math.exp %220 : vector<2x32xf32>
    %cst_65 = arith.constant 1.000000e+00 : f32
    %222 = vector.broadcast %cst_65 : f32 to vector<2x32xf32>
    %223 = arith.addf %222, %221 : vector<2x32xf32>
    %224 = arith.divf %222, %223 : vector<2x32xf32>
    %225 = vector.extract_strided_slice %224 {offsets = [0, 0], sizes = [2, 16], strides = [1, 1]} : vector<2x32xf32> to vector<2x16xf32>
    %226 = vector.extract_strided_slice %224 {offsets = [0, 16], sizes = [2, 16], strides = [1, 1]} : vector<2x32xf32> to vector<2x16xf32>
    %227 = vector.extract_strided_slice %213 {offsets = [0, 32], sizes = [2, 16], strides = [1, 1]} : vector<2x48xf32> to vector<2x16xf32>
    %228 = vector.extract_strided_slice %216 {offsets = [0, 32], sizes = [2, 16], strides = [1, 1]} : vector<2x48xf32> to vector<2x16xf32>
    %229 = arith.mulf %225, %228 : vector<2x16xf32>
    %230 = arith.addf %227, %229 : vector<2x16xf32>
    %231 = math.tanh %230 : vector<2x16xf32>
    %cst_66 = arith.constant 1.000000e+00 : f32
    %232 = vector.broadcast %cst_66 : f32 to vector<2x16xf32>
    %233 = arith.subf %232, %226 : vector<2x16xf32>
    %234 = arith.mulf %233, %231 : vector<2x16xf32>
    %235 = arith.mulf %226, %212 : vector<2x16xf32>
    %236 = arith.addf %234, %235 : vector<2x16xf32>
    %237 = vector.extract_strided_slice %163 {offsets = [6, 0], sizes = [2, 48], strides = [1, 1]} : vector<16x48xf32> to vector<2x48xf32>
    %cst_67 = arith.constant dense<0.000000e+00> : vector<2x48xf32>
    %238 = tpu.matmul %236, %158, %cst_67 {dimension_numbers = #tpu.dot_dimension_numbers<[1], [0], [0], [1], [0, 0, 1, 1], [], []>} : vector<2x16xf32>, vector<16x48xf32>, vector<2x48xf32> -> vector<2x48xf32>
    %239 = vector.broadcast %160 : vector<1x48xf32> to vector<2x48xf32>
    %240 = arith.addf %238, %239 : vector<2x48xf32>
    %241 = vector.extract_strided_slice %237 {offsets = [0, 0], sizes = [2, 32], strides = [1, 1]} : vector<2x48xf32> to vector<2x32xf32>
    %242 = vector.extract_strided_slice %240 {offsets = [0, 0], sizes = [2, 32], strides = [1, 1]} : vector<2x48xf32> to vector<2x32xf32>
    %243 = arith.addf %241, %242 : vector<2x32xf32>
    %244 = arith.negf %243 : vector<2x32xf32>
    %245 = math.exp %244 : vector<2x32xf32>
    %cst_68 = arith.constant 1.000000e+00 : f32
    %246 = vector.broadcast %cst_68 : f32 to vector<2x32xf32>
    %247 = arith.addf %246, %245 : vector<2x32xf32>
    %248 = arith.divf %246, %247 : vector<2x32xf32>
    %249 = vector.extract_strided_slice %248 {offsets = [0, 0], sizes = [2, 16], strides = [1, 1]} : vector<2x32xf32> to vector<2x16xf32>
    %250 = vector.extract_strided_slice %248 {offsets = [0, 16], sizes = [2, 16], strides = [1, 1]} : vector<2x32xf32> to vector<2x16xf32>
    %251 = vector.extract_strided_slice %237 {offsets = [0, 32], sizes = [2, 16], strides = [1, 1]} : vector<2x48xf32> to vector<2x16xf32>
    %252 = vector.extract_strided_slice %240 {offsets = [0, 32], sizes = [2, 16], strides = [1, 1]} : vector<2x48xf32> to vector<2x16xf32>
    %253 = arith.mulf %249, %252 : vector<2x16xf32>
    %254 = arith.addf %251, %253 : vector<2x16xf32>
    %255 = math.tanh %254 : vector<2x16xf32>
    %cst_69 = arith.constant 1.000000e+00 : f32
    %256 = vector.broadcast %cst_69 : f32 to vector<2x16xf32>
    %257 = arith.subf %256, %250 : vector<2x16xf32>
    %258 = arith.mulf %257, %255 : vector<2x16xf32>
    %259 = arith.mulf %250, %236 : vector<2x16xf32>
    %260 = arith.addf %258, %259 : vector<2x16xf32>
    %261 = vector.extract_strided_slice %163 {offsets = [8, 0], sizes = [2, 48], strides = [1, 1]} : vector<16x48xf32> to vector<2x48xf32>
    %cst_70 = arith.constant dense<0.000000e+00> : vector<2x48xf32>
    %262 = tpu.matmul %260, %158, %cst_70 {dimension_numbers = #tpu.dot_dimension_numbers<[1], [0], [0], [1], [0, 0, 1, 1], [], []>} : vector<2x16xf32>, vector<16x48xf32>, vector<2x48xf32> -> vector<2x48xf32>
    %263 = vector.broadcast %160 : vector<1x48xf32> to vector<2x48xf32>
    %264 = arith.addf %262, %263 : vector<2x48xf32>
    %265 = vector.extract_strided_slice %261 {offsets = [0, 0], sizes = [2, 32], strides = [1, 1]} : vector<2x48xf32> to vector<2x32xf32>
    %266 = vector.extract_strided_slice %264 {offsets = [0, 0], sizes = [2, 32], strides = [1, 1]} : vector<2x48xf32> to vector<2x32xf32>
    %267 = arith.addf %265, %266 : vector<2x32xf32>
    %268 = arith.negf %267 : vector<2x32xf32>
    %269 = math.exp %268 : vector<2x32xf32>
    %cst_71 = arith.constant 1.000000e+00 : f32
    %270 = vector.broadcast %cst_71 : f32 to vector<2x32xf32>
    %271 = arith.addf %270, %269 : vector<2x32xf32>
    %272 = arith.divf %270, %271 : vector<2x32xf32>
    %273 = vector.extract_strided_slice %272 {offsets = [0, 0], sizes = [2, 16], strides = [1, 1]} : vector<2x32xf32> to vector<2x16xf32>
    %274 = vector.extract_strided_slice %272 {offsets = [0, 16], sizes = [2, 16], strides = [1, 1]} : vector<2x32xf32> to vector<2x16xf32>
    %275 = vector.extract_strided_slice %261 {offsets = [0, 32], sizes = [2, 16], strides = [1, 1]} : vector<2x48xf32> to vector<2x16xf32>
    %276 = vector.extract_strided_slice %264 {offsets = [0, 32], sizes = [2, 16], strides = [1, 1]} : vector<2x48xf32> to vector<2x16xf32>
    %277 = arith.mulf %273, %276 : vector<2x16xf32>
    %278 = arith.addf %275, %277 : vector<2x16xf32>
    %279 = math.tanh %278 : vector<2x16xf32>
    %cst_72 = arith.constant 1.000000e+00 : f32
    %280 = vector.broadcast %cst_72 : f32 to vector<2x16xf32>
    %281 = arith.subf %280, %274 : vector<2x16xf32>
    %282 = arith.mulf %281, %279 : vector<2x16xf32>
    %283 = arith.mulf %274, %260 : vector<2x16xf32>
    %284 = arith.addf %282, %283 : vector<2x16xf32>
    %285 = vector.extract_strided_slice %163 {offsets = [10, 0], sizes = [2, 48], strides = [1, 1]} : vector<16x48xf32> to vector<2x48xf32>
    %cst_73 = arith.constant dense<0.000000e+00> : vector<2x48xf32>
    %286 = tpu.matmul %284, %158, %cst_73 {dimension_numbers = #tpu.dot_dimension_numbers<[1], [0], [0], [1], [0, 0, 1, 1], [], []>} : vector<2x16xf32>, vector<16x48xf32>, vector<2x48xf32> -> vector<2x48xf32>
    %287 = vector.broadcast %160 : vector<1x48xf32> to vector<2x48xf32>
    %288 = arith.addf %286, %287 : vector<2x48xf32>
    %289 = vector.extract_strided_slice %285 {offsets = [0, 0], sizes = [2, 32], strides = [1, 1]} : vector<2x48xf32> to vector<2x32xf32>
    %290 = vector.extract_strided_slice %288 {offsets = [0, 0], sizes = [2, 32], strides = [1, 1]} : vector<2x48xf32> to vector<2x32xf32>
    %291 = arith.addf %289, %290 : vector<2x32xf32>
    %292 = arith.negf %291 : vector<2x32xf32>
    %293 = math.exp %292 : vector<2x32xf32>
    %cst_74 = arith.constant 1.000000e+00 : f32
    %294 = vector.broadcast %cst_74 : f32 to vector<2x32xf32>
    %295 = arith.addf %294, %293 : vector<2x32xf32>
    %296 = arith.divf %294, %295 : vector<2x32xf32>
    %297 = vector.extract_strided_slice %296 {offsets = [0, 0], sizes = [2, 16], strides = [1, 1]} : vector<2x32xf32> to vector<2x16xf32>
    %298 = vector.extract_strided_slice %296 {offsets = [0, 16], sizes = [2, 16], strides = [1, 1]} : vector<2x32xf32> to vector<2x16xf32>
    %299 = vector.extract_strided_slice %285 {offsets = [0, 32], sizes = [2, 16], strides = [1, 1]} : vector<2x48xf32> to vector<2x16xf32>
    %300 = vector.extract_strided_slice %288 {offsets = [0, 32], sizes = [2, 16], strides = [1, 1]} : vector<2x48xf32> to vector<2x16xf32>
    %301 = arith.mulf %297, %300 : vector<2x16xf32>
    %302 = arith.addf %299, %301 : vector<2x16xf32>
    %303 = math.tanh %302 : vector<2x16xf32>
    %cst_75 = arith.constant 1.000000e+00 : f32
    %304 = vector.broadcast %cst_75 : f32 to vector<2x16xf32>
    %305 = arith.subf %304, %298 : vector<2x16xf32>
    %306 = arith.mulf %305, %303 : vector<2x16xf32>
    %307 = arith.mulf %298, %284 : vector<2x16xf32>
    %308 = arith.addf %306, %307 : vector<2x16xf32>
    %309 = vector.extract_strided_slice %163 {offsets = [12, 0], sizes = [2, 48], strides = [1, 1]} : vector<16x48xf32> to vector<2x48xf32>
    %cst_76 = arith.constant dense<0.000000e+00> : vector<2x48xf32>
    %310 = tpu.matmul %308, %158, %cst_76 {dimension_numbers = #tpu.dot_dimension_numbers<[1], [0], [0], [1], [0, 0, 1, 1], [], []>} : vector<2x16xf32>, vector<16x48xf32>, vector<2x48xf32> -> vector<2x48xf32>
    %311 = vector.broadcast %160 : vector<1x48xf32> to vector<2x48xf32>
    %312 = arith.addf %310, %311 : vector<2x48xf32>
    %313 = vector.extract_strided_slice %309 {offsets = [0, 0], sizes = [2, 32], strides = [1, 1]} : vector<2x48xf32> to vector<2x32xf32>
    %314 = vector.extract_strided_slice %312 {offsets = [0, 0], sizes = [2, 32], strides = [1, 1]} : vector<2x48xf32> to vector<2x32xf32>
    %315 = arith.addf %313, %314 : vector<2x32xf32>
    %316 = arith.negf %315 : vector<2x32xf32>
    %317 = math.exp %316 : vector<2x32xf32>
    %cst_77 = arith.constant 1.000000e+00 : f32
    %318 = vector.broadcast %cst_77 : f32 to vector<2x32xf32>
    %319 = arith.addf %318, %317 : vector<2x32xf32>
    %320 = arith.divf %318, %319 : vector<2x32xf32>
    %321 = vector.extract_strided_slice %320 {offsets = [0, 0], sizes = [2, 16], strides = [1, 1]} : vector<2x32xf32> to vector<2x16xf32>
    %322 = vector.extract_strided_slice %320 {offsets = [0, 16], sizes = [2, 16], strides = [1, 1]} : vector<2x32xf32> to vector<2x16xf32>
    %323 = vector.extract_strided_slice %309 {offsets = [0, 32], sizes = [2, 16], strides = [1, 1]} : vector<2x48xf32> to vector<2x16xf32>
    %324 = vector.extract_strided_slice %312 {offsets = [0, 32], sizes = [2, 16], strides = [1, 1]} : vector<2x48xf32> to vector<2x16xf32>
    %325 = arith.mulf %321, %324 : vector<2x16xf32>
    %326 = arith.addf %323, %325 : vector<2x16xf32>
    %327 = math.tanh %326 : vector<2x16xf32>
    %cst_78 = arith.constant 1.000000e+00 : f32
    %328 = vector.broadcast %cst_78 : f32 to vector<2x16xf32>
    %329 = arith.subf %328, %322 : vector<2x16xf32>
    %330 = arith.mulf %329, %327 : vector<2x16xf32>
    %331 = arith.mulf %322, %308 : vector<2x16xf32>
    %332 = arith.addf %330, %331 : vector<2x16xf32>
    %333 = vector.extract_strided_slice %163 {offsets = [14, 0], sizes = [2, 48], strides = [1, 1]} : vector<16x48xf32> to vector<2x48xf32>
    %cst_79 = arith.constant dense<0.000000e+00> : vector<2x48xf32>
    %334 = tpu.matmul %332, %158, %cst_79 {dimension_numbers = #tpu.dot_dimension_numbers<[1], [0], [0], [1], [0, 0, 1, 1], [], []>} : vector<2x16xf32>, vector<16x48xf32>, vector<2x48xf32> -> vector<2x48xf32>
    %335 = vector.broadcast %160 : vector<1x48xf32> to vector<2x48xf32>
    %336 = arith.addf %334, %335 : vector<2x48xf32>
    %337 = vector.extract_strided_slice %333 {offsets = [0, 0], sizes = [2, 32], strides = [1, 1]} : vector<2x48xf32> to vector<2x32xf32>
    %338 = vector.extract_strided_slice %336 {offsets = [0, 0], sizes = [2, 32], strides = [1, 1]} : vector<2x48xf32> to vector<2x32xf32>
    %339 = arith.addf %337, %338 : vector<2x32xf32>
    %340 = arith.negf %339 : vector<2x32xf32>
    %341 = math.exp %340 : vector<2x32xf32>
    %cst_80 = arith.constant 1.000000e+00 : f32
    %342 = vector.broadcast %cst_80 : f32 to vector<2x32xf32>
    %343 = arith.addf %342, %341 : vector<2x32xf32>
    %344 = arith.divf %342, %343 : vector<2x32xf32>
    %345 = vector.extract_strided_slice %344 {offsets = [0, 0], sizes = [2, 16], strides = [1, 1]} : vector<2x32xf32> to vector<2x16xf32>
    %346 = vector.extract_strided_slice %344 {offsets = [0, 16], sizes = [2, 16], strides = [1, 1]} : vector<2x32xf32> to vector<2x16xf32>
    %347 = vector.extract_strided_slice %333 {offsets = [0, 32], sizes = [2, 16], strides = [1, 1]} : vector<2x48xf32> to vector<2x16xf32>
    %348 = vector.extract_strided_slice %336 {offsets = [0, 32], sizes = [2, 16], strides = [1, 1]} : vector<2x48xf32> to vector<2x16xf32>
    %349 = arith.mulf %345, %348 : vector<2x16xf32>
    %350 = arith.addf %347, %349 : vector<2x16xf32>
    %351 = math.tanh %350 : vector<2x16xf32>
    %cst_81 = arith.constant 1.000000e+00 : f32
    %352 = vector.broadcast %cst_81 : f32 to vector<2x16xf32>
    %353 = arith.subf %352, %346 : vector<2x16xf32>
    %354 = arith.mulf %353, %351 : vector<2x16xf32>
    %355 = arith.mulf %346, %332 : vector<2x16xf32>
    %356 = arith.addf %354, %355 : vector<2x16xf32>
    %357 = vector.shape_cast %188 : vector<2x16xf32> to vector<1x2x16xf32>
    %358 = vector.shape_cast %212 : vector<2x16xf32> to vector<1x2x16xf32>
    %359 = vector.shape_cast %236 : vector<2x16xf32> to vector<1x2x16xf32>
    %360 = vector.shape_cast %260 : vector<2x16xf32> to vector<1x2x16xf32>
    %361 = vector.shape_cast %284 : vector<2x16xf32> to vector<1x2x16xf32>
    %362 = vector.shape_cast %308 : vector<2x16xf32> to vector<1x2x16xf32>
    %363 = vector.shape_cast %332 : vector<2x16xf32> to vector<1x2x16xf32>
    %364 = vector.shape_cast %356 : vector<2x16xf32> to vector<1x2x16xf32>
    %365 = tpu.concatenate %357, %358, %359, %360, %361, %362, %363, %364 in 0 : vector<1x2x16xf32>, vector<1x2x16xf32>, vector<1x2x16xf32>, vector<1x2x16xf32>, vector<1x2x16xf32>, vector<1x2x16xf32>, vector<1x2x16xf32>, vector<1x2x16xf32> -> vector<8x2x16xf32>
    %c0_82 = arith.constant 0 : index
    %c0_83 = arith.constant 0 : index
    %366 = vector.load %arg19[%c0_82, %c0_83] : memref<1x16xf32, #tpu.memory_space<vmem>>, vector<1x16xf32>
    %c0_84 = arith.constant 0 : index
    %c0_85 = arith.constant 0 : index
    %367 = memref.load %arg20[%c0_84, %c0_85] : memref<1x1xf32, #tpu.memory_space<smem>>
    %368 = vector.shape_cast %366 : vector<1x16xf32> to vector<1x1x16xf32>
    %369 = vector.broadcast %368 : vector<1x1x16xf32> to vector<8x2x16xf32>
    %370 = arith.mulf %365, %369 : vector<8x2x16xf32>
    %cst_86 = arith.constant dense<0.000000e+00> : vector<8x2xf32>
    %371 = vector.multi_reduction <add>, %370, %cst_86 [2] : vector<8x2x16xf32> to vector<8x2xf32>
    %372 = vector.shape_cast %371 : vector<8x2xf32> to vector<8x2x1xf32>
    %373 = vector.broadcast %367 : f32 to vector<8x2x1xf32>
    %374 = arith.addf %372, %373 : vector<8x2x1xf32>
    %cst_87 = arith.constant dense<0xFF800000> : vector<2x1xf32>
    %375 = vector.multi_reduction <maximumf>, %374, %cst_87 [0] : vector<8x2x1xf32> to vector<2x1xf32>
    %cst_88 = arith.constant 0xFF800000 : f32
    %376 = vector.broadcast %cst_88 : f32 to vector<2x1xf32>
    %377 = arith.maximumf %376, %375 : vector<2x1xf32>
    %378 = vector.shape_cast %377 : vector<2x1xf32> to vector<1x2x1xf32>
    %379 = vector.broadcast %378 : vector<1x2x1xf32> to vector<8x2x1xf32>
    %380 = arith.subf %374, %379 : vector<8x2x1xf32>
    %381 = math.exp %380 : vector<8x2x1xf32>
    %cst_89 = arith.constant dense<0.000000e+00> : vector<2x1xf32>
    %382 = vector.multi_reduction <add>, %381, %cst_89 [0] : vector<8x2x1xf32> to vector<2x1xf32>
    %383 = vector.shape_cast %382 : vector<2x1xf32> to vector<1x2x1xf32>
    %384 = vector.broadcast %383 : vector<1x2x1xf32> to vector<8x2x1xf32>
    %385 = arith.divf %381, %384 : vector<8x2x1xf32>
    %386 = vector.broadcast %385 : vector<8x2x1xf32> to vector<8x2x16xf32>
    %387 = arith.mulf %365, %386 : vector<8x2x16xf32>
    %cst_90 = arith.constant dense<0.000000e+00> : vector<2x16xf32>
    %388 = vector.multi_reduction <add>, %387, %cst_90 [0] : vector<8x2x16xf32> to vector<2x16xf32>
    %c0_91 = arith.constant 0 : index
    %c0_92 = arith.constant 0 : index
    %c0_93 = arith.constant 0 : index
    %389 = vector.load %arg21[%c0_91, %c0_92, %c0_93] : memref<1x2x16xf32, #tpu.memory_space<vmem>>, vector<1x2x16xf32>
    %390 = vector.shape_cast %389 : vector<1x2x16xf32> to vector<2x16xf32>
    %391 = vector.shape_cast %388 : vector<2x16xf32> to vector<1x2x16xf32>
    tpu.vector_store %arg21[%c0_91, %c0_92, %c0_93], %391 {strides = array<i32>} : memref<1x2x16xf32, #tpu.memory_space<vmem>>, vector<1x2x16xf32>,
    return
  }
  func.func @transform_0(%arg0: i32) -> (i32, i32, i32) {
    %c0_i32 = arith.constant 0 : i32
    %c0_i32_0 = arith.constant 0 : i32
    %c0_i32_1 = arith.constant 0 : i32
    return %arg0, %c0_i32, %c0_i32_0 : i32, i32, i32
  }
  func.func @transform_1(%arg0: i32) -> (i32, i32) {
    %c0_i32 = arith.constant 0 : i32
    %c0_i32_0 = arith.constant 0 : i32
    %c0_i32_1 = arith.constant 0 : i32
    return %c0_i32, %c0_i32_0 : i32, i32
  }
  func.func @transform_2(%arg0: i32) -> (i32, i32) {
    %c0_i32 = arith.constant 0 : i32
    %c0_i32_0 = arith.constant 0 : i32
    %c0_i32_1 = arith.constant 0 : i32
    return %c0_i32, %c0_i32_0 : i32, i32
  }
  func.func @transform_3(%arg0: i32) -> (i32, i32) {
    %c0_i32 = arith.constant 0 : i32
    %c0_i32_0 = arith.constant 0 : i32
    %c0_i32_1 = arith.constant 0 : i32
    return %c0_i32, %c0_i32_0 : i32, i32
  }
  func.func @transform_4(%arg0: i32) -> (i32, i32) {
    %c0_i32 = arith.constant 0 : i32
    %c0_i32_0 = arith.constant 0 : i32
    %c0_i32_1 = arith.constant 0 : i32
    return %c0_i32, %c0_i32_0 : i32, i32
  }
  func.func @transform_5(%arg0: i32) -> (i32, i32) {
    %c0_i32 = arith.constant 0 : i32
    %c0_i32_0 = arith.constant 0 : i32
    %c0_i32_1 = arith.constant 0 : i32
    return %c0_i32, %c0_i32_0 : i32, i32
  }
  func.func @transform_6(%arg0: i32) -> (i32, i32) {
    %c0_i32 = arith.constant 0 : i32
    %c0_i32_0 = arith.constant 0 : i32
    %c0_i32_1 = arith.constant 0 : i32
    return %c0_i32, %c0_i32_0 : i32, i32
  }
  func.func @transform_7(%arg0: i32) -> (i32, i32) {
    %c0_i32 = arith.constant 0 : i32
    %c0_i32_0 = arith.constant 0 : i32
    %c0_i32_1 = arith.constant 0 : i32
    return %c0_i32, %c0_i32_0 : i32, i32
  }
  func.func @transform_8(%arg0: i32) -> (i32, i32) {
    %c0_i32 = arith.constant 0 : i32
    %c0_i32_0 = arith.constant 0 : i32
    %c0_i32_1 = arith.constant 0 : i32
    return %c0_i32, %c0_i32_0 : i32, i32
  }
  func.func @transform_9(%arg0: i32) -> (i32, i32) {
    %c0_i32 = arith.constant 0 : i32
    %c0_i32_0 = arith.constant 0 : i32
    %c0_i32_1 = arith.constant 0 : i32
    return %c0_i32, %c0_i32_0 : i32, i32
  }
  func.func @transform_10(%arg0: i32) -> (i32, i32) {
    %c0_i32 = arith.constant 0 : i32
    %c0_i32_0 = arith.constant 0 : i32
    %c0_i32_1 = arith.constant 0 : i32
    return %c0_i32, %c0_i32_0 : i32, i32
  }
  func.func @transform_11(%arg0: i32) -> (i32, i32) {
    %c0_i32 = arith.constant 0 : i32
    %c0_i32_0 = arith.constant 0 : i32
    %c0_i32_1 = arith.constant 0 : i32
    return %c0_i32, %c0_i32_0 : i32, i32
  }
  func.func @transform_12(%arg0: i32) -> (i32, i32) {
    %c0_i32 = arith.constant 0 : i32
    %c0_i32_0 = arith.constant 0 : i32
    %c0_i32_1 = arith.constant 0 : i32
    return %c0_i32, %c0_i32_0 : i32, i32
  }
  func.func @transform_13(%arg0: i32) -> (i32, i32) {
    %c0_i32 = arith.constant 0 : i32
    %c0_i32_0 = arith.constant 0 : i32
    %c0_i32_1 = arith.constant 0 : i32
    return %c0_i32, %c0_i32_0 : i32, i32
  }
  func.func @transform_14(%arg0: i32) -> (i32, i32) {
    %c0_i32 = arith.constant 0 : i32
    %c0_i32_0 = arith.constant 0 : i32
    %c0_i32_1 = arith.constant 0 : i32
    return %c0_i32, %c0_i32_0 : i32, i32
  }
  func.func @transform_15(%arg0: i32) -> (i32, i32) {
    %c0_i32 = arith.constant 0 : i32
    %c0_i32_0 = arith.constant 0 : i32
    %c0_i32_1 = arith.constant 0 : i32
    return %c0_i32, %c0_i32_0 : i32, i32
  }
  func.func @transform_16(%arg0: i32) -> (i32, i32) {
    %c0_i32 = arith.constant 0 : i32
    %c0_i32_0 = arith.constant 0 : i32
    %c0_i32_1 = arith.constant 0 : i32
    return %c0_i32, %c0_i32_0 : i32, i32
  }
  func.func @transform_17(%arg0: i32) -> (i32, i32) {
    %c0_i32 = arith.constant 0 : i32
    %c0_i32_0 = arith.constant 0 : i32
    %c0_i32_1 = arith.constant 0 : i32
    return %c0_i32, %c0_i32_0 : i32, i32
  }
  func.func @transform_18(%arg0: i32) -> (i32, i32) {
    %c0_i32 = arith.constant 0 : i32
    %c0_i32_0 = arith.constant 0 : i32
    %c0_i32_1 = arith.constant 0 : i32
    return %c0_i32, %c0_i32_0 : i32, i32
  }
  func.func @transform_19(%arg0: i32) -> (i32, i32) {
    %c0_i32 = arith.constant 0 : i32
    %c0_i32_0 = arith.constant 0 : i32
    %c0_i32_1 = arith.constant 0 : i32
    return %c0_i32, %c0_i32_0 : i32, i32
  }
  func.func @transform_20(%arg0: i32) -> (i32, i32, i32) {
    %c0_i32 = arith.constant 0 : i32
    %c0_i32_0 = arith.constant 0 : i32
    %c0_i32_1 = arith.constant 0 : i32
    return %arg0, %c0_i32, %c0_i32_0 : i32, i32, i32
  }
}

</mosaic_0001>

<bundles_post_ra>
// kernel: feature_extractor_forward.1
= control target key start
LH: loop header
LB: loop body
LE: loop exit
PB: predicated region body
PF: predicated region fallthrough
CT: control target
= control target key end

     0   :  { %s5696_s0 = inlined_call_operand.vmem [shape: f32[2,4,256], index: 0, kind: input, shape index: {}]   ;;  %s5697_s1 = inlined_call_operand.vmem [shape: f32[8,12], index: 1, kind: input, shape index: {}]   ;;  %s5698_s2 = inlined_call_operand.vmem [shape: f32[8,1], index: 2, kind: input, shape index: {}]   ;;  %s5699_s3 = inlined_call_operand.vmem [shape: f32[8,24], index: 3, kind: input, shape index: {}]   ;;  %s5700_s4 = inlined_call_operand.vmem [shape: f32[8,1], index: 4, kind: input, shape index: {}]   ;;  %s5701_s5 = inlined_call_operand.vmem [shape: f32[8,24], index: 5, kind: input, shape index: {}]   ;;  %s5702_s6 = inlined_call_operand.vmem [shape: f32[8,1], index: 6, kind: input, shape index: {}]   ;;  %s5703_s7 = inlined_call_operand.vmem [shape: f32[8,24], index: 7, kind: input, shape index: {}]   ;;  %s5704_s8 = inlined_call_operand.vmem [shape: f32[8,1], index: 8, kind: input, shape index: {}]   ;;  %s5705_s9 = inlined_call_operand.vmem [shape: f32[4,8], index: 9, kind: input, shape index: {}]   ;;  %s5706_s10 = inlined_call_operand.vmem [shape: f32[4,8], index: 10, kind: input, shape index: {}]   ;;  %s5707_s11 = inlined_call_operand.vmem [shape: f32[8,8], index: 11, kind: input, shape index: {}]   ;;  %s5708_s12 = inlined_call_operand.<no memory space> [shape: f32[1,1], index: 12, kind: input, shape index: {}]   ;;  %s5709_s13 = inlined_call_operand.vmem [shape: f32[64,64], index: 13, kind: input, shape index: {}]   ;;  %s5710_s14 = inlined_call_operand.vmem [shape: f32[64,48], index: 14, kind: input, shape index: {}]   ;;  %s5711_s15 = inlined_call_operand.vmem [shape: f32[16,48], index: 15, kind: input, shape index: {}]   ;;  %s5712_s16 = inlined_call_operand.vmem [shape: f32[1,48], index: 16, kind: input, shape index: {}]   ;;  %s5713_s17 = inlined_call_operand.vmem [shape: f32[1,48], index: 17, kind: input, shape index: {}]   ;;  %s5714_s18 = inlined_call_operand.vmem [shape: f32[1,16], index: 18, kind: input, shape index: {}]   ;;  %s5715_s19 = inlined_call_operand.<no memory space> [shape: f32[1,1], index: 19, kind: input, shape index: {}]   ;;  %s5716_s20 = inlined_call_operand.hbm [shape: f32[2,2,16], index: 20, kind: output, shape index: {}]  }
   0x1   :  { %5729 = sst [smem:[#allocation9_spill]] %s5696_s0 }
   0x2   :  { %5730 = sst [smem:[#allocation10_spill]] %s5697_s1 }
   0x3   :  { %5731 = sst [smem:[#allocation11_spill]] %s5698_s2 }
   0x4   :  { %5732 = sst [smem:[#allocation12_spill]] %s5699_s3 }
   0x5   :  { %5733 = sst [smem:[#allocation13_spill]] %s5700_s4 }
   0x6   :  { %5734 = sst [smem:[#allocation14_spill]] %s5701_s5 }
   0x7   :  { %5735 = sst [smem:[#allocation15_spill]] %s5702_s6 }
   0x8   :  { %25 = sst [smem:[#allocation2]] %s5708_s12 }
   0x9   :  { %26 = sst [smem:[#allocation3]] %s5715_s19 }
   0xa   :  { %27 = vsyncpa [#allocation5], 0 }
   0xb   :  { %29 = vsyncpa [#allocation5 + $0x1], 0  ;;  %s4633_s2 = smov 0   ;;  %s4635_s25 = smov 0  }
   0xc   :  { %s4637_s3 = smov 0   ;;  %s4639_s26 = smov 0  }
   0xd LB: > { %5736 = sst [smem:[#allocation7_spill]] %s4496_s3  ;;  %s4654_s12 = sadd.s32 4294967295, %s4500_s26   ;;  %s4500_s26 = sphi %s4639_s26, %s5757_s26   ;;  %s4496_s3 = sphi %s4637_s3, %s5754_s3   ;;  %s4492_s25 = sphi %s4635_s25, %s5756_s25   ;;  %s4488_s2 = sphi %s4633_s2, %s5755_s2  }
   0xe   : > { %s4005_s19 = sadd.s32 4294967294, %s4500_s26   ;;  %s4658_s27 = sadd.s32 1, %s4500_s26  }
   0xf   : > { %s467_s28 = sadd.s32 1, %s4496_s3  ;;  %s464_s4 = ssub.s32 %s4500_s26, %s4658_s27 }
  0x10   : > { %p477_p0 = scmp.ne.s32.totalorder %s4496_s3, %s4492_s25  ;;  %p465_p1 = scmp.eq.s32.totalorder %s464_s4, 0 }
  0x11   : > { %p478_p2 = scmp.eq.s32.totalorder %s4654_s12, 1  ;;  %p483_p3 = scmp.ne.s32.totalorder %s4492_s25, %s4488_s2 }
  0x12   : > { %p484_p4 = scmp.eq.s32.totalorder %s4005_s19, 1  ;;  %p4008_p7 = scmp.ge.s32.totalorder %s4500_s26, 1 }
  0x13   : > { %s4669_s29 = scalar_select %p465_p1, %s4496_s3, %s467_s28  }
  0x14   : > { %p4671_p5 = por %p478_p2, %p477_p0  ;;  %p4675_p6 = por %p484_p4, %p483_p3 }
  0x15   : > { %5737 = sst [smem:[#allocation8_spill]] %s4669_s29  ;;  %p567_p8 = scmp.lt.s32.totalorder %s4500_s26, 3 }
  0x17   : > { %p568_p9 = pnand %p4008_p7, %p567_p8 }
  0x18   : > { %p625_p10 = scmp.lt.s32.totalorder (!%p568_p9), %s4654_s12, 1  ;;  %s5740_s24 = sld [smem:[#allocation9_spill]] (!%p568_p9) }
  0x19   : > { %571 = sbr.rel (%p568_p9) target bundleno = 8247 (0x2037), region = 100  ;;  %s5720_s28 = smov (!%p568_p9), 112  }
  0x1a   : > { %s5718_s4 = smov (!%p568_p9), 120   ;;  %s5741_s3 = sld [smem:[#allocation11_spill]] (!%p568_p9) }
  0x1b   : > { %s5745_s6 = sld [smem:[#allocation15_spill]] (!%p568_p9)  ;;  %s5725_s29 = smov (!%p568_p9), 96  }
  0x1c   : > { %s5746_s5 = sld [smem:[#allocation14_spill]] (!%p568_p9)  ;;  %s5722_s22 = smov (!%p568_p9), 16  }
  0x1d   : > { %s4515_s23 = smov (!%p568_p9), 8  }
  0x1e   : > { %s626_s21 = scalar_select %p625_p10, %s4654_s12, 1  ;;  %v4502_v0 = vmov 0.0   ;;  %v4503_v1 = vmov 0   ;;  %vm637_vm0 = vcmask 982016   ;;  %vm646_vm1 = vcmask 916480   ;;  %v977_v59 = vld [vmem:[%s5704_s8] sm:$0xff] }
  0x1f   : > { %740 = vmatprep.mubr.f32.mxu0 %v4502_v0  ;;  %844 = vmatprep.mubr.f32.mxu1 %v4502_v0  ;;  %vm657_vm2 = vcmask 1043456   ;;  %vm667_vm3 = vcmask 97280   ;;  %vm776_vm4 = vcmask 195584   ;;  %vm1069_vm5 = vcmask 64512  }
  0x20   : > { %s4065_s1 = sshll.u32 %s626_s21, 3  ;;  %4335 = vset.pattern.permute.xlu0 %v4503_v1  ;;  %4336 = vset.pattern.permute.xlu1 %v4503_v1  ;;  %v661_v4 = vld [vmem:[%s5741_s3] sm:$0xff]  ;;  %s5744_s3 = sld [smem:[#allocation12_spill]]  ;;  %vm1326_vm6 = vcmask 31744   ;;  %vm4506_vm7 = vmmov 0   ;;  %vm1459_vm8 = vcmask 523264  }
  0x21   : > { %s629_s19 = scalar_lea.vmem %s5740_s24, %s4065_s1  ;;  %s5742_s1 = sld [smem:[#allocation10_spill]]  ;;  %v874_v42 = vld [vmem:[%s5745_s6] sm:$0xff]  ;;  %vm2020_vm9 = vcmask 130048   ;;  %vm2023_vm10 = vcmask 261120   ;;  %vm2025_vm11 = vcmask 326656   ;;  %vm2027_vm12 = vcmask 392192  }
  0x22   : > { %v630_v2 = vld [vmem:[%s629_s19] sm:$0xff]  ;;  %s5743_s24 = sld [smem:[#allocation13_spill]]  ;;  %s4507_s19 = smov 88   ;;  %vm2029_vm13 = vcmask 457728   ;;  %vm2800_vm14 = vcmask 1041408   ;;  %vm2803_vm15 = vcmask 1045504  }
  0x23   : > { %642 = vrot.lane.b32.xlu1 %v630_v2, %s5720_s28  ;;  %633 = vrot.lane.b32.xlu0 %v630_v2, %s5718_s4  ;;  %v632_v3 = vcombine.high %v630_v2, %v630_v2  ;;  %v873_v51 = vld [vmem:[%s5746_s5] sm:$0xff]  ;;  %s4508_s21 = smov 104  }
  0x26   : > { %v769_v34 = vld [vmem:[%s5744_s3] sm:$0xff]  ;;  %s4510_s3 = smov 80  }
  0x27   : > { %644 = vrot.lane.b32.xlu1 %v632_v3, %s5720_s28  ;;  %635 = vrot.lane.b32.xlu0 %v632_v3, %s5718_s4  ;;  %v660_v17 = vld [vmem:[%s5742_s1] sm:$0xff]  ;;  %s4513_s1 = smov 72  }
  0x28   : > { %v770_v24 = vld [vmem:[%s5743_s24] sm:$0xff]  ;;  %s5748_s24 = smov 120  }
  0x2b   : > { %664 = vperm.xlu0 %4335, %v661_v4  }
  0x95   : > { %v643_v5 = vpop.permute.xlu1 %642  ;;  %v634_v6 = vpop.permute.xlu0 %633 }
  0x99   : > { %v645_v7 = vpop.permute.xlu1 %644  ;;  %v636_v8 = vpop.permute.xlu0 %635 }
  0x9a   : > { %v638_v9 = vsel %vm637_vm0, %v634_v6, %v636_v8  ;;  %v641_v10 = vsel %vm637_vm0, %v636_v8, %v634_v6  ;;  %v650_v11 = vsel %vm646_vm1, %v645_v7, %v643_v5  ;;  %v647_v12 = vsel %vm646_vm1, %v643_v5, %v645_v7  ;;  %v976_v5 = vld [vmem:[%s5703_s7] sm:$0xff] }
  0x9b   : > { %v653_v13 = vrot.slane %v638_v9, 4  ;;  %v654_v14 = vrot.slane %v641_v10, 4  ;;  %4012 = vmatprep.subr.msk.mxu0 %vm657_vm2, %v650_v11 }
  0x9c   : > { %4013 = vmatpush1.msk.msra.mxu0 %vm657_vm2, %v647_v12 }
  0x9d   : > { %v659_v15 = vsel %vm657_vm2, %v632_v3, %v654_v14  ;;  %v658_v16 = vsel %vm657_vm2, %v630_v2, %v653_v13  ;;  %v1068_v13 = vld [vmem:[%s5705_s9] sm:$0xf] }
  0x9e   : > { %706 = vmatprep.subr.mxu0 %v659_v15  ;;  %v1144_v14 = vld [vmem:[%s5706_s10] sm:$0xf] }
  0x9f   : > { %707 = vmatpush1.msra.mxu0 %v658_v16 }
  0xa0   : > { %4014 = vmatmul.mubr.msk.f32.vlgmr.msra.gmra.mxu0 %vm667_vm3, %v660_v17 }
  0xa1   : > { %947 = vmatprep.mubr.f32.mxu0 %v4502_v0 }
  0xa6   : > { %v665_v18 = vpop.permute.xlu0 %664 }
 0x160   : > { %v742_v19 = vpop.f32.mrf.mxu0 }
 0x161   : > { %v743_v20 = vadd.f32 %v742_v19, %v665_v18  ;;  %v1219_v19 = vld [vmem:[%s5707_s11] sm:$0xff] }
 0x162   : > { %v744_v21 = vpop.f32.mrf.mxu0 }
 0x163   : > { %v745_v22 = vadd.f32 %v744_v21, %v665_v18  ;;  %v747_v23 = vmax.f32 %v743_v20, 0.0 }
 0x165   : > { %751 = vrot.lane.b32.xlu0 %v747_v23, %s5718_s4  ;;  %760 = vrot.lane.b32.xlu1 %v747_v23, %s5720_s28  ;;  %v748_v25 = vmax.f32 %v745_v22, 0.0 }
 0x169   : > { %773 = vperm.xlu0 %4335, %v770_v24   ;;  %762 = vrot.lane.b32.xlu1 %v748_v25, %s5720_s28 }
 0x16d   : > { %753 = vrot.lane.b32.xlu1 %v748_v25, %s5718_s4 }
 0x1d7   : > { %v761_v26 = vpop.permute.xlu1 %760  ;;  %v752_v30 = vpop.permute.xlu0 %751 }
 0x1db   : > { %v763_v27 = vpop.permute.xlu1 %762 }
 0x1dc   : > { %v768_v28 = vsel %vm646_vm1, %v763_v27, %v761_v26  ;;  %v764_v29 = vsel %vm646_vm1, %v761_v26, %v763_v27 }
 0x1dd   : > { %806 = vmatprep.subr.mxu1 %v768_v28 }
 0x1de   : > { %807 = vmatpush1.msra.mxu1 %v764_v29 }
 0x1df   : > { %v754_v31 = vpop.permute.xlu1 %753 }
 0x1e0   : > { %v759_v32 = vsel %vm637_vm0, %v754_v31, %v752_v30  ;;  %v755_v33 = vsel %vm637_vm0, %v752_v30, %v754_v31 }
 0x1e1   : > { %808 = vmatprep.subr.mxu1 %v759_v32 }
 0x1e2   : > { %809 = vmatpush1.msra.mxu1 %v755_v33 }
 0x1e3   : > { %810 = vmatprep.subr.mxu1 %v748_v25 }
 0x1e4   : > { %811 = vmatpush1.msra.mxu1 %v747_v23  ;;  %v774_v35 = vpop.permute.xlu0 %773 }
 0x1e5   : > { %4015 = vmatmul.mubr.msk.f32.vlgmr.msra.gmra.mxu1 %vm776_vm4, %v769_v34 }
 0x1e6   : > { %1050 = vmatprep.mubr.f32.mxu1 %v4502_v0 }
 0x2a5   : > { %v846_v36 = vpop.f32.mrf.mxu1 }
 0x2a6   : > { %v847_v37 = vadd.f32 %v846_v36, %v774_v35 }
 0x2a7   : > { %v848_v38 = vpop.f32.mrf.mxu1 }
 0x2a8   : > { %v851_v39 = vmax.f32 %v847_v37, 0.0  ;;  %v849_v40 = vadd.f32 %v848_v38, %v774_v35 }
 0x2aa   : > { %v852_v41 = vmax.f32 %v849_v40, 0.0  ;;  %864 = vrot.lane.b32.xlu1 %v851_v39, %s5720_s28 }
 0x2ac   : > { %866 = vrot.lane.b32.xlu0 %v852_v41, %s5720_s28 }
 0x2ae   : > { %855 = vrot.lane.b32.xlu1 %v851_v39, %s5718_s4 }
 0x2b0   : > { %857 = vrot.lane.b32.xlu0 %v852_v41, %s5718_s4 }
 0x2b2   : > { %877 = vperm.xlu1 %4336, %v874_v42   ;;  %v1064_v42 = vld [vmem:[%s5709_s13 + $0x20] sm:$0xff] }
 0x31c   : > { %v865_v43 = vpop.permute.xlu1 %864 }
 0x31e   : > { %v867_v44 = vpop.permute.xlu0 %866 }
 0x31f   : > { %v872_v45 = vsel %vm646_vm1, %v867_v44, %v865_v43  ;;  %v868_v46 = vsel %vm646_vm1, %v865_v43, %v867_v44  ;;  %v1060_v43 = vld [vmem:[%s5709_s13] sm:$0xff]  ;;  %v1065_v44 = vld [vmem:[%s5709_s13 + $0x28] sm:$0xff] }
 0x320   : > { %909 = vmatprep.subr.mxu0 %v872_v45  ;;  %v856_v47 = vpop.permute.xlu1 %855  ;;  %v1061_v45 = vld [vmem:[%s5709_s13 + $0x8] sm:$0xff] }
 0x321   : > { %910 = vmatpush1.msra.mxu0 %v868_v46 }
 0x322   : > { %v858_v48 = vpop.permute.xlu0 %857 }
 0x323   : > { %v863_v49 = vsel %vm637_vm0, %v858_v48, %v856_v47  ;;  %v859_v50 = vsel %vm637_vm0, %v856_v47, %v858_v48  ;;  %v1063_v47 = vld [vmem:[%s5709_s13 + $0x18] sm:$0xff]  ;;  %v1062_v48 = vld [vmem:[%s5709_s13 + $0x10] sm:$0xff] }
 0x324   : > { %911 = vmatprep.subr.mxu0 %v863_v49  ;;  %v1067_v49 = vld [vmem:[%s5709_s13 + $0x38] sm:$0xff] }
 0x325   : > { %912 = vmatpush1.msra.mxu0 %v859_v50 }
 0x326   : > { %913 = vmatprep.subr.mxu0 %v852_v41 }
 0x327   : > { %914 = vmatpush1.msra.mxu0 %v851_v39 }
 0x328   : > { %4016 = vmatmul.mubr.msk.f32.vlgmr.msra.gmra.mxu0 %vm776_vm4, %v873_v51 }
 0x329   : > { %1137 = vmatprep.mubr.f32.mxu0 %v4502_v0 }
 0x32d   : > { %v878_v52 = vpop.permute.xlu1 %877 }
 0x3e8   : > { %v949_v53 = vpop.f32.mrf.mxu0 }
 0x3e9   : > { %v950_v54 = vadd.f32 %v949_v53, %v878_v52 }
 0x3ea   : > { %v951_v55 = vpop.f32.mrf.mxu0 }
 0x3eb   : > { %v952_v56 = vadd.f32 %v951_v55, %v878_v52  ;;  %v954_v57 = vmax.f32 %v950_v54, 0.0  ;;  %v1066_v54 = vld [vmem:[%s5709_s13 + $0x30] sm:$0xff] }
 0x3ed   : > { %v955_v58 = vmax.f32 %v952_v56, 0.0  ;;  %967 = vrot.lane.b32.xlu0 %v954_v57, %s5720_s28 }
 0x3ef   : > { %969 = vrot.lane.b32.xlu1 %v955_v58, %s5720_s28  ;;  %s1059_s28 = sld [smem:[#allocation2]] }
 0x3f1   : > { %958 = vrot.lane.b32.xlu0 %v954_v57, %s5718_s4 }
 0x3f3   : > { %960 = vrot.lane.b32.xlu1 %v955_v58, %s5718_s4  ;;  %s5747_s4 = smov 112  }
 0x3f5   : > { %980 = vperm.xlu0 %4335, %v977_v59  }
 0x45f   : > { %v968_v60 = vpop.permute.xlu0 %967 }
 0x461   : > { %v970_v61 = vpop.permute.xlu1 %969 }
 0x462   : > { %v975_v62 = vsel %vm646_vm1, %v970_v61, %v968_v60  ;;  %v971_v63 = vsel %vm646_vm1, %v968_v60, %v970_v61  ;;  %vm3911_vm1 = vcmask 255104  }
 0x463   : > { %1012 = vmatprep.subr.mxu1 %v975_v62  ;;  %v959_v1 = vpop.permute.xlu0 %958 }
 0x464   : > { %1013 = vmatpush1.msra.mxu1 %v971_v63 }
 0x465   : > { %v961_v2 = vpop.permute.xlu1 %960 }
 0x466   : > { %v966_v3 = vsel %vm637_vm0, %v961_v2, %v959_v1  ;;  %v962_v4 = vsel %vm637_vm0, %v959_v1, %v961_v2  ;;  %vm3806_vm0 = vcmask 123904  }
 0x467   : > { %1014 = vmatprep.subr.mxu1 %v966_v3 }
 0x468   : > { %1015 = vmatpush1.msra.mxu1 %v962_v4 }
 0x469   : > { %1016 = vmatprep.subr.mxu1 %v955_v58 }
 0x46a   : > { %1017 = vmatpush1.msra.mxu1 %v954_v57 }
 0x46b   : > { %4017 = vmatmul.mubr.msk.f32.vlgmr.msra.gmra.mxu1 %vm776_vm4, %v976_v5 }
 0x46c   : > { %1212 = vmatprep.mubr.f32.mxu1 %v4502_v0 }
 0x470   : > { %v981_v7 = vpop.permute.xlu0 %980 }
 0x52b   : > { %v1052_v6 = vpop.f32.mrf.mxu1 }
 0x52c   : > { %v1053_v8 = vadd.f32 %v1052_v6, %v981_v7 }
 0x52d   : > { %v1054_v9 = vpop.f32.mrf.mxu1 }
 0x52e   : > { %v1055_v10 = vadd.f32 %v1054_v9, %v981_v7  ;;  %v4757_v12 = vmax.f32 %v1053_v8, 0.0 }
 0x530   : > { %v4755_v11 = vmax.f32 %v1055_v10, 0.0 }
 0x532   : > { %1103 = vmatprep.subr.mxu0 %v4755_v11  ;;  %1178 = vmatprep.subr.mxu1 %v4755_v11 }
 0x533   : > { %1104 = vmatpush1.msra.mxu0 %v4757_v12  ;;  %1179 = vmatpush1.msra.mxu1 %v4757_v12 }
 0x534   : > { %4018 = vmatmul.mubr.msk.f32.vlgmr.msra.gmra.mxu0 %vm1069_vm5, %v1068_v13  ;;  %1253 = vmatprep.subr.mxu0 %v4755_v11 }
 0x535   : > { %1254 = vmatpush1.msra.mxu0 %v4757_v12  ;;  %4019 = vmatmul.mubr.msk.f32.vlgmr.msra.gmra.mxu1 %vm1069_vm5, %v1144_v14 }
 0x536   : > { %1287 = vmatprep.mubr.f32.mxu0 %v4502_v0  ;;  %4150 = vmatprep.subr.mxu0 %v4502_v0 }
 0x538   : > { %4020 = vmatmul.mubr.msk.f32.vlgmr.msra.gmra.mxu0 %vm1069_vm5, %v1219_v19 }
 0x539   : > { %4166 = vmatprep.mubr.msk.f32.mxu0 %vm4506_vm7, %v4502_v0 }
 0x5f4   : > { %v1139_v15 = vpop.f32.mrf.mxu0 }
 0x5f5   : > { %1294 = vxpose.xlu1.b32.start.end [1/1] (short) (narrow) %v1139_v15, 64  ;;  %v1214_v16 = vpop.f32.mrf.mxu1 }
 0x5f6   : > { %v1141_v17 = vpop.f32.mrf.mxu0  ;;  %4136 = vmatprep.subr.msk.mxu1 %vm657_vm2, %v1214_v16 }
 0x5f7   : > { %1611 = vxpose.xlu0.b32.start.end [1/1] (short) (narrow) %v1141_v17, 64  ;;  %4137 = vmatpush3.msk.msra.mxu1 %vm657_vm2, %v1214_v16  ;;  %v1216_v18 = vpop.f32.mrf.mxu1 }
 0x5f8   : > { %4169 = vmatprep.subr.msk.mxu1 %vm657_vm2, %v1216_v18 }
 0x671   : > { %v1310_v20 = vpop.trf.xlu1 }
 0x672   : > { %4138 = vmatprep.mubr.msk.f32.mxu1 %vm1326_vm6, %v1310_v20 }
 0x673   : > { %v1627_v21 = vpop.trf.xlu0 }
 0x675   : > { %v1311_v22 = vpop.trf.xlu1 }
 0x676   : > { %4139 = vmatmul.mubr.msk.f32.vlgmr.msra.gmra.mxu1 %vm1326_vm6, %v1311_v22 }
 0x677   : > { %4170 = vmatpush3.msk.msra.mxu1 %vm657_vm2, %v1216_v18  ;;  %v1628_v23 = vpop.trf.xlu0 }
 0x679   : > { %v1312_v24 = vpop.trf.xlu1 }
 0x67a   : > { %4141 = vmatprep.mubr.msk.f32.mxu1 %vm1326_vm6, %v1312_v24 }
 0x67b   : > { %v1629_v26 = vpop.trf.xlu0 }
 0x67d   : > { %v1313_v25 = vpop.trf.xlu1 }
 0x67e   : > { %4142 = vmatmul.mubr.msk.f32.gmra.mxu1 %vm1326_vm6, %v1313_v25 }
 0x67f   : > { %v1630_v28 = vpop.trf.xlu0 }
 0x681   : > { %v1314_v27 = vpop.trf.xlu1 }
 0x682   : > { %4144 = vmatprep.mubr.msk.f32.mxu1 %vm1326_vm6, %v1314_v27 }
 0x683   : > { %v1631_v31 = vpop.trf.xlu0 }
 0x685   : > { %v1315_v29 = vpop.trf.xlu1 }
 0x686   : > { %4145 = vmatmul.mubr.msk.f32.gmra.mxu1 %vm1326_vm6, %v1315_v29 }
 0x687   : > { %v1632_v33 = vpop.trf.xlu0 }
 0x689   : > { %v1316_v30 = vpop.trf.xlu1 }
 0x68a   : > { %4147 = vmatprep.mubr.msk.f32.mxu1 %vm1326_vm6, %v1316_v30 }
 0x68b   : > { %v1633_v34 = vpop.trf.xlu0 }
 0x68d   : > { %v1317_v32 = vpop.trf.xlu1 }
 0x68e   : > { %4148 = vmatmul.mubr.msk.f32.gmra.mxu1 %vm1326_vm6, %v1317_v32 }
 0x68f   : > { %4171 = vmatprep.mubr.msk.f32.mxu1 %vm1326_vm6, %v1627_v21  ;;  %v1634_v35 = vpop.trf.xlu0 }
 0x692   : > { %4172 = vmatmul.mubr.msk.f32.vlgmr.msra.gmra.mxu1 %vm1326_vm6, %v1628_v23 }
 0x693   : > { %4174 = vmatprep.mubr.msk.f32.mxu1 %vm1326_vm6, %v1629_v26 }
 0x696   : > { %4175 = vmatmul.mubr.msk.f32.gmra.mxu1 %vm1326_vm6, %v1630_v28 }
 0x697   : > { %4177 = vmatprep.mubr.msk.f32.mxu1 %vm1326_vm6, %v1631_v31 }
 0x69a   : > { %4178 = vmatmul.mubr.msk.f32.gmra.mxu1 %vm1326_vm6, %v1632_v33 }
 0x69b   : > { %4180 = vmatprep.mubr.msk.f32.mxu1 %vm1326_vm6, %v1633_v34 }
 0x69e   : > { %4181 = vmatmul.mubr.msk.f32.gmra.mxu1 %vm1326_vm6, %v1634_v35 }
 0x736   : > { %v4140_v36 = vpop.f32.mrf.mxu1 }
 0x737   : > { %v4828_v52 = vadd.f32 %v4140_v36, %v1061_v45 }
 0x738   : > { %v1420_v37 = vpop.f32.mrf.mxu1 }
 0x739   : > { %v4824_v50 = vadd.f32 %v1420_v37, %v1060_v43  ;;  %v1461_v3 = vsel %vm1459_vm8, %v4828_v52, -inf }
 0x73b   : > { %v1460_v60 = vsel %vm1459_vm8, %v4824_v50, -inf }
 0x73e   : > { %v4143_v38 = vpop.f32.mrf.mxu1 }
 0x73f   : > { %v4833_v55 = vadd.f32 %v4143_v38, %v1063_v47 }
 0x740   : > { %v1430_v39 = vpop.f32.mrf.mxu1 }
 0x741   : > { %v1431_v56 = vadd.f32 %v1430_v39, %v1062_v48  ;;  %v1463_v4 = vsel %vm1459_vm8, %v4833_v55, -inf }
 0x743   : > { %v1462_v5 = vsel %vm1459_vm8, %v1431_v56, -inf }
 0x746   : > { %v4146_v40 = vpop.f32.mrf.mxu1 }
 0x747   : > { %v4826_v51 = vadd.f32 %v4146_v40, %v1065_v44 }
 0x748   : > { %v1440_v41 = vpop.f32.mrf.mxu1 }
 0x749   : > { %v4813_v46 = vadd.f32 %v1440_v41, %v1064_v42  ;;  %v1466_v61 = vsel %vm1459_vm8, %v4826_v51, -inf }
 0x74a   : > { %v1467_v7 = vmax.f32 %v1461_v3, %v1466_v61 }
 0x74b   : > { %v1464_v57 = vsel %vm1459_vm8, %v4813_v46, -inf }
 0x74c   : > { %v1465_v1 = vmax.f32 %v1460_v60, %v1464_v57 }
 0x74e   : > { %v4149_v53 = vpop.f32.mrf.mxu1  ;;  %v1472_v13 = vmax.f32 %v1465_v1, %v1467_v7 }
 0x74f   : > { %v4837_v58 = vadd.f32 %v4149_v53, %v1067_v49 }
 0x750   : > { %v1450_v59 = vpop.f32.mrf.mxu1 }
 0x751   : > { %v1470_v62 = vsel %vm1459_vm8, %v4837_v58, -inf  ;;  %v4845_v63 = vadd.f32 %v1450_v59, %v1066_v54 }
 0x752   : > { %v4173_v2 = vpop.f32.mrf.mxu1  ;;  %v1471_v8 = vmax.f32 %v1463_v4, %v1470_v62 }
 0x753   : > { %v1468_v6 = vsel %vm1459_vm8, %v4845_v63, -inf  ;;  %v4864_v30 = vadd.f32 %v4173_v2, %v1061_v45 }
 0x754   : > { %v1469_v9 = vmax.f32 %v1462_v5, %v1468_v6  ;;  %v1736_v10 = vpop.f32.mrf.mxu1 }
 0x755   : > { %v4856_v24 = vadd.f32 %v1736_v10, %v1060_v43  ;;  %v1776_v43 = vsel %vm1459_vm8, %v4864_v30, -inf }
 0x756   : > { %v1473_v14 = vmax.f32 %v1469_v9, %v1471_v8  ;;  %v4176_v15 = vpop.f32.mrf.mxu1 }
 0x757   : > { %v4866_v31 = vadd.f32 %v4176_v15, %v1063_v47  ;;  %v1775_v36 = vsel %vm1459_vm8, %v4856_v24, -inf }
 0x758   : > { %v1474_v16 = vmax.f32 %v1472_v13, %v1473_v14  ;;  %v1746_v17 = vpop.f32.mrf.mxu1 }
 0x759   : > { %v4860_v27 = vadd.f32 %v1746_v17, %v1062_v48 }
 0x75a   : > { %v1475_v18 = vrot.slane %v1474_v16, 4  ;;  %v4179_v19 = vpop.f32.mrf.mxu1 }
 0x75b   : > { %v4858_v25 = vadd.f32 %v4179_v19, %v1065_v44  ;;  %v1777_v39 = vsel %vm1459_vm8, %v4860_v27, -inf  ;;  %v1778_v44 = vsel %vm1459_vm8, %v4866_v31, -inf }
 0x75c   : > { %v1476_v20 = vmax.f32 %v1474_v16, %v1475_v18  ;;  %v1756_v21 = vpop.f32.mrf.mxu1 }
 0x75d   : > { %v4854_v22 = vadd.f32 %v1756_v21, %v1064_v42  ;;  %v1781_v37 = vsel %vm1459_vm8, %v4858_v25, -inf }
 0x75e   : > { %v1477_v23 = vrot.slane %v1476_v20, 2  ;;  %v4182_v26 = vpop.f32.mrf.mxu1  ;;  %v1782_v47 = vmax.f32 %v1776_v43, %v1781_v37 }
 0x75f   : > { %v4862_v28 = vadd.f32 %v4182_v26, %v1067_v49  ;;  %v1779_v32 = vsel %vm1459_vm8, %v4854_v22, -inf }
 0x760   : > { %v1478_v29 = vmax.f32 %v1476_v20, %v1477_v23  ;;  %v1766_v33 = vpop.f32.mrf.mxu1  ;;  %v1780_v40 = vmax.f32 %v1775_v36, %v1779_v32 }
 0x761   : > { %v4870_v34 = vadd.f32 %v1766_v33, %v1066_v54  ;;  %v1785_v38 = vsel %vm1459_vm8, %v4862_v28, -inf }
 0x762   : > { %v1479_v35 = vrot.slane %v1478_v29, 1  ;;  %v1786_v48 = vmax.f32 %v1778_v44, %v1785_v38  ;;  %v1787_v60 = vmax.f32 %v1780_v40, %v1782_v47 }
 0x763   : > { %v1783_v41 = vsel %vm1459_vm8, %v4870_v34, -inf }
 0x764   : > { %v1480_v42 = vmax.f32 %v1478_v29, %v1479_v35  ;;  %v1784_v45 = vmax.f32 %v1777_v39, %v1783_v41 }
 0x766   : > { %v1481_v49 = vsub.f32 %v4824_v50, %v1480_v42  ;;  %v1482_v53 = vsub.f32 %v4828_v52, %v1480_v42  ;;  %v1483_v54 = vsub.f32 %v1431_v56, %v1480_v42  ;;  %v1484_v57 = vsub.f32 %v4833_v55, %v1480_v42 }
 0x767   : > { %v1485_v59 = vsub.f32 %v4813_v46, %v1480_v42  ;;  %v1788_v2 = vmax.f32 %v1784_v45, %v1786_v48  ;;  %v1486_v3 = vsub.f32 %v4826_v51, %v1480_v42  ;;  %v1487_v6 = vsub.f32 %v4845_v63, %v1480_v42 }
 0x768   : > { %v1489_v61 = vmul.f32 1.442695, %v1481_v49  ;;  %v1491_v62 = vmul.f32 1.442695, %v1482_v53  ;;  %v1493_v1 = vmul.f32 1.442695, %v1483_v54  ;;  %v1488_v55 = vsub.f32 %v4837_v58, %v1480_v42 }
 0x769   : > { %v1495_v4 = vmul.f32 1.442695, %v1484_v57  ;;  %v1789_v5 = vmax.f32 %v1787_v60, %v1788_v2  ;;  %v1497_v50 = vmul.f32 1.442695, %v1485_v59  ;;  %v1499_v46 = vmul.f32 1.442695, %v1486_v3 }
 0x76a   : > { %4338 = vpow2.f32 %v1489_v61  ;;  %v1501_v7 = vmul.f32 1.442695, %v1487_v6  ;;  %v1503_v9 = vmul.f32 1.442695, %v1488_v55 }
 0x76b   : > { %4340 = vpow2.f32 %v1491_v62  ;;  %v1790_v52 = vrot.slane %v1789_v5, 4 }
 0x76c   : > { %4342 = vpow2.f32 %v1493_v1 }
 0x76d   : > { %4344 = vpow2.f32 %v1495_v4  ;;  %v1791_v56 = vmax.f32 %v1789_v5, %v1790_v52 }
 0x76e   : > { %4346 = vpow2.f32 %v1497_v50 }
 0x76f   : > { %v1792_v8 = vrot.slane %v1791_v56, 2  ;;  %4348 = vpow2.f32 %v1499_v46 }
 0x770   : > { %4350 = vpow2.f32 %v1501_v7 }
 0x771   : > { %v1793_v51 = vmax.f32 %v1791_v56, %v1792_v8  ;;  %4352 = vpow2.f32 %v1503_v9 }
 0x773   : > { %v1794_v10 = vrot.slane %v1793_v51, 1 }
 0x775   : > { %v1795_v13 = vmax.f32 %v1793_v51, %v1794_v10 }
 0x777   : > { %v4893_v63 = vpop.eup %4338  ;;  %v1796_v15 = vsub.f32 %v4856_v24, %v1795_v13  ;;  %v1797_v16 = vsub.f32 %v4864_v30, %v1795_v13  ;;  %v1798_v17 = vsub.f32 %v4860_v27, %v1795_v13  ;;  %v1799_v20 = vsub.f32 %v4866_v31, %v1795_v13 }
 0x778   : > { %v4895_v14 = vpop.eup %4340  ;;  %v1505_v58 = vsel %vm1459_vm8, %v4893_v63, 0.0  ;;  %v1800_v26 = vsub.f32 %v4854_v22, %v1795_v13  ;;  %v1801_v33 = vsub.f32 %v4858_v25, %v1795_v13  ;;  %v1802_v22 = vsub.f32 %v4870_v34, %v1795_v13 }
 0x779   : > { %v4902_v18 = vpop.eup %4342  ;;  %v1506_v19 = vsel %vm1459_vm8, %v4895_v14, 0.0  ;;  %v1804_v24 = vmul.f32 1.442695, %v1796_v15  ;;  %v1806_v32 = vmul.f32 1.442695, %v1797_v16  ;;  %v1803_v25 = vsub.f32 %v4862_v28, %v1795_v13 }
 0x77a   : > { %v4907_v21 = vpop.eup %4344  ;;  %v1507_v23 = vadd.f32 %v1506_v19, %v1505_v58  ;;  %v1508_v29 = vsel %vm1459_vm8, %v4902_v18, 0.0  ;;  %v1808_v35 = vmul.f32 1.442695, %v1798_v17  ;;  %v1810_v36 = vmul.f32 1.442695, %v1799_v20 }
 0x77b   : > { %v4912_v30 = vpop.eup %4346  ;;  %v1510_v31 = vsel %vm1459_vm8, %v4907_v21, 0.0  ;;  %4354 = vpow2.f32 %v1804_v24  ;;  %v1812_v39 = vmul.f32 1.442695, %v1800_v26  ;;  %v1814_v43 = vmul.f32 1.442695, %v1801_v33 }
 0x77c   : > { %v1509_v27 = vadd.f32 %v1508_v29, %v1507_v23  ;;  %v4917_v37 = vpop.eup %4348  ;;  %4356 = vpow2.f32 %v1806_v32  ;;  %v1512_v40 = vsel %vm1459_vm8, %v4912_v30, 0.0  ;;  %v1816_v48 = vmul.f32 1.442695, %v1802_v22 }
 0x77d   : > { %4358 = vpow2.f32 %v1808_v35  ;;  %v4351_v41 = vpop.eup %4350  ;;  %v1514_v44 = vsel %vm1459_vm8, %v4917_v37, 0.0  ;;  %v1818_v53 = vmul.f32 1.442695, %v1803_v25 }
 0x77e   : > { %v1511_v38 = vadd.f32 %v1510_v31, %v1509_v27  ;;  %4360 = vpow2.f32 %v1810_v36  ;;  %v4353_v45 = vpop.eup %4352  ;;  %v1516_v34 = vsel %vm1459_vm8, %v4351_v41, 0.0 }
 0x77f   : > { %4362 = vpow2.f32 %v1812_v39  ;;  %v1518_v54 = vsel %vm1459_vm8, %v4353_v45, 0.0 }
 0x780   : > { %v1513_v42 = vadd.f32 %v1512_v40, %v1511_v38  ;;  %4364 = vpow2.f32 %v1814_v43 }
 0x781   : > { %4366 = vpow2.f32 %v1816_v48  ;;  %v1608_v48 = vstv %s1059_s28  ;;  %s4516_s28 = smov 24  }
 0x782   : > { %v1515_v47 = vadd.f32 %v1514_v44, %v1513_v42  ;;  %4368 = vpow2.f32 %v1818_v53 }
 0x784   : > { %v1517_v49 = vadd.f32 %v1516_v34, %v1515_v47 }
 0x786   : > { %v1519_v57 = vadd.f32 %v1518_v54, %v1517_v49 }
 0x788   : > { %v1520_v59 = vrot.slane %v1519_v57, 4  ;;  %v4927_v28 = vpop.eup %4354 }
 0x789   : > { %v4929_v61 = vpop.eup %4356  ;;  %v1820_v62 = vsel %vm1459_vm8, %v4927_v28, 0.0 }
 0x78a   : > { %v1521_v60 = vadd.f32 %v1520_v59, %v1519_v57  ;;  %v4933_v1 = vpop.eup %4358  ;;  %v1821_v3 = vsel %vm1459_vm8, %v4929_v61, 0.0  ;;  %v4509_v57 = vmov 1983009808  }
 0x78b   : > { %v4937_v4 = vpop.eup %4360  ;;  %v1822_v5 = vadd.f32 %v1821_v3, %v1820_v62  ;;  %v1823_v50 = vsel %vm1459_vm8, %v4933_v1, 0.0  ;;  %v1927_v59 = vunpack.c.l.s4 %v4509_v57 }
 0x78c   : > { %v1522_v2 = vrot.slane %v1521_v60, 2  ;;  %v4363_v52 = vpop.eup %4362  ;;  %v1825_v56 = vsel %vm1459_vm8, %v4937_v4, 0.0 }
 0x78d   : > { %v1824_v55 = vadd.f32 %v1823_v50, %v1822_v5  ;;  %v4365_v7 = vpop.eup %4364  ;;  %v1827_v51 = vsel %vm1459_vm8, %v4363_v52, 0.0 }
 0x78e   : > { %v1523_v6 = vadd.f32 %v1522_v2, %v1521_v60  ;;  %v4367_v10 = vpop.eup %4366  ;;  %v1829_v58 = vsel %vm1459_vm8, %v4365_v7, 0.0  ;;  %v1928_v60 = vunpack.c.0.s8 %v1927_v59 }
 0x78f   : > { %v1826_v8 = vadd.f32 %v1825_v56, %v1824_v55  ;;  %v4369_v15 = vpop.eup %4368  ;;  %v1831_v17 = vsel %vm1459_vm8, %v4367_v10, 0.0 }
 0x790   : > { %v1524_v46 = vrot.slane %v1523_v6, 1  ;;  %v1833_v20 = vsel %vm1459_vm8, %v4369_v15, 0.0 }
 0x791   : > { %v1828_v13 = vadd.f32 %v1827_v51, %v1826_v8 }
 0x792   : > { %v1525_v9 = vadd.f32 %v1524_v46, %v1523_v6 }
 0x793   : > { %v1830_v16 = vadd.f32 %v1829_v58, %v1828_v13 }
 0x794   : > { %4370 = vrcp.f32 %v1525_v9 }
 0x795   : > { %v1832_v19 = vadd.f32 %v1831_v17, %v1830_v16 }
 0x797   : > { %v1834_v23 = vadd.f32 %v1833_v20, %v1832_v19 }
 0x799   : > { %v1835_v26 = vrot.slane %v1834_v23, 4 }
 0x79b   : > { %v1836_v29 = vadd.f32 %v1835_v26, %v1834_v23 }
 0x79d   : > { %v1837_v24 = vrot.slane %v1836_v29, 2 }
 0x79f   : > { %v1838_v27 = vadd.f32 %v1837_v24, %v1836_v29 }
 0x7a1   : > { %v4371_v32 = vpop.eup %4370  ;;  %v1839_v35 = vrot.slane %v1838_v27, 1 }
 0x7a2   : > { %v1534_v33 = vmul.f32 %v4371_v32, %v4353_v45  ;;  %v1533_v36 = vmul.f32 %v4371_v32, %v4351_v41  ;;  %v1532_v38 = vmul.f32 %v4371_v32, %v4917_v37  ;;  %v1531_v22 = vmul.f32 %v4371_v32, %v4912_v30  ;;  %v1289_v41 = vpop.f32.mrf.mxu0 }
 0x7a3   : > { %v1840_v31 = vadd.f32 %v1839_v35, %v1838_v27  ;;  %v1530_v39 = vmul.f32 %v4371_v32, %v4907_v21  ;;  %v1529_v40 = vmul.f32 %v4371_v32, %v4902_v18  ;;  %v1528_v37 = vmul.f32 %v4371_v32, %v4895_v14 }
 0x7a4   : > { %4151 = vmatpush3.msra.mxu0 %v1534_v33  ;;  %v1527_v30 = vmul.f32 %v4371_v32, %v4893_v63  ;;  %v1291_v47 = vpop.f32.mrf.mxu0 }
 0x7a5   : > { %4152 = vmatprep.subr.mxu0 %v4502_v0  ;;  %4372 = vrcp.f32 %v1840_v31 }
 0x7a6   : > { %4153 = vmatpush3.msra.mxu0 %v1533_v36 }
 0x7a7   : > { %4154 = vmatprep.subr.mxu0 %v4502_v0 }
 0x7a8   : > { %4155 = vmatpush3.msra.mxu0 %v1532_v38 }
 0x7a9   : > { %4156 = vmatprep.subr.mxu0 %v4502_v0 }
 0x7aa   : > { %4157 = vmatpush3.msra.mxu0 %v1531_v22 }
 0x7ab   : > { %4158 = vmatprep.subr.mxu0 %v4502_v0 }
 0x7ac   : > { %4159 = vmatpush3.msra.mxu0 %v1530_v39 }
 0x7ad   : > { %4160 = vmatprep.subr.mxu0 %v4502_v0 }
 0x7ae   : > { %4161 = vmatpush3.msra.mxu0 %v1529_v40 }
 0x7af   : > { %4162 = vmatprep.subr.mxu0 %v4502_v0 }
 0x7b0   : > { %4163 = vmatpush3.msra.mxu0 %v1528_v37 }
 0x7b1   : > { %4164 = vmatprep.subr.mxu0 %v4502_v0 }
 0x7b2   : > { %4165 = vmatpush3.msra.mxu0 %v1527_v30  ;;  %v4373_v21 = vpop.eup %4372 }
 0x7b3   : > { %4167 = vmatmul.mubr.msk.f32.vlgmr.msra.gmra.mxu0 %vm1459_vm8, %v1289_v41  ;;  %4183 = vmatprep.subr.mxu0 %v4502_v0  ;;  %v1849_v18 = vmul.f32 %v4373_v21, %v4369_v15  ;;  %v1848_v14 = vmul.f32 %v4373_v21, %v4367_v10  ;;  %v1847_v42 = vmul.f32 %v4373_v21, %v4365_v7 }
 0x7b4   : > { %4199 = vmatprep.mubr.msk.f32.mxu0 %vm4506_vm7, %v4502_v0  ;;  %v1846_v63 = vmul.f32 %v4373_v21, %v4363_v52  ;;  %v1845_v25 = vmul.f32 %v4373_v21, %v4937_v4  ;;  %v1844_v43 = vmul.f32 %v4373_v21, %v4933_v1  ;;  %v1843_v44 = vmul.f32 %v4373_v21, %v4929_v61 }
 0x7b5   : > { %4184 = vmatpush3.msra.mxu0 %v1849_v18  ;;  %v1842_v45 = vmul.f32 %v4373_v21, %v4927_v28  ;;  %v1929_v28 = vlaneseq  ;;  %v4511_v1 = vmov 1934713408  }
 0x7b6   : > { %4185 = vmatprep.subr.mxu0 %v4502_v0 }
 0x7b7   : > { %4186 = vmatpush3.msra.mxu0 %v1848_v14  ;;  %v1930_v61 = vshrl.u32 %v1929_v28, 7 }
 0x7b8   : > { %4187 = vmatprep.subr.mxu0 %v4502_v0 }
 0x7b9   : > { %4188 = vmatpush3.msra.mxu0 %v1847_v42  ;;  %v4985_v4 = vsub.s32 %v1928_v60, %v1930_v61 }
 0x7ba   : > { %4189 = vmatprep.subr.mxu0 %v4502_v0 }
 0x7bb   : > { %4190 = vmatpush3.msra.mxu0 %v1846_v63 }
 0x7bc   : > { %4191 = vmatprep.subr.mxu0 %v4502_v0 }
 0x7bd   : > { %4192 = vmatpush3.msra.mxu0 %v1845_v25 }
 0x7be   : > { %4193 = vmatprep.subr.mxu0 %v4502_v0 }
 0x7bf   : > { %4194 = vmatpush3.msra.mxu0 %v1844_v43 }
 0x7c0   : > { %4195 = vmatprep.subr.mxu0 %v4502_v0 }
 0x7c1   : > { %4196 = vmatpush3.msra.mxu0 %v1843_v44 }
 0x7c2   : > { %4197 = vmatprep.subr.mxu0 %v4502_v0 }
 0x7c3   : > { %4198 = vmatpush3.msra.mxu0 %v1842_v45 }
 0x7c4   : > { %4200 = vmatmul.mubr.msk.f32.vlgmr.msra.gmra.mxu0 %vm1459_vm8, %v1291_v47  ;;  %4221 = vmatprep.subr.mxu0 %v4502_v0 }
 0x7c5   : > { %4225 = vmatprep.mubr.msk.f32.mxu0 %vm4506_vm7, %v4502_v0 }
 0x873   : > { %v1604_v34 = vpop.f32.mrf.mxu0 }
 0x874   : > { %v1609_v49 = vmul.f32 %v1608_v48, %v1604_v34 }
 0x875   : > { %v4168_v53 = vpop.f32.mrf.mxu0 }
 0x876   : > { %v1610_v54 = vadd.f32 %v1609_v49, %v4757_v12  ;;  %v1958_v12 = vunpack.c.l.s4 %v4511_v1 }
 0x878   : > { %2140 = vrot.lane.b32.xlu1 %v1610_v54, %s5747_s4  ;;  %2033 = vrot.lane.b32.xlu0 %v1610_v54, %s5748_s24  ;;  %v1959_v6 = vunpack.c.0.s8 %v1958_v12  ;;  %v1932_v52 = vrot.slane %v1610_v54, %v4985_v4  ;;  %v1925_v9 = vcombine.high %v1610_v54, %v4502_v0 }
 0x87a   : > { %v4991_v46 = vsub.s32 %v1959_v6, %v1930_v61  ;;  %v1939_v13 = vrot.slane %v1925_v9, %v4985_v4 }
 0x87c   : > { %2461 = vrot.lane.b32.xlu1 %v1610_v54, %s4507_s19 }
 0x880   : > { %2247 = vrot.lane.b32.xlu1 %v1610_v54, %s4508_s21 }
 0x884   : > { %2568 = vrot.lane.b32.xlu1 %v1610_v54, %s4510_s3  ;;  %v1919_v62 = vpop.f32.mrf.mxu0 }
 0x885   : > { %v1923_v2 = vmul.f32 %v1919_v62, %v1608_v48 }
 0x886   : > { %v4201_v3 = vpop.f32.mrf.mxu0 }
 0x887   : > { %v1924_v5 = vadd.f32 %v1923_v2, %v4755_v11 }
 0x888   : > { %2354 = vrot.lane.b32.xlu1 %v1610_v54, %s5725_s29 }
 0x889   : > { %2142 = vrot.lane.b32.xlu0 %v1924_v5, %s5747_s4  ;;  %v1947_v50 = vrot.slane %v1924_v5, %v4985_v4  ;;  %v1940_v7 = vcombine.high %v1924_v5, %v4502_v0 }
 0x88b   : > { %v1956_v55 = vcombine.high %v1932_v52, %v1947_v50  ;;  %v1955_v56 = vcombine.low %v1932_v52, %v1947_v50  ;;  %v1954_v51 = vrot.slane %v1940_v7, %v4985_v4 }
 0x88c   : > { %2675 = vrot.lane.b32.xlu1 %v1610_v54, %s4513_s1 }
 0x88d   : > { %2463 = vrot.lane.b32.xlu0 %v1924_v5, %s4507_s19  ;;  %v1970_v11 = vrot.slane %v1956_v55, %v4991_v46  ;;  %v4997_v8 = vrot.slane %v1955_v56, %v4991_v46  ;;  %v1972_v58 = vcombine.high %v1939_v13, %v1954_v51  ;;  %v1971_v16 = vcombine.low %v1939_v13, %v1954_v51  ;;  %s5727_s19 = smov 56  }
 0x88f   : > { %v1987_v10 = vcombine.high %v4997_v8, %v4502_v0  ;;  %v1988_v15 = vcombine.high %v1970_v11, %v4502_v0  ;;  %v1986_v17 = vrot.slane %v1972_v58, %v4991_v46  ;;  %v1979_v19 = vrot.slane %v1971_v16, %v4991_v46 }
 0x890   : > { %2035 = vrot.lane.b32.xlu1 %v1924_v5, %s5748_s24  ;;  %s5723_s24 = smov 32  }
 0x891   : > { %2249 = vrot.lane.b32.xlu0 %v1924_v5, %s4508_s21  ;;  %v1990_v20 = vcombine.high %v1986_v17, %v4502_v0  ;;  %s4519_s21 = smov 48   ;;  %v1989_v23 = vcombine.high %v1979_v19, %v4502_v0 }
 0x894   : > { %1996 = vrot.lane.b32.xlu1 %v1970_v11, %s5722_s22 }
 0x895   : > { %2570 = vrot.lane.b32.xlu0 %v1924_v5, %s4510_s3  ;;  %s4520_s3 = smov 40  }
 0x898   : > { %1992 = vrot.lane.b32.xlu1 %v1987_v10, %s4515_s23 }
 0x899   : > { %2356 = vrot.lane.b32.xlu0 %v1924_v5, %s5725_s29  ;;  %s5751_s29 = smov 32  }
 0x89c   : > { %2000 = vrot.lane.b32.xlu1 %v1988_v15, %s4516_s28 }
 0x89d   : > { %2677 = vrot.lane.b32.xlu0 %v1924_v5, %s4513_s1 }
 0x8a0   : > { %2004 = vrot.lane.b32.xlu1 %v1979_v19, %s5723_s24 }
 0x8a1   : > { %2016 = vrot.lane.b32.xlu0 %v1990_v20, %s5727_s19 }
 0x8a4   : > { %2012 = vrot.lane.b32.xlu1 %v1986_v17, %s4519_s21 }
 0x8a8   : > { %2008 = vrot.lane.b32.xlu1 %v1989_v23, %s4520_s3 }
 0x8ea   : > { %v5019_v26 = vpop.permute.xlu1 %2140  ;;  %v5027_v27 = vpop.permute.xlu0 %2033 }
 0x8eb   : > { %v2153_v36 = vrot.slane %v5019_v26, %v4985_v4  ;;  %v2046_v21 = vrot.slane %v5027_v27, %v4985_v4 }
 0x8ee   : > { %v5021_v29 = vpop.permute.xlu1 %2461 }
 0x8ef   : > { %v2474_v40 = vrot.slane %v5021_v29, %v4985_v4 }
 0x8f2   : > { %v5023_v24 = vpop.permute.xlu1 %2247 }
 0x8f3   : > { %v5057_v25 = vrot.slane %v5023_v24, %v4985_v4 }
 0x8f6   : > { %v5025_v32 = vpop.permute.xlu1 %2568 }
 0x8f7   : > { %v5076_v49 = vrot.slane %v5025_v32, %v4985_v4 }
 0x8fa   : > { %v5029_v33 = vpop.permute.xlu1 %2354 }
 0x8fb   : > { %v2143_v35 = vpop.permute.xlu0 %2142  ;;  %v2367_v60 = vrot.slane %v5029_v33, %v4985_v4 }
 0x8fc   : > { %v2168_v31 = vrot.slane %v2143_v35, %v4985_v4 }
 0x8fe   : > { %v5034_v38 = vpop.permute.xlu1 %2675  ;;  %v2177_v22 = vcombine.high %v2153_v36, %v2168_v31  ;;  %v2176_v3 = vcombine.low %v2153_v36, %v2168_v31 }
 0x8ff   : > { %v5036_v39 = vpop.permute.xlu0 %2463  ;;  %v5102_v5 = vrot.slane %v5034_v38, %v4985_v4 }
 0x900   : > { %v2489_v37 = vrot.slane %v5036_v39, %v4985_v4  ;;  %v5043_v41 = vrot.slane %v2177_v22, %v4991_v46  ;;  %v5123_v51 = vrot.slane %v2176_v3, %v4991_v46 }
 0x902   : > { %v5045_v30 = vpop.permute.xlu1 %2035  ;;  %v2498_v14 = vcombine.high %v2474_v40, %v2489_v37  ;;  %2217 = vrot.lane.b32.xlu1 %v5043_v41, %s5722_s22  ;;  %v2497_v50 = vcombine.low %v2474_v40, %v2489_v37  ;;  %v2208_v19 = vcombine.high %v5123_v51, %v4502_v0  ;;  %v2146_v40 = vcombine.high %v5019_v26, %v4502_v0  ;;  %v5152_v37 = vld [vmem:[%s5711_s15 + $0x8] sm:$0xff] }
 0x903   : > { %v2061_v18 = vrot.slane %v5045_v30, %v4985_v4  ;;  %v5053_v42 = vpop.permute.xlu0 %2249  ;;  %v2054_v26 = vcombine.high %v5045_v30, %v4502_v0  ;;  %4222 = vmatpush3.msra.mxu0 %v5152_v37 }
 0x904   : > { %v5061_v43 = vrot.slane %v5053_v42, %v4985_v4  ;;  %v5064_v44 = vrot.slane %v2498_v14, %v4991_v46  ;;  %v5131_v15 = vrot.slane %v2497_v50, %v4991_v46  ;;  %v2209_v14 = vcombine.high %v5043_v41, %v4502_v0  ;;  %4223 = vmatprep.subr.mxu0 %v4502_v0  ;;  %v5181_v41 = vld [vmem:[%s5711_s15] sm:$0xff] }
 0x905   : > { %v2070_v63 = vcombine.high %v2046_v21, %v2061_v18  ;;  %v2069_v61 = vcombine.low %v2046_v21, %v2061_v18  ;;  %v2160_v30 = vrot.slane %v2146_v40, %v4985_v4  ;;  %4224 = vmatpush3.msra.mxu0 %v5181_v41 }
 0x906   : > { %v1997_v45 = vpop.permute.xlu1 %1996  ;;  %v2284_v48 = vcombine.high %v5057_v25, %v5061_v43  ;;  %2538 = vrot.lane.b32.xlu1 %v5064_v44, %s5722_s22  ;;  %v2283_v20 = vcombine.low %v5057_v25, %v5061_v43  ;;  %v2529_v31 = vcombine.high %v5131_v15, %v4502_v0  ;;  %4226 = vmatmul.mubr.f32.vlgmr.msra.gmra.mxu0 %v4502_v0 }
 0x907   : > { %v2084_v47 = vrot.slane %v2070_v63, %v4991_v46  ;;  %v5071_v34 = vpop.permute.xlu0 %2570  ;;  %v5114_v7 = vrot.slane %v2069_v61, %v4991_v46  ;;  %4235 = vmatprep.subr.mxu0 %v4502_v0  ;;  %4239 = vmatprep.mubr.msk.f32.mxu0 %vm4506_vm7, %v4502_v0 }
 0x908   : > { %v5080_v53 = vrot.slane %v5071_v34, %v4985_v4  ;;  %v5083_v57 = vrot.slane %v2284_v48, %v4991_v46  ;;  %v5171_v43 = vrot.slane %v2283_v20, %v4991_v46  ;;  %v2039_v48 = vcombine.high %v5027_v27, %v4502_v0  ;;  %4236 = vmatpush3.msra.mxu0 %v5152_v37 }
 0x909   : > { %2110 = vrot.lane.b32.xlu0 %v2084_v47, %s5722_s22  ;;  %v2101_v13 = vcombine.high %v5114_v7, %v4502_v0  ;;  %v2102_v25 = vcombine.high %v2084_v47, %v4502_v0  ;;  %v5188_v47 = vrot.slane %v2054_v26, %v4985_v4  ;;  %4237 = vmatprep.subr.mxu0 %v4502_v0 }
 0x90a   : > { %v1993_v54 = vpop.permute.xlu1 %1992  ;;  %v2605_v59 = vcombine.high %v5076_v49, %v5080_v53  ;;  %v2604_v63 = vcombine.low %v5076_v49, %v5080_v53  ;;  %v2315_v53 = vcombine.high %v5171_v43, %v4502_v0  ;;  %v2053_v27 = vrot.slane %v2039_v48, %v4985_v4  ;;  %4238 = vmatpush3.msra.mxu0 %v5181_v41 }
 0x90b   : > { %v5087_v28 = vpop.permute.xlu0 %2356  ;;  %v2019_v9 = vsel %vm1069_vm5, %v4997_v8, %v1993_v54  ;;  %v2161_v8 = vcombine.high %v2143_v35, %v4502_v0  ;;  %4249 = vmatprep.subr.mxu0 %v4502_v0  ;;  %v2316_v20 = vcombine.high %v5083_v57, %v4502_v0 }
 0x90c   : > { %v2382_v62 = vrot.slane %v5087_v28, %v4985_v4  ;;  %v5096_v1 = vrot.slane %v2605_v59, %v4991_v46  ;;  %v2021_v16 = vsel %vm2020_vm9, %v2019_v9, %v1997_v45  ;;  %v5197_v59 = vrot.slane %v2604_v63, %v4991_v46 }
 0x90d   : > { %2324 = vrot.lane.b32.xlu0 %v5083_v57, %s5722_s22  ;;  %v5160_v18 = vrot.slane %v2161_v8, %v4985_v4 }
 0x90e   : > { %v2001_v12 = vpop.permute.xlu1 %2000  ;;  %v2391_v2 = vcombine.high %v2367_v60, %v2382_v62  ;;  %2645 = vrot.lane.b32.xlu1 %v5096_v1, %s5722_s22  ;;  %v2390_v23 = vcombine.low %v2367_v60, %v2382_v62  ;;  %v2589_v60 = vcombine.high %v5071_v34, %v4502_v0  ;;  %v2636_v61 = vcombine.high %v5197_v59, %v4502_v0 }
 0x90f   : > { %v5104_v6 = vpop.permute.xlu0 %2677  ;;  %v2022_v17 = vsel %vm776_vm4, %v2021_v16, %v2001_v12  ;;  %v2192_v49 = vcombine.low %v2160_v30, %v5160_v18  ;;  %v2085_v12 = vcombine.low %v2053_v27, %v5188_v47 }
 0x910   : > { %v5108_v52 = vrot.slane %v5104_v6, %v4985_v4  ;;  %v5111_v55 = vrot.slane %v2391_v2, %v4991_v46  ;;  %v5174_v45 = vrot.slane %v2390_v23, %v4991_v46  ;;  %v2574_v2 = vcombine.high %v5025_v32, %v4502_v0 }
 0x911   : > { %v2200_v62 = vrot.slane %v2192_v49, %v4991_v46  ;;  %v5221_v34 = vrot.slane %v2589_v60, %v4985_v4  ;;  %v5226_v50 = vrot.slane %v2085_v12, %v4991_v46  ;;  %v2482_v32 = vcombine.high %v5036_v39, %v4502_v0 }
 0x912   : > { %v2005_v56 = vpop.permute.xlu1 %2004  ;;  %v2712_v11 = vcombine.high %v5102_v5, %v5108_v52  ;;  %2431 = vrot.lane.b32.xlu1 %v5111_v55, %s5722_s22  ;;  %v2422_v54 = vcombine.high %v5174_v45, %v4502_v0  ;;  %v2711_v3 = vcombine.low %v5102_v5, %v5108_v52  ;;  %v2530_v5 = vcombine.high %v5064_v44, %v4502_v0 }
 0x913   : > { %v2024_v36 = vsel %vm2023_vm10, %v2022_v17, %v2005_v56  ;;  %v2637_v56 = vcombine.high %v5096_v1, %v4502_v0  ;;  %v2375_v52 = vcombine.high %v5087_v28, %v4502_v0  ;;  %v2423_v1 = vcombine.high %v5111_v55, %v4502_v0 }
 0x914   : > { %v5126_v10 = vrot.slane %v2712_v11, %v4991_v46  ;;  %v5231_v11 = vrot.slane %v2574_v2, %v4985_v4  ;;  %v5245_v9 = vrot.slane %v2711_v3, %v4991_v46  ;;  %v2360_v39 = vcombine.high %v5029_v33, %v4502_v0 }
 0x915   : > { %v2268_v44 = vcombine.high %v5053_v42, %v4502_v0  ;;  %v2193_v28 = vcombine.high %v2160_v30, %v5160_v18  ;;  %v2496_v55 = vrot.slane %v2482_v32, %v4985_v4  ;;  %v2389_v16 = vrot.slane %v2375_v52, %v4985_v4 }
 0x916   : > { %v2013_v58 = vpop.permute.xlu1 %2012  ;;  %2752 = vrot.lane.b32.xlu0 %v5126_v10, %s5722_s22  ;;  %2106 = vrot.lane.b32.xlu1 %v2101_v13, %s4515_s23  ;;  %v2620_v13 = vcombine.low %v5231_v11, %v5221_v34  ;;  %v2743_v8 = vcombine.high %v5245_v9, %v4502_v0  ;;  %v2253_v17 = vcombine.high %v5023_v24, %v4502_v0  ;;  %s5750_s22 = smov 96  }
 0x917   : > { %v2282_v42 = vrot.slane %v2268_v44, %v4985_v4  ;;  %v5273_v23 = vrot.slane %v2193_v28, %v4991_v46  ;;  %v2696_v18 = vcombine.high %v5104_v6, %v4502_v0  ;;  %v2811_v44 = vld [vmem:[%s5710_s14 + $0x18] sm:$0xff]  ;;  %v2810_v28 = vld [vmem:[%s5710_s14 + $0x10] sm:$0xff] }
 0x919   : > { %v2710_v30 = vrot.slane %v2696_v18, %v4985_v4 }
 0x91a   : > { %v2009_v22 = vpop.permute.xlu1 %2008  ;;  %2534 = vrot.lane.b32.xlu0 %v2529_v31, %s4515_s23  ;;  %2213 = vrot.lane.b32.xlu1 %v2208_v19, %s4515_s23  ;;  %v2374_v19 = vrot.slane %v2360_v39, %v4985_v4 }
 0x91b   : > { %v2026_v35 = vsel %vm2025_vm11, %v2024_v36, %v2009_v22  ;;  %v2267_v22 = vrot.slane %v2253_v17, %v4985_v4 }
 0x91c   : > { %v5157_v21 = vsel %vm2027_vm12, %v2026_v35, %v2013_v58  ;;  %v2467_v58 = vcombine.high %v5021_v29, %v4502_v0  ;;  %v2628_v29 = vrot.slane %v2620_v13, %v4991_v46  ;;  %v2406_v31 = vcombine.low %v2374_v19, %v2389_v16  ;;  %v2814_v13 = vld [vmem:[%s5710_s14 + $0x30] sm:$0xff] }
 0x91d   : > { %v2086_v35 = vcombine.high %v2053_v27, %v5188_v47  ;;  %v2300_v57 = vcombine.high %v2267_v22, %v2282_v42  ;;  %v2299_v63 = vcombine.low %v2267_v22, %v2282_v42  ;;  %v2210_v47 = vcombine.high %v2200_v62, %v4502_v0 }
 0x91e   : > { %2114 = vrot.lane.b32.xlu0 %v2102_v25, %s4516_s28  ;;  %2221 = vrot.lane.b32.xlu1 %v2209_v14, %s4516_s28  ;;  %v2481_v33 = vrot.slane %v2467_v58, %v4985_v4  ;;  %v5281_v40 = vrot.slane %v2406_v31, %v4991_v46  ;;  %v2681_v25 = vcombine.high %v5034_v38, %v4502_v0  ;;  %v2812_v58 = vld [vmem:[%s5710_s14 + $0x20] sm:$0xff] }
 0x91f   : > { %v2100_v26 = vrot.slane %v2086_v35, %v4991_v46  ;;  %v2314_v14 = vrot.slane %v2300_v57, %v4991_v46  ;;  %v2307_v48 = vrot.slane %v2299_v63, %v4991_v46  ;;  %v2744_v38 = vcombine.high %v5126_v10, %v4502_v0 }
 0x920   : > { %v2513_v36 = vcombine.low %v2481_v33, %v2496_v55  ;;  %v2514_v49 = vcombine.high %v2481_v33, %v2496_v55  ;;  %v2695_v6 = vrot.slane %v2681_v25, %v4985_v4  ;;  %v2621_v10 = vcombine.high %v5231_v11, %v5221_v34 }
 0x921   : > { %v2407_v2 = vcombine.high %v2374_v19, %v2389_v16  ;;  %v2317_v39 = vcombine.high %v2307_v48, %v4502_v0  ;;  %v2211_v55 = vcombine.high %v5273_v23, %v4502_v0  ;;  %v2809_v16 = vld [vmem:[%s5710_s14 + $0x8] sm:$0xff]  ;;  %v5370_v19 = vpop.permute.xlu0 %2016 }
 0x922   : > { %2320 = vrot.lane.b32.xlu0 %v2315_v53, %s4515_s23  ;;  %2427 = vrot.lane.b32.xlu1 %v2422_v54, %s4515_s23  ;;  %v2521_v24 = vrot.slane %v2513_v36, %v4991_v46  ;;  %v2638_v53 = vcombine.high %v2628_v29, %v4502_v0  ;;  %v2528_v54 = vrot.slane %v2514_v49, %v4991_v46 }
 0x923   : > { %v2727_v27 = vcombine.low %v2695_v6, %v2710_v30  ;;  %v2635_v12 = vrot.slane %v2621_v10, %v4991_v46  ;;  %v2728_v32 = vcombine.high %v2695_v6, %v2710_v30 }
 0x924   : > { %v2532_v60 = vcombine.high %v2528_v54, %v4502_v0  ;;  %v2531_v52 = vcombine.high %v2521_v24, %v4502_v0 }
 0x925   : > { %v2735_v4 = vrot.slane %v2727_v27, %v4991_v46  ;;  %v2639_v3 = vcombine.high %v2635_v12, %v4502_v0  ;;  %v2742_v11 = vrot.slane %v2728_v32, %v4991_v46 }
 0x926   : > { %2641 = vrot.lane.b32.xlu0 %v2636_v61, %s4515_s23  ;;  %2225 = vrot.lane.b32.xlu1 %v2200_v62, %s5723_s24  ;;  %v2318_v62 = vcombine.high %v2314_v14, %v4502_v0 }
 0x927   : > { %v2745_v61 = vcombine.high %v2735_v4, %v4502_v0  ;;  %v2746_v33 = vcombine.high %v2742_v11, %v4502_v0 }
 0x92a   : > { %2118 = vrot.lane.b32.xlu0 %v5226_v50, %s5723_s24  ;;  %2649 = vrot.lane.b32.xlu1 %v2637_v56, %s4516_s28  ;;  %v2421_v56 = vrot.slane %v2407_v2, %v4991_v46  ;;  %v2813_v46 = vld [vmem:[%s5710_s14 + $0x28] sm:$0xff] }
 0x92c   : > { %v2425_v34 = vcombine.high %v2421_v56, %v4502_v0 }
 0x92e   : > { %2542 = vrot.lane.b32.xlu0 %v2530_v5, %s4516_s28  ;;  %2435 = vrot.lane.b32.xlu1 %v2423_v1, %s4516_s28  ;;  %v2103_v5 = vcombine.high %v5226_v50, %v4502_v0  ;;  %v2815_v1 = vld [vmem:[%s5710_s14 + $0x38] sm:$0xff]  ;;  %v2104_v50 = vcombine.high %v2100_v26, %v4502_v0 }
 0x92f   : > { %4202 = vmatprep.subr.mxu1 %v2815_v1 }
 0x930   : > { %4203 = vmatpush3.msra.mxu1 %v2815_v1 }
 0x931   : > { %4204 = vmatprep.subr.mxu1 %v2814_v13 }
 0x932   : > { %2748 = vrot.lane.b32.xlu0 %v2743_v8, %s4515_s23  ;;  %2653 = vrot.lane.b32.xlu1 %v2628_v29, %s5723_s24  ;;  %s5749_s23 = smov 56   ;;  %v2808_v8 = vld [vmem:[%s5710_s14] sm:$0xff]  ;;  %v2424_v29 = vcombine.high %v5281_v40, %v4502_v0 }
 0x933   : > { %4205 = vmatpush3.msra.mxu1 %v2814_v13 }
 0x934   : > { %4206 = vmatprep.subr.mxu1 %v2813_v46 }
 0x935   : > { %4207 = vmatpush3.msra.mxu1 %v2813_v46 }
 0x936   : > { %2328 = vrot.lane.b32.xlu0 %v2316_v20, %s4516_s28  ;;  %2233 = vrot.lane.b32.xlu1 %v5273_v23, %s4519_s21 }
 0x937   : > { %4208 = vmatprep.subr.mxu1 %v2812_v58 }
 0x938   : > { %4209 = vmatpush3.msra.mxu1 %v2812_v58 }
 0x939   : > { %4210 = vmatprep.subr.mxu1 %v2811_v44 }
 0x93a   : > { %2546 = vrot.lane.b32.xlu0 %v2521_v24, %s5723_s24  ;;  %2439 = vrot.lane.b32.xlu1 %v5281_v40, %s5723_s24 }
 0x93b   : > { %4211 = vmatpush3.msra.mxu1 %v2811_v44 }
 0x93c   : > { %4212 = vmatprep.subr.mxu1 %v2810_v28 }
 0x93d   : > { %4213 = vmatpush3.msra.mxu1 %v2810_v28 }
 0x93e   : > { %2126 = vrot.lane.b32.xlu0 %v2100_v26, %s4519_s21  ;;  %2340 = vrot.lane.b32.xlu1 %v2314_v14, %s4519_s21 }
 0x93f   : > { %4214 = vmatprep.subr.mxu1 %v2809_v16 }
 0x940   : > { %4215 = vmatpush3.msra.mxu1 %v2809_v16 }
 0x941   : > { %4216 = vmatprep.subr.mxu1 %v2808_v8 }
 0x942   : > { %2332 = vrot.lane.b32.xlu0 %v2307_v48, %s5723_s24  ;;  %2229 = vrot.lane.b32.xlu1 %v2210_v47, %s4520_s3 }
 0x943   : > { %4217 = vmatpush3.msra.mxu1 %v2808_v8 }
 0x944   : > { %4228 = vmatprep.subr.mxu1 %v4502_v0 }
 0x946   : > { %2756 = vrot.lane.b32.xlu0 %v2744_v38, %s4516_s28  ;;  %2657 = vrot.lane.b32.xlu1 %v2638_v53, %s4520_s3  ;;  %s5752_s28 = smov 16  }
 0x94a   : > { %2554 = vrot.lane.b32.xlu0 %v2528_v54, %s4519_s21  ;;  %2558 = vrot.lane.b32.xlu1 %v2532_v60, %s5727_s19 }
 0x94e   : > { %2760 = vrot.lane.b32.xlu0 %v2735_v4, %s5723_s24  ;;  %2764 = vrot.lane.b32.xlu1 %v2745_v61, %s4520_s3  ;;  %s4062_s24 = sshll.u32 %s4654_s12, 5 }
 0x952   : > { %2661 = vrot.lane.b32.xlu0 %v2635_v12, %s4519_s21  ;;  %2344 = vrot.lane.b32.xlu1 %v2318_v62, %s5727_s19 }
 0x956   : > { %2447 = vrot.lane.b32.xlu0 %v2421_v56, %s4519_s21  ;;  %2665 = vrot.lane.b32.xlu1 %v2639_v3, %s5727_s19 }
 0x95a   : > { %2768 = vrot.lane.b32.xlu0 %v2742_v11, %s4519_s21  ;;  %2451 = vrot.lane.b32.xlu1 %v2425_v34, %s5727_s19 }
 0x95e   : > { %2122 = vrot.lane.b32.xlu0 %v2103_v5, %s4520_s3 }
 0x962   : > { %2550 = vrot.lane.b32.xlu0 %v2531_v52, %s4520_s3 }
 0x966   : > { %2130 = vrot.lane.b32.xlu0 %v2104_v50, %s5749_s23 }
 0x96a   : > { %2336 = vrot.lane.b32.xlu0 %v2317_v39, %s4520_s3 }
 0x96e   : > { %2237 = vrot.lane.b32.xlu0 %v2211_v55, %s5749_s23 }
 0x972   : > { %2443 = vrot.lane.b32.xlu0 %v2424_v29, %s4520_s3  ;;  %s3757_s3 = sld [smem:[#allocation3]] }
 0x974   : > { %v2218_v17 = vpop.permute.xlu1 %2217 }
 0x976   : > { %2772 = vrot.lane.b32.xlu0 %v2746_v33, %s5749_s23  ;;  %s622_s23 = sand.u32 1, %s4492_s25  }
 0x978   : > { %v2539_v42 = vpop.permute.xlu1 %2538 }
 0x97b   : > { %v2111_v20 = vpop.permute.xlu0 %2110 }
 0x97f   : > { %v2325_v36 = vpop.permute.xlu0 %2324 }
 0x980   : > { %v2646_v23 = vpop.permute.xlu1 %2645 }
 0x984   : > { %v5372_v31 = vpop.permute.xlu1 %2431 }
 0x988   : > { %v5374_v22 = vpop.permute.xlu0 %2752  ;;  %v2107_v24 = vpop.permute.xlu1 %2106 }
 0x989   : > { %v2133_v30 = vsel %vm1069_vm5, %v5114_v7, %v2107_v24 }
 0x98a   : > { %v2134_v38 = vsel %vm2020_vm9, %v2133_v30, %v2111_v20 }
 0x98c   : > { %v2535_v40 = vpop.permute.xlu0 %2534  ;;  %v2214_v35 = vpop.permute.xlu1 %2213 }
 0x98d   : > { %v2561_v57 = vsel %vm1069_vm5, %v5131_v15, %v2535_v40  ;;  %v2240_v16 = vsel %vm1069_vm5, %v5123_v51, %v2214_v35  ;;  %v2030_v51 = vsel %vm2029_vm13, %v5157_v21, %v5370_v19 }
 0x98e   : > { %v2562_v18 = vsel %vm2020_vm9, %v2561_v57, %v2539_v42 }
 0x990   : > { %v2115_v26 = vpop.permute.xlu0 %2114  ;;  %v2222_v14 = vpop.permute.xlu1 %2221 }
 0x991   : > { %v2135_v15 = vsel %vm776_vm4, %v2134_v38, %v2115_v26 }
 0x994   : > { %v2321_v63 = vpop.permute.xlu0 %2320  ;;  %v2428_v25 = vpop.permute.xlu1 %2427 }
 0x995   : > { %v2347_v8 = vsel %vm1069_vm5, %v5171_v43, %v2321_v63  ;;  %v2454_v21 = vsel %vm1069_vm5, %v5174_v45, %v2428_v25 }
 0x996   : > { %v2348_v24 = vsel %vm2020_vm9, %v2347_v8, %v2325_v36 }
 0x998   : > { %v2642_v48 = vpop.permute.xlu0 %2641  ;;  %v2226_v47 = vpop.permute.xlu1 %2225 }
 0x999   : > { %v2668_v49 = vsel %vm1069_vm5, %v5197_v59, %v2642_v48 }
 0x99a   : > { %v2669_v6 = vsel %vm2020_vm9, %v2668_v49, %v2646_v23  ;;  %v2241_v23 = vsel %vm2020_vm9, %v2240_v16, %v2218_v17 }
 0x99b   : > { %v2242_v35 = vsel %vm776_vm4, %v2241_v23, %v2222_v14  ;;  %v5423_v14 = vld [vmem:[%s5713_s17] ss:$0 sm:$0xff] }
 0x99c   : > { %v2119_v53 = vpop.permute.xlu0 %2118  ;;  %v2650_v27 = vpop.permute.xlu1 %2649  ;;  %v2243_v57 = vsel %vm2023_vm10, %v2242_v35, %v2226_v47 }
 0x99d   : > { %v2136_v54 = vsel %vm2023_vm10, %v2135_v15, %v2119_v53  ;;  %v2670_v38 = vsel %vm776_vm4, %v2669_v6, %v2650_v27 }
 0x9a0   : > { %v2543_v60 = vpop.permute.xlu0 %2542  ;;  %v2436_v61 = vpop.permute.xlu1 %2435 }
 0x9a1   : > { %v2563_v4 = vsel %vm776_vm4, %v2562_v18, %v2543_v60  ;;  %v2455_v60 = vsel %vm2020_vm9, %v2454_v21, %v5372_v31 }
 0x9a4   : > { %v2749_v7 = vpop.permute.xlu0 %2748  ;;  %v2654_v62 = vpop.permute.xlu1 %2653 }
 0x9a5   : > { %v2775_v47 = vsel %vm1069_vm5, %v5245_v9, %v2749_v7  ;;  %v2456_v7 = vsel %vm776_vm4, %v2455_v60, %v2436_v61 }
 0x9a6   : > { %v2776_v6 = vsel %vm2020_vm9, %v2775_v47, %v5374_v22 }
 0x9a8   : > { %v2329_v10 = vpop.permute.xlu0 %2328  ;;  %v2234_v2 = vpop.permute.xlu1 %2233 }
 0x9a9   : > { %v2349_v43 = vsel %vm776_vm4, %v2348_v24, %v2329_v10 }
 0x9ac   : > { %v2547_v12 = vpop.permute.xlu0 %2546  ;;  %v5388_v56 = vpop.permute.xlu1 %2439 }
 0x9ad   : > { %v2564_v18 = vsel %vm2023_vm10, %v2563_v4, %v2547_v12  ;;  %v2671_v4 = vsel %vm2023_vm10, %v2670_v38, %v2654_v62 }
 0x9b0   : > { %v2127_v59 = vpop.permute.xlu0 %2126  ;;  %v2341_v34 = vpop.permute.xlu1 %2340 }
 0x9b4   : > { %v2333_v3 = vpop.permute.xlu0 %2332  ;;  %v2230_v52 = vpop.permute.xlu1 %2229 }
 0x9b5   : > { %v2350_v26 = vsel %vm2023_vm10, %v2349_v43, %v2333_v3  ;;  %v2244_v36 = vsel %vm2025_vm11, %v2243_v57, %v2230_v52 }
 0x9b6   : > { %v2245_v45 = vsel %vm2027_vm12, %v2244_v36, %v2234_v2 }
 0x9b8   : > { %v2757_v32 = vpop.permute.xlu0 %2756  ;;  %v2658_v13 = vpop.permute.xlu1 %2657 }
 0x9b9   : > { %v2672_v27 = vsel %vm2025_vm11, %v2671_v4, %v2658_v13  ;;  %v2777_v2 = vsel %vm776_vm4, %v2776_v6, %v2757_v32 }
 0x9bc   : > { %v2555_v11 = vpop.permute.xlu0 %2554  ;;  %v2559_v58 = vpop.permute.xlu1 %2558 }
 0x9c0   : > { %v2761_v5 = vpop.permute.xlu0 %2760  ;;  %v5394_v44 = vpop.permute.xlu1 %2764 }
 0x9c1   : > { %v2778_v61 = vsel %vm2023_vm10, %v2777_v2, %v2761_v5 }
 0x9c4   : > { %v2662_v1 = vpop.permute.xlu0 %2661  ;;  %v2345_v42 = vpop.permute.xlu1 %2344 }
 0x9c5   : > { %v2673_v3 = vsel %vm2027_vm12, %v2672_v27, %v2662_v1 }
 0x9c6   : > { %v2982_v25 = vpop.f32.mrf.mxu0 }
 0x9c7   : > { %v2983_v9 = vadd.f32 %v5423_v14, %v2982_v25 }
 0x9c8   : > { %v5390_v46 = vpop.permute.xlu0 %2447  ;;  %v2666_v49 = vpop.permute.xlu1 %2665 }
 0x9c9   : > { %2994 = vrot.lane.b32.xlu1 %v2983_v9, %s5750_s22  ;;  %v2674_v22 = vsel %vm2029_vm13, %v2673_v3, %v2666_v49 }
 0x9ca   : > { %v2795_v5 = vrot.slane %v2674_v22, 4 }
 0x9cc   : > { %v5392_v50 = vpop.permute.xlu0 %2768  ;;  %v2452_v1 = vpop.permute.xlu1 %2451 }
 0x9d0   : > { %v2123_v39 = vpop.permute.xlu0 %2122 }
 0x9d1   : > { %v2137_v55 = vsel %vm2025_vm11, %v2136_v54, %v2123_v39 }
 0x9d2   : > { %v2138_v33 = vsel %vm2027_vm12, %v2137_v55, %v2127_v59  ;;  %v4227_v59 = vpop.f32.mrf.mxu0 }
 0x9d4   : > { %v2551_v28 = vpop.permute.xlu0 %2550 }
 0x9d5   : > { %v2565_v30 = vsel %vm2025_vm11, %v2564_v18, %v2551_v28 }
 0x9d6   : > { %v2566_v15 = vsel %vm2027_vm12, %v2565_v30, %v2555_v11 }
 0x9d7   : > { %v2567_v31 = vsel %vm2029_vm13, %v2566_v15, %v2559_v58 }
 0x9d8   : > { %v2131_v29 = vpop.permute.xlu0 %2130  ;;  %v2792_v39 = vrot.slane %v2567_v31, 6 }
 0x9d9   : > { %v2139_v20 = vsel %vm2029_vm13, %v2138_v33, %v2131_v29 }
 0x9da   : > { %v2783_v40 = vrot.slane %v2139_v20, 6 }
 0x9dc   : > { %v2801_v63 = vsel %vm2800_vm14, %v2030_v51, %v2783_v40  ;;  %v2337_v17 = vpop.permute.xlu0 %2336 }
 0x9dd   : > { %v2351_v48 = vsel %vm2025_vm11, %v2350_v26, %v2337_v17 }
 0x9de   : > { %v2352_v19 = vsel %vm2027_vm12, %v2351_v48, %v2341_v34  ;;  %v2457_v34 = vsel %vm2023_vm10, %v2456_v7, %v5388_v56  ;;  %v2779_v56 = vsel %vm2025_vm11, %v2778_v61, %v5394_v44 }
 0x9df   : > { %v2353_v53 = vsel %vm2029_vm13, %v2352_v19, %v2345_v42  ;;  %v2780_v55 = vsel %vm2027_vm12, %v2779_v56, %v5392_v50  ;;  %v4041_v50 = vld [vmem:[%s5712_s16] ss:$0 sm:$0xff] }
 0x9e0   : > { %v2238_v54 = vpop.permute.xlu0 %2237  ;;  %v2789_v62 = vrot.slane %v2353_v53, 2 }
 0x9e1   : > { %v2246_v10 = vsel %vm2029_vm13, %v2245_v45, %v2238_v54 }
 0x9e2   : > { %v2786_v12 = vrot.slane %v2246_v10, 4 }
 0x9e4   : > { %v2444_v11 = vpop.permute.xlu0 %2443  ;;  %v2802_v52 = vsel %vm657_vm2, %v2801_v63, %v2786_v12 }
 0x9e5   : > { %v2458_v13 = vsel %vm2025_vm11, %v2457_v34, %v2444_v11  ;;  %v2804_v32 = vsel %vm2803_vm15, %v2802_v52, %v2789_v62 }
 0x9e6   : > { %v2459_v58 = vsel %vm2027_vm12, %v2458_v13, %v5390_v46  ;;  %4218 = vmatprep.mubr.msk.f32.mxu1 %vm1459_vm8, %v2804_v32 }
 0x9e7   : > { %v2460_v28 = vsel %vm2029_vm13, %v2459_v58, %v2452_v1 }
 0x9e8   : > { %v2805_v16 = vsel %vm2800_vm14, %v2460_v28, %v2792_v39  ;;  %v2773_v8 = vpop.permute.xlu0 %2772 }
 0x9e9   : > { %v2781_v29 = vsel %vm2029_vm13, %v2780_v55, %v2773_v8  ;;  %v2806_v33 = vsel %vm657_vm2, %v2805_v16, %v2795_v5 }
 0x9ea   : > { %v2798_v42 = vrot.slane %v2781_v29, 2 }
 0x9ec   : > { %v2807_v46 = vsel %vm2803_vm15, %v2806_v33, %v2798_v42 }
 0x9ed   : > { %4219 = vmatmul.mubr.msk.f32.vlgmr.msra.gmra.mxu1 %vm1459_vm8, %v2807_v46 }
 0x9ee   : > { %4229 = vmatpush3.msra.mxu1 %v5152_v37  ;;  %4232 = vmatprep.mubr.msk.f32.mxu1 %vm4506_vm7, %v4502_v0 }
 0x9ef   : > { %4230 = vmatprep.subr.mxu1 %v4502_v0 }
 0x9f0   : > { %4231 = vmatpush3.msra.mxu1 %v5181_v41 }
 0x9f1   : > { %4242 = vmatprep.subr.mxu1 %v4502_v0 }
 0xa3b   : > { %v2995_v57 = vpop.permute.xlu1 %2994 }
 0xaad   : > { %v4220_v44 = vpop.f32.mrf.mxu1 }
 0xaae   : > { %v5473_v20 = vadd.f32 %v4220_v44, %v4041_v50 }
 0xaaf   : > { %v2898_v23 = vpop.f32.mrf.mxu1 }
 0xab0   : > { %v5475_v24 = vadd.f32 %v4041_v50, %v2898_v23 }
 0xab2   : > { %v2986_v40 = vadd.f32 %v2983_v9, %v5475_v24 }
 0xab4   : > { %v4045_v51 = vmul.f32 -1.442695, %v2986_v40 }
 0xab6   : > { %4374 = vpow2.f32 %v4045_v51 }
 0xac3   : > { %v4375_v35 = vpop.eup %4374 }
 0xac4   : > { %v2990_v43 = vadd.f32 1.0, %v4375_v35 }
 0xac6   : > { %4376 = vrcp.f32 %v2990_v43 }
 0xad3   : > { %v4377_v18 = vpop.eup %4376 }
 0xad4   : > { %v2997_v26 = vmul.f32 %v4377_v18, %v2995_v57  ;;  %v3004_v30 = vsub.f32 1.0, %v4377_v18  ;;  %v3010_v21 = vmul.f32 0.0, %v4377_v18 }
 0xad6   : > { %2999 = vrot.lane.b32.xlu0 %v2997_v26, %s5751_s29 }
 0xb48   : > { %v3000_v63 = vpop.permute.xlu0 %2999 }
 0xb49   : > { %v3002_v17 = vadd.f32 %v3000_v63, %v5475_v24 }
 0xb4b   : > { %4378 = vtanh.f32 %v3002_v17 }
 0xb58   : > { %v4379_v36 = vpop.eup %4378 }
 0xb59   : > { %3006 = vrot.lane.b32.xlu1 %v4379_v36, %s5747_s4 }
 0xbcb   : > { %v3007_v48 = vpop.permute.xlu1 %3006 }
 0xbcc   : > { %v3009_v19 = vmul.f32 %v3007_v48, %v3004_v30 }
 0xbce   : > { %v5481_v47 = vadd.f32 %v3010_v21, %v3009_v19 }
 0xbd0   : > { %3013 = vrot.lane.b32.xlu0 %v5481_v47, %s5747_s4  ;;  %v3113_v2 = vrot.slane %v5481_v47, 6 }
 0xc42   : > { %v3014_v49 = vpop.permute.xlu0 %3013 }
 0xc43   : > { %4233 = vmatmul.mubr.msk.f32.vlgmr.msra.gmra.mxu1 %vm2020_vm9, %v3014_v49 }
 0xc44   : > { %4243 = vmatpush3.msra.mxu1 %v5152_v37  ;;  %4246 = vmatprep.mubr.msk.f32.mxu1 %vm4506_vm7, %v4502_v0 }
 0xc45   : > { %4244 = vmatprep.subr.mxu1 %v4502_v0 }
 0xc46   : > { %4245 = vmatpush3.msra.mxu1 %v5181_v41 }
 0xc47   : > { %4256 = vmatprep.subr.mxu1 %v4502_v0 }
 0xd03   : > { %v3083_v38 = vpop.f32.mrf.mxu1 }
 0xd04   : > { %v3084_v15 = vadd.f32 %v5423_v14, %v3083_v38 }
 0xd05   : > { %v4234_v53 = vpop.f32.mrf.mxu1 }
 0xd06   : > { %v3088_v54 = vrot.slane %v3084_v15, 6 }
 0xd08   : > { %3097 = vrot.lane.b32.xlu1 %v3088_v54, %s5750_s22  ;;  %v3090_v45 = vadd.f32 %v3088_v54, %v5475_v24 }
 0xd0a   : > { %v4047_v25 = vmul.f32 -1.442695, %v3090_v45 }
 0xd0c   : > { %4380 = vpow2.f32 %v4047_v25 }
 0xd19   : > { %v4381_v60 = vpop.eup %4380 }
 0xd1a   : > { %v3094_v4 = vadd.f32 1.0, %v4381_v60 }
 0xd1c   : > { %4382 = vrcp.f32 %v3094_v4 }
 0xd29   : > { %v4383_v10 = vpop.eup %4382 }
 0xd2a   : > { %v3107_v59 = vsub.f32 1.0, %v4383_v10  ;;  %v3115_v62 = vmul.f32 %v4383_v10, %v3113_v2 }
 0xd7a   : > { %v3098_v9 = vpop.permute.xlu1 %3097 }
 0xd7b   : > { %v3100_v7 = vmul.f32 %v4383_v10, %v3098_v9 }
 0xd7d   : > { %3102 = vrot.lane.b32.xlu0 %v3100_v7, %s5751_s29 }
 0xdef   : > { %v3103_v6 = vpop.permute.xlu0 %3102 }
 0xdf0   : > { %v3105_v27 = vadd.f32 %v3103_v6, %v5475_v24 }
 0xdf2   : > { %4384 = vtanh.f32 %v3105_v27 }
 0xdff   : > { %v4385_v12 = vpop.eup %4384 }
 0xe00   : > { %3109 = vrot.lane.b32.xlu1 %v4385_v12, %s5747_s4 }
 0xe72   : > { %v3110_v3 = vpop.permute.xlu1 %3109 }
 0xe73   : > { %v3112_v31 = vmul.f32 %v3110_v3, %v3107_v59 }
 0xe75   : > { %v3116_v34 = vadd.f32 %v3115_v62, %v3112_v31 }
 0xe77   : > { %v5499_v61 = vrot.slane %v3116_v34, 2  ;;  %v3219_v33 = vrot.slane %v3116_v34, 6 }
 0xe79   : > { %3119 = vrot.lane.b32.xlu0 %v5499_v61, %s5747_s4 }
 0xeeb   : > { %v3120_v22 = vpop.permute.xlu0 %3119 }
 0xeec   : > { %4240 = vmatmul.mubr.msk.f32.vlgmr.msra.gmra.mxu0 %vm2020_vm9, %v3120_v22 }
 0xeed   : > { %4250 = vmatpush3.msra.mxu0 %v5152_v37  ;;  %4253 = vmatprep.mubr.msk.f32.mxu0 %vm4506_vm7, %v4502_v0 }
 0xeee   : > { %4251 = vmatprep.subr.mxu0 %v4502_v0 }
 0xeef   : > { %4252 = vmatpush3.msra.mxu0 %v5181_v41 }
 0xef0   : > { %4263 = vmatprep.subr.mxu0 %v4502_v0 }
 0xfac   : > { %v3189_v11 = vpop.f32.mrf.mxu0 }
 0xfad   : > { %v3190_v52 = vadd.f32 %v5423_v14, %v3189_v11 }
 0xfae   : > { %v4241_v13 = vpop.f32.mrf.mxu0 }
 0xfaf   : > { %v3194_v32 = vrot.slane %v3190_v52, 4 }
 0xfb1   : > { %3203 = vrot.lane.b32.xlu1 %v3194_v32, %s5750_s22  ;;  %v3196_v1 = vadd.f32 %v3194_v32, %v5475_v24 }
 0xfb3   : > { %v4049_v39 = vmul.f32 -1.442695, %v3196_v1 }
 0xfb5   : > { %4386 = vpow2.f32 %v4049_v39 }
 0xfc2   : > { %v4387_v58 = vpop.eup %4386 }
 0xfc3   : > { %v3200_v56 = vadd.f32 1.0, %v4387_v58 }
 0xfc5   : > { %4388 = vrcp.f32 %v3200_v56 }
 0xfd2   : > { %v4389_v5 = vpop.eup %4388 }
 0xfd3   : > { %v3213_v42 = vsub.f32 1.0, %v4389_v5  ;;  %v3221_v50 = vmul.f32 %v4389_v5, %v3219_v33 }
0x1023   : > { %v3204_v28 = vpop.permute.xlu1 %3203 }
0x1024   : > { %v3206_v55 = vmul.f32 %v4389_v5, %v3204_v28 }
0x1026   : > { %3208 = vrot.lane.b32.xlu0 %v3206_v55, %s5751_s29 }
0x1098   : > { %v3209_v16 = vpop.permute.xlu0 %3208 }
0x1099   : > { %v3211_v8 = vadd.f32 %v3209_v16, %v5475_v24 }
0x109b   : > { %4390 = vtanh.f32 %v3211_v8 }
0x10a8   : > { %v4391_v29 = vpop.eup %4390 }
0x10a9   : > { %3215 = vrot.lane.b32.xlu1 %v4391_v29, %s5747_s4 }
0x111b   : > { %v3216_v46 = vpop.permute.xlu1 %3215 }
0x111c   : > { %v3218_v44 = vmul.f32 %v3216_v46, %v3213_v42 }
0x111e   : > { %v3222_v23 = vadd.f32 %v3221_v50, %v3218_v44 }
0x1120   : > { %v5516_v40 = vrot.slane %v3222_v23, 4  ;;  %v3325_v15 = vrot.slane %v3222_v23, 6 }
0x1122   : > { %3225 = vrot.lane.b32.xlu0 %v5516_v40, %s5747_s4 }
0x1194   : > { %v3226_v51 = vpop.permute.xlu0 %3225 }
0x1195   : > { %4247 = vmatmul.mubr.msk.f32.vlgmr.msra.gmra.mxu1 %vm2020_vm9, %v3226_v51 }
0x1196   : > { %4257 = vmatpush3.msra.mxu1 %v5152_v37  ;;  %4260 = vmatprep.mubr.msk.f32.mxu1 %vm4506_vm7, %v4502_v0 }
0x1197   : > { %4258 = vmatprep.subr.mxu1 %v4502_v0 }
0x1198   : > { %4259 = vmatpush3.msra.mxu1 %v5181_v41 }
0x1199   : > { %4270 = vmatprep.subr.mxu1 %v4502_v0 }
0x1255   : > { %v3295_v35 = vpop.f32.mrf.mxu1 }
0x1256   : > { %v3296_v43 = vadd.f32 %v5423_v14, %v3295_v35 }
0x1257   : > { %v4248_v57 = vpop.f32.mrf.mxu1 }
0x1258   : > { %v3300_v18 = vrot.slane %v3296_v43, 2 }
0x125a   : > { %3309 = vrot.lane.b32.xlu1 %v3300_v18, %s5750_s22  ;;  %v3302_v26 = vadd.f32 %v3300_v18, %v5475_v24 }
0x125c   : > { %v4051_v63 = vmul.f32 -1.442695, %v3302_v26 }
0x125e   : > { %4392 = vpow2.f32 %v4051_v63 }
0x126b   : > { %v4393_v17 = vpop.eup %4392 }
0x126c   : > { %v3306_v36 = vadd.f32 1.0, %v4393_v17 }
0x126e   : > { %4394 = vrcp.f32 %v3306_v36 }
0x127b   : > { %v4395_v30 = vpop.eup %4394 }
0x127c   : > { %v3319_v53 = vsub.f32 1.0, %v4395_v30  ;;  %v3327_v45 = vmul.f32 %v4395_v30, %v3325_v15 }
0x12cc   : > { %v3310_v48 = vpop.permute.xlu1 %3309 }
0x12cd   : > { %v3312_v21 = vmul.f32 %v4395_v30, %v3310_v48 }
0x12cf   : > { %3314 = vrot.lane.b32.xlu0 %v3312_v21, %s5751_s29 }
0x1341   : > { %v3315_v19 = vpop.permute.xlu0 %3314 }
0x1342   : > { %v3317_v49 = vadd.f32 %v3315_v19, %v5475_v24 }
0x1344   : > { %4396 = vtanh.f32 %v3317_v49 }
0x1351   : > { %v4397_v38 = vpop.eup %4396 }
0x1352   : > { %3321 = vrot.lane.b32.xlu1 %v4397_v38, %s5747_s4 }
0x13c4   : > { %v3322_v54 = vpop.permute.xlu1 %3321 }
0x13c5   : > { %v3324_v25 = vmul.f32 %v3322_v54, %v3319_v53 }
0x13c7   : > { %v3328_v60 = vadd.f32 %v3327_v45, %v3324_v25 }
0x13c9   : > { %v5533_v4 = vrot.slane %v3328_v60, 6 }
0x13cb   : > { %3331 = vrot.lane.b32.xlu0 %v5533_v4, %s5747_s4 }
0x143d   : > { %v3332_v10 = vpop.permute.xlu0 %3331 }
0x143e   : > { %4254 = vmatmul.mubr.msk.f32.vlgmr.msra.gmra.mxu0 %vm2020_vm9, %v3332_v10 }
0x143f   : > { %4264 = vmatpush3.msra.mxu0 %v5152_v37  ;;  %4267 = vmatprep.mubr.msk.f32.mxu0 %vm4506_vm7, %v4502_v0 }
0x1440   : > { %4265 = vmatprep.subr.mxu0 %v4502_v0 }
0x1441   : > { %4266 = vmatpush3.msra.mxu0 %v5181_v41 }
0x14fe   : > { %v3401_v24 = vpop.f32.mrf.mxu0 }
0x14ff   : > { %v3402_v9 = vadd.f32 %v5423_v14, %v3401_v24 }
0x1500   : > { %v4255_v7 = vpop.f32.mrf.mxu0 }
0x1501   : > { %3413 = vrot.lane.b32.xlu1 %v3402_v9, %s5750_s22  ;;  %v3405_v6 = vadd.f32 %v3402_v9, %v5473_v20 }
0x1503   : > { %v4053_v27 = vmul.f32 -1.442695, %v3405_v6 }
0x1505   : > { %4398 = vpow2.f32 %v4053_v27 }
0x1512   : > { %v4399_v12 = vpop.eup %4398 }
0x1513   : > { %v3409_v59 = vadd.f32 1.0, %v4399_v12 }
0x1515   : > { %4400 = vrcp.f32 %v3409_v59 }
0x1522   : > { %v4401_v2 = vpop.eup %4400 }
0x1523   : > { %v3423_v11 = vsub.f32 1.0, %v4401_v2  ;;  %v3430_v13 = vmul.f32 %v4401_v2, %v5533_v4 }
0x1573   : > { %v3414_v3 = vpop.permute.xlu1 %3413 }
0x1574   : > { %v3416_v31 = vmul.f32 %v4401_v2, %v3414_v3 }
0x1576   : > { %3418 = vrot.lane.b32.xlu0 %v3416_v31, %s5751_s29 }
0x15e8   : > { %v3419_v62 = vpop.permute.xlu0 %3418 }
0x15e9   : > { %v3421_v34 = vadd.f32 %v3419_v62, %v5473_v20 }
0x15eb   : > { %4402 = vtanh.f32 %v3421_v34 }
0x15f8   : > { %v4403_v22 = vpop.eup %4402 }
0x15f9   : > { %3425 = vrot.lane.b32.xlu1 %v4403_v22, %s5747_s4 }
0x166b   : > { %v3426_v52 = vpop.permute.xlu1 %3425 }
0x166c   : > { %v3428_v32 = vmul.f32 %v3426_v52, %v3423_v11 }
0x166e   : > { %v5550_v1 = vadd.f32 %v3430_v13, %v3428_v32 }
0x1670   : > { %3433 = vrot.lane.b32.xlu0 %v5550_v1, %s5747_s4  ;;  %v3533_v44 = vrot.slane %v5550_v1, 6 }
0x16e2   : > { %v3434_v39 = vpop.permute.xlu0 %3433 }
0x16e3   : > { %4261 = vmatmul.mubr.msk.f32.vlgmr.msra.gmra.mxu1 %vm2020_vm9, %v3434_v39 }
0x16e4   : > { %4271 = vmatpush3.msra.mxu1 %v5152_v37  ;;  %4274 = vmatprep.mubr.msk.f32.mxu1 %vm4506_vm7, %v4502_v0 }
0x16e5   : > { %4272 = vmatprep.subr.mxu1 %v4502_v0 }
0x16e6   : > { %4273 = vmatpush3.msra.mxu1 %v5181_v41 }
0x17a3   : > { %v3503_v58 = vpop.f32.mrf.mxu1 }
0x17a4   : > { %v3504_v56 = vadd.f32 %v5423_v14, %v3503_v58 }
0x17a5   : > { %v4262_v5 = vpop.f32.mrf.mxu1 }
0x17a6   : > { %v3508_v28 = vrot.slane %v3504_v56, 6 }
0x17a8   : > { %3517 = vrot.lane.b32.xlu1 %v3508_v28, %s5750_s22  ;;  %v3510_v55 = vadd.f32 %v3508_v28, %v5473_v20 }
0x17aa   : > { %v4055_v16 = vmul.f32 -1.442695, %v3510_v55 }
0x17ac   : > { %4404 = vpow2.f32 %v4055_v16 }
0x17b9   : > { %v4405_v8 = vpop.eup %4404 }
0x17ba   : > { %v3514_v37 = vadd.f32 1.0, %v4405_v8 }
0x17bc   : > { %4406 = vrcp.f32 %v3514_v37 }
0x17c9   : > { %v4407_v29 = vpop.eup %4406 }
0x17ca   : > { %v3527_v50 = vsub.f32 1.0, %v4407_v29  ;;  %v3535_v35 = vmul.f32 %v4407_v29, %v3533_v44 }
0x181a   : > { %v3518_v33 = vpop.permute.xlu1 %3517 }
0x181b   : > { %v3520_v42 = vmul.f32 %v4407_v29, %v3518_v33 }
0x181d   : > { %3522 = vrot.lane.b32.xlu0 %v3520_v42, %s5751_s29 }
0x188f   : > { %v3523_v0 = vpop.permute.xlu0 %3522 }
0x1890   : > { %v3525_v41 = vadd.f32 %v3523_v0, %v5473_v20 }
0x1892   : > { %4408 = vtanh.f32 %v3525_v41 }
0x189f   : > { %v4409_v46 = vpop.eup %4408 }
0x18a0   : > { %3529 = vrot.lane.b32.xlu1 %v4409_v46, %s5747_s4 }
0x1912   : > { %v3530_v23 = vpop.permute.xlu1 %3529 }
0x1913   : > { %v3532_v51 = vmul.f32 %v3530_v23, %v3527_v50 }
0x1915   : > { %v3536_v43 = vadd.f32 %v3535_v35, %v3532_v51 }
0x1917   : > { %v5567_v57 = vrot.slane %v3536_v43, 2  ;;  %v3639_v25 = vrot.slane %v3536_v43, 6 }
0x1919   : > { %3539 = vrot.lane.b32.xlu0 %v5567_v57, %s5747_s4 }
0x198b   : > { %v3540_v18 = vpop.permute.xlu0 %3539 }
0x198c   : > { %4268 = vmatmul.mubr.msk.f32.vlgmr.msra.gmra.mxu0 %vm2020_vm9, %v3540_v18 }
0x1a4c   : > { %v3609_v26 = vpop.f32.mrf.mxu0 }
0x1a4d   : > { %v3610_v63 = vadd.f32 %v5423_v14, %v3609_v26 }
0x1a4e   : > { %v4269_v17 = vpop.f32.mrf.mxu0 }
0x1a4f   : > { %v3614_v36 = vrot.slane %v3610_v63, 4 }
0x1a51   : > { %3623 = vrot.lane.b32.xlu1 %v3614_v36, %s5750_s22  ;;  %v3616_v30 = vadd.f32 %v3614_v36, %v5473_v20 }
0x1a53   : > { %v4057_v48 = vmul.f32 -1.442695, %v3616_v30 }
0x1a55   : > { %4410 = vpow2.f32 %v4057_v48 }
0x1a62   : > { %v4411_v21 = vpop.eup %4410 }
0x1a63   : > { %v3620_v19 = vadd.f32 1.0, %v4411_v21 }
0x1a65   : > { %4412 = vrcp.f32 %v3620_v19 }
0x1a72   : > { %v4413_v49 = vpop.eup %4412 }
0x1a73   : > { %v3633_v60 = vsub.f32 1.0, %v4413_v49  ;;  %v3641_v24 = vmul.f32 %v4413_v49, %v3639_v25 }
0x1ac3   : > { %v3624_v38 = vpop.permute.xlu1 %3623 }
0x1ac4   : > { %v3626_v15 = vmul.f32 %v4413_v49, %v3624_v38 }
0x1ac6   : > { %3628 = vrot.lane.b32.xlu0 %v3626_v15, %s5751_s29 }
0x1b38   : > { %v3629_v53 = vpop.permute.xlu0 %3628 }
0x1b39   : > { %v3631_v54 = vadd.f32 %v3629_v53, %v5473_v20 }
0x1b3b   : > { %4414 = vtanh.f32 %v3631_v54 }
0x1b48   : > { %v4415_v45 = vpop.eup %4414 }
0x1b49   : > { %3635 = vrot.lane.b32.xlu1 %v4415_v45, %s5747_s4 }
0x1bbb   : > { %v3636_v10 = vpop.permute.xlu1 %3635 }
0x1bbc   : > { %v3638_v9 = vmul.f32 %v3636_v10, %v3633_v60  ;;  %v3831_v10 = vstv %s3757_s3  ;;  %s3933_s3 = scalar_lea.sflag [#allocation5], %s622_s23 }
0x1bbe   : > { %v3642_v7 = vadd.f32 %v3641_v24, %v3638_v9 }
0x1bc0   : > { %v5578_v6 = vrot.slane %v3642_v7, 4  ;;  %v3745_v33 = vrot.slane %v3642_v7, 6 }
0x1bc2   : > { %3645 = vrot.lane.b32.xlu0 %v5578_v6, %s5747_s4 }
0x1c34   : > { %v3646_v27 = vpop.permute.xlu0 %3645 }
0x1c35   : > { %4275 = vmatmul.mubr.msk.f32.vlgmr.msra.gmra.mxu1 %vm2020_vm9, %v3646_v27 }
0x1cf5   : > { %v3715_v12 = vpop.f32.mrf.mxu1 }
0x1cf6   : > { %v3716_v59 = vadd.f32 %v5423_v14, %v3715_v12  ;;  %v4060_v14 = vld [vmem:[%s5714_s18] ss:$0 sm:$0xff] }
0x1cf7   : > { %v4276_v2 = vpop.f32.mrf.mxu1 }
0x1cf8   : > { %v3720_v3 = vrot.slane %v3716_v59, 2 }
0x1cfa   : > { %3729 = vrot.lane.b32.xlu1 %v3720_v3, %s5750_s22  ;;  %v3722_v31 = vadd.f32 %v3720_v3, %v5473_v20  ;;  %s4009_s22 = sshll.u32 %s622_s23, 1 }
0x1cfb   : > { %s624_s1 = scalar_lea.vmem [#allocation4], %s4009_s22 }
0x1cfc   : > { %v4059_v62 = vmul.f32 -1.442695, %v3722_v31 }
0x1cfe   : > { %4416 = vpow2.f32 %v4059_v62 }
0x1d0b   : > { %v4417_v34 = vpop.eup %4416 }
0x1d0c   : > { %v3726_v22 = vadd.f32 1.0, %v4417_v34 }
0x1d0e   : > { %4418 = vrcp.f32 %v3726_v22 }
0x1d1b   : > { %v4419_v11 = vpop.eup %4418 }
0x1d1c   : > { %v3739_v42 = vsub.f32 1.0, %v4419_v11  ;;  %v3747_v41 = vmul.f32 %v4419_v11, %v3745_v33 }
0x1d6c   : > { %v3730_v52 = vpop.permute.xlu1 %3729 }
0x1d6d   : > { %v3732_v13 = vmul.f32 %v4419_v11, %v3730_v52 }
0x1d6f   : > { %3734 = vrot.lane.b32.xlu0 %v3732_v13, %s5751_s29  ;;  %s3946_s29 = sshll.u32 %s624_s1, 4  ;;  %s3947_s29 = int_to_ptr.vmem [resolvable:$true] %s3946_s29 }
0x1d70   : > { %s4440_s5 = scalar_lea.vmem %s3947_s29, 32 }
0x1d71   : > { %p4441_p11 = scmp.ne.s32.totalorder %s3947_s29, %s4440_s5 }
0x1d73   : > { %3763 = vrot.lane.b32.xlu0 %v4060_v14, %s5752_s28  ;;  %s5660_s28 = scalar_lea.hbm %s5716_s20, %s4062_s24  ;;  %p4442_p12 = pnand %p4441_p11, %p4671_p5 }
0x1d75   : > { %p4443_p13 = pneg %p4442_p12 }
0x1de1   : > { %v3735_v32 = vpop.permute.xlu0 %3734 }
0x1de2   : > { %v3737_v39 = vadd.f32 %v3735_v32, %v5473_v20 }
0x1de4   : > { %4420 = vtanh.f32 %v3737_v39 }
0x1de5   : > { %v3764_v58 = vpop.permute.xlu0 %3763 }
0x1de6   : > { %v3767_v56 = vmul.f32 %v3764_v58, %v5499_v61  ;;  %v3769_v5 = vmul.f32 %v3764_v58, %v5533_v4  ;;  %v3771_v28 = vmul.f32 %v3764_v58, %v5567_v57  ;;  %v3766_v16 = vmul.f32 %v3764_v58, %v5481_v47 }
0x1de7   : > { %v3768_v20 = vmul.f32 %v3764_v58, %v5516_v40  ;;  %v3770_v8 = vmul.f32 %v3764_v58, %v5550_v1  ;;  %v3772_v37 = vmul.f32 %v3764_v58, %v5578_v6 }
0x1de8   : > { %3784 = vrot.lane.b32.xlu0 %v3767_v56, %s5747_s4 }
0x1dec   : > { %3788 = vrot.lane.b32.xlu0 %v3769_v5, %s5747_s4 }
0x1df0   : > { %3792 = vrot.lane.b32.xlu0 %v3771_v28, %s5747_s4 }
0x1df1   : > { %v4421_v55 = vpop.eup %4420 }
0x1df2   : > { %3741 = vrot.lane.b32.xlu1 %v4421_v55, %s5747_s4 }
0x1df6   : > { %3782 = vrot.lane.b32.xlu1 %v3766_v16, %s5747_s4 }
0x1dfa   : > { %3786 = vrot.lane.b32.xlu1 %v3768_v20, %s5747_s4 }
0x1dfe   : > { %3790 = vrot.lane.b32.xlu1 %v3770_v8, %s5747_s4 }
0x1e02   : > { %3794 = vrot.lane.b32.xlu1 %v3772_v37, %s5747_s4 }
0x1e5a   : > { %v3785_v29 = vpop.permute.xlu0 %3784 }
0x1e5b   : > { %v3810_v36 = vsel %vm3806_vm0, %v3785_v29, 0.0 }
0x1e5e   : > { %v3789_v44 = vpop.permute.xlu0 %3788 }
0x1e5f   : > { %v3816_v18 = vsel %vm3806_vm0, %v3789_v44, 0.0 }
0x1e62   : > { %v3793_v26 = vpop.permute.xlu0 %3792 }
0x1e63   : > { %v3822_v63 = vsel %vm3806_vm0, %v3793_v26, 0.0 }
0x1e64   : > { %v3742_v0 = vpop.permute.xlu1 %3741 }
0x1e65   : > { %v3744_v46 = vmul.f32 %v3742_v0, %v3739_v42 }
0x1e67   : > { %v5607_v50 = vadd.f32 %v3747_v41, %v3744_v46 }
0x1e68   : > { %v3783_v23 = vpop.permute.xlu1 %3782 }
0x1e69   : > { %v3754_v51 = vrot.slane %v5607_v50, 6  ;;  %v3807_v35 = vsel %vm3806_vm0, %v3783_v23, 0.0 }
0x1e6a   : > { %3808 = vadd.xlane.f32.xlu1 %v3807_v35 }
0x1e6b   : > { %v3773_v43 = vmul.f32 %v3764_v58, %v3754_v51 }
0x1e6c   : > { %v3787_v17 = vpop.permute.xlu1 %3786 }
0x1e6d   : > { %3796 = vrot.lane.b32.xlu0 %v3773_v43, %s5747_s4  ;;  %v3813_v48 = vsel %vm3806_vm0, %v3787_v17, 0.0 }
0x1e6e   : > { %3817 = vadd.xlane.f32.xlu1 %v3816_v18 }
0x1e70   : > { %v3791_v30 = vpop.permute.xlu1 %3790 }
0x1e71   : > { %v3819_v21 = vsel %vm3806_vm0, %v3791_v30, 0.0 }
0x1e72   : > { %3823 = vadd.xlane.f32.xlu1 %v3822_v63 }
0x1e74   : > { %v3795_v19 = vpop.permute.xlu1 %3794 }
0x1e75   : > { %v3825_v49 = vsel %vm3806_vm0, %v3795_v19, 0.0 }
0x1e8c   : > { %3811 = vadd.xlane.f32.xlu0 %v3810_v36 }
0x1e90   : > { %3814 = vadd.xlane.f32.xlu0 %v3813_v48 }
0x1e94   : > { %3820 = vadd.xlane.f32.xlu0 %v3819_v21 }
0x1e98   : > { %3826 = vadd.xlane.f32.xlu0 %v3825_v49 }
0x1edf   : > { %v3797_v38 = vpop.permute.xlu0 %3796 }
0x1ee0   : > { %v3828_v15 = vsel %vm3806_vm0, %v3797_v38, 0.0 }
0x1ee1   : > { %3829 = vadd.xlane.f32.xlu1 %v3828_v15 }
0x1ef3   : > { %v3809_v45 = vpop.xlane.xlu1 %3808 }
0x1ef4   : > { %v3832_v27 = vadd.f32 %v3831_v10, %v3809_v45 }
0x1ef6   : > { %v3840_v22 = vsel %vm2800_vm14, %v3832_v27, -inf }
0x1ef7   : > { %v3818_v60 = vpop.xlane.xlu1 %3817 }
0x1ef8   : > { %v3835_v2 = vadd.f32 %v3831_v10, %v3818_v60 }
0x1efa   : > { %v3843_v32 = vsel %vm2800_vm14, %v3835_v2, -inf }
0x1efb   : > { %v3824_v7 = vpop.xlane.xlu1 %3823 }
0x1efc   : > { %v3837_v3 = vadd.f32 %v3831_v10, %v3824_v7 }
0x1efe   : > { %v3846_v39 = vsel %vm2800_vm14, %v3837_v3, -inf }
0x1f15   : > { %v3812_v53 = vpop.xlane.xlu0 %3811 }
0x1f16   : > { %v3833_v12 = vadd.f32 %v3831_v10, %v3812_v53 }
0x1f18   : > { %v3841_v11 = vsel %vm2800_vm14, %v3833_v12, -inf }
0x1f19   : > { %v3815_v54 = vpop.xlane.xlu0 %3814  ;;  %v3847_v5 = vmax.f32 %v3841_v11, %v3846_v39 }
0x1f1a   : > { %v3834_v31 = vadd.f32 %v3831_v10, %v3815_v54 }
0x1f1c   : > { %v3842_v58 = vsel %vm2800_vm14, %v3834_v31, -inf }
0x1f1d   : > { %v3821_v25 = vpop.xlane.xlu0 %3820 }
0x1f1e   : > { %v3836_v9 = vadd.f32 %v3831_v10, %v3821_v25 }
0x1f20   : > { %v3844_v62 = vsel %vm2800_vm14, %v3836_v9, -inf }
0x1f21   : > { %v3827_v24 = vpop.xlane.xlu0 %3826  ;;  %v3845_v14 = vmax.f32 %v3840_v22, %v3844_v62 }
0x1f22   : > { %v3838_v59 = vadd.f32 %v3831_v10, %v3827_v24 }
0x1f23   : > { %v3852_v16 = vmax.f32 %v3845_v14, %v3847_v5 }
0x1f24   : > { %v3848_v52 = vsel %vm2800_vm14, %v3838_v59, -inf }
0x1f25   : > { %v3849_v28 = vmax.f32 %v3842_v58, %v3848_v52 }
0x1f6a   : > { %v3830_v34 = vpop.xlane.xlu1 %3829 }
0x1f6b   : > { %v3839_v13 = vadd.f32 %v3831_v10, %v3830_v34 }
0x1f6d   : > { %v3850_v56 = vsel %vm2800_vm14, %v3839_v13, -inf }
0x1f6e   : > { %v3851_v55 = vmax.f32 %v3843_v32, %v3850_v56 }
0x1f70   : > { %v3853_v20 = vmax.f32 %v3849_v28, %v3851_v55 }
0x1f72   : > { %v3854_v8 = vmax.f32 %v3852_v16, %v3853_v20 }
0x1f74   : > { %v3855_v37 = vsub.f32 %v3832_v27, %v3854_v8  ;;  %v3856_v29 = vsub.f32 %v3833_v12, %v3854_v8  ;;  %v3857_v33 = vsub.f32 %v3834_v31, %v3854_v8  ;;  %v3858_v42 = vsub.f32 %v3835_v2, %v3854_v8 }
0x1f75   : > { %v3859_v0 = vsub.f32 %v3836_v9, %v3854_v8  ;;  %v3860_v23 = vsub.f32 %v3837_v3, %v3854_v8  ;;  %v3861_v43 = vsub.f32 %v3838_v59, %v3854_v8  ;;  %v3862_v26 = vsub.f32 %v3839_v13, %v3854_v8 }
0x1f76   : > { %v3863_v41 = vmul.f32 1.442695, %v3855_v37  ;;  %v3865_v46 = vmul.f32 1.442695, %v3856_v29  ;;  %v3867_v44 = vmul.f32 1.442695, %v3857_v33 }
0x1f77   : > { %v3869_v35 = vmul.f32 1.442695, %v3858_v42  ;;  %v3871_v18 = vmul.f32 1.442695, %v3859_v0  ;;  %v3873_v63 = vmul.f32 1.442695, %v3860_v23 }
0x1f78   : > { %4422 = vpow2.f32 %v3863_v41  ;;  %v3875_v17 = vmul.f32 1.442695, %v3861_v43  ;;  %v3877_v36 = vmul.f32 1.442695, %v3862_v26 }
0x1f79   : > { %4424 = vpow2.f32 %v3865_v46 }
0x1f7a   : > { %4426 = vpow2.f32 %v3867_v44 }
0x1f7b   : > { %4428 = vpow2.f32 %v3869_v35 }
0x1f7c   : > { %4430 = vpow2.f32 %v3871_v18 }
0x1f7d   : > { %4432 = vpow2.f32 %v3873_v63 }
0x1f7e   : > { %4434 = vpow2.f32 %v3875_v17 }
0x1f7f   : > { %4436 = vpow2.f32 %v3877_v36 }
0x1f85   : > { %v4423_v30 = vpop.eup %4422 }
0x1f86   : > { %v4425_v48 = vpop.eup %4424  ;;  %v3879_v21 = vsel %vm2800_vm14, %v4423_v30, 0.0 }
0x1f87   : > { %v4427_v19 = vpop.eup %4426  ;;  %v3880_v49 = vsel %vm2800_vm14, %v4425_v48, 0.0 }
0x1f88   : > { %v4429_v38 = vpop.eup %4428  ;;  %v3881_v15 = vadd.f32 %v3880_v49, %v3879_v21  ;;  %v3882_v53 = vsel %vm2800_vm14, %v4427_v19, 0.0 }
0x1f89   : > { %v4431_v54 = vpop.eup %4430  ;;  %v3884_v25 = vsel %vm2800_vm14, %v4429_v38, 0.0 }
0x1f8a   : > { %v3883_v45 = vadd.f32 %v3882_v53, %v3881_v15  ;;  %v4433_v60 = vpop.eup %4432  ;;  %v3886_v24 = vsel %vm2800_vm14, %v4431_v54, 0.0 }
0x1f8b   : > { %v4435_v9 = vpop.eup %4434  ;;  %v3888_v27 = vsel %vm2800_vm14, %v4433_v60, 0.0 }
0x1f8c   : > { %v3885_v10 = vadd.f32 %v3884_v25, %v3883_v45  ;;  %v4437_v12 = vpop.eup %4436  ;;  %v3890_v2 = vsel %vm2800_vm14, %v4435_v9, 0.0 }
0x1f8d   : > { %v3892_v31 = vsel %vm2800_vm14, %v4437_v12, 0.0 }
0x1f8e   : > { %v3887_v7 = vadd.f32 %v3886_v24, %v3885_v10 }
0x1f90   : > { %v3889_v59 = vadd.f32 %v3888_v27, %v3887_v7 }
0x1f92   : > { %v3891_v3 = vadd.f32 %v3890_v2, %v3889_v59 }
0x1f94   : > { %v3893_v62 = vadd.f32 %v3892_v31, %v3891_v3 }
0x1f96   : > { %4438 = vrcp.f32 %v3893_v62 }
0x1fa3   : > { %v4439_v34 = vpop.eup %4438 }
0x1fa4   : > { %v3895_v22 = vmul.f32 %v4439_v34, %v4423_v30  ;;  %v3896_v11 = vmul.f32 %v4439_v34, %v4425_v48  ;;  %v3897_v52 = vmul.f32 %v4439_v34, %v4427_v19  ;;  %v3898_v13 = vmul.f32 %v4439_v34, %v4429_v38 }
0x1fa5   : > { %v3899_v14 = vmul.f32 %v4439_v34, %v4431_v54  ;;  %v3900_v56 = vmul.f32 %v4439_v34, %v4433_v60  ;;  %v3901_v20 = vmul.f32 %v4439_v34, %v4435_v9 }
0x1fa6   : > { %v3903_v32 = vmul.f32 %v3895_v22, %v5481_v47  ;;  %v3904_v39 = vmul.f32 %v3896_v11, %v5499_v61  ;;  %v3905_v58 = vmul.f32 %v3897_v52, %v5516_v40  ;;  %v3906_v5 = vmul.f32 %v3898_v13, %v5533_v4 }
0x1fa7   : > { %v3907_v8 = vmul.f32 %v3899_v14, %v5550_v1  ;;  %v3902_v47 = vmul.f32 %v4439_v34, %v4437_v12  ;;  %v3908_v61 = vmul.f32 %v3900_v56, %v5567_v57  ;;  %v3909_v4 = vmul.f32 %v3901_v20, %v5578_v6 }
0x1fa8   : > { %v3912_v28 = vsel %vm3911_vm1, %v3903_v32, 0.0  ;;  %v3913_v55 = vsel %vm3911_vm1, %v3904_v39, 0.0  ;;  %v3915_v37 = vsel %vm3911_vm1, %v3905_v58, 0.0  ;;  %v3917_v40 = vsel %vm3911_vm1, %v3906_v5, 0.0 }
0x1fa9   : > { %v3914_v16 = vadd.f32 %v3913_v55, %v3912_v28  ;;  %v3919_v42 = vsel %vm3911_vm1, %v3907_v8, 0.0  ;;  %v3910_v41 = vmul.f32 %v3902_v47, %v3754_v51  ;;  %v3921_v1 = vsel %vm3911_vm1, %v3908_v61, 0.0 }
0x1faa   : > { %v3923_v44 = vsel %vm3911_vm1, %v3909_v4, 0.0 }
0x1fab   : > { %v3916_v29 = vadd.f32 %v3915_v37, %v3914_v16  ;;  %v3925_v57 = vsel %vm3911_vm1, %v3910_v41, 0.0 }
0x1fad   : > { %v3918_v33 = vadd.f32 %v3917_v40, %v3916_v29 }
0x1faf   : > { %v3920_v0 = vadd.f32 %v3919_v42, %v3918_v33 }
0x1fb1   : > { %v3922_v46 = vadd.f32 %v3921_v1, %v3920_v0 }
0x1fb3   : > { %v3924_v23 = vadd.f32 %v3923_v44, %v3922_v46 }
0x1fb5   : > { %v3926_v35 = vadd.f32 %v3925_v57, %v3924_v23 }
0x1fb7   : > { %3928 = vrot.lane.b32.xlu0 %v3926_v35, %s5747_s4  ;;  %s4521_s4 = smov [#allocation4]  }
0x1fb8   : > { %s4444_s6 = sshll.u32 %s4521_s4, 4  ;;  %s4445_s6 = int_to_ptr.vmem [resolvable:$false] %s4444_s6 }
0x1fb9   : > { %s4446_s12 = scalar_lea.vmem %s4445_s6, 64  ;;  %p4447_p0 = scmp.lt.s32.totalorder %s3947_s29, %s4445_s6 }
0x1fba   : > { %p4448_p1 = scmp.lt.s32.totalorder %s4446_s12, %s4440_s5 }
0x1fbc   : > { %p4449_p2 = por %p4448_p1, %p4447_p0 }
0x1fbe   : > { %p4450_p3 = pnand %p4449_p2, %p4443_p13 }
0x2029   : > { %v3929_v6 = vpop.permute.xlu0 %3928 }
0x202a   : > { %3931 = vst.msk [vmem:[%s624_s1] sm:$0x3] %vm3806_vm0, %v3929_v6 }
0x202b   : > { %4453 = shalt.err (!%p4450_p3)
}
0x202c   : > { %s4454_s22 = scalar_lea.hbm %s5660_s28, 32  ;;  %s4458_s1 = scalar_lea.hbm %s5716_s20, 64 }
0x202d   : > { %p4455_p4 = scmp.ne.s32.totalorder %s5660_s28, %s4454_s22  ;;  %p4459_p9 = scmp.lt.s32.totalorder %s5660_s28, %s5716_s20 }
0x202e   : > { %p4460_p10 = scmp.lt.s32.totalorder %s4458_s1, %s4454_s22 }
0x202f   : > { %p4456_p7 = pnand %p4455_p4, %p4671_p5 }
0x2030   : > { %p4461_p11 = por %p4460_p10, %p4459_p9 }
0x2031   : > { %p4457_p8 = pneg %p4456_p7 }
0x2033   : > { %p4462_p12 = pnand %p4461_p11, %p4457_p8 }
0x2035   : > { %4465 = shalt.err (!%p4462_p12)
}
0x2036   : > { %4277 = dma.vmem_to_hbm [thread:$0]  (%p4671_p5), %s3947_s29, 32, %s5660_s28, %s3933_s3  }
0x2037 PF: > { %p4283_p13 = scmp.ge.s32.totalorder %s4500_s26, 2  ;;  %s3958_s5 = sand.u32 1, %s4488_s2  }
0x2038   : > { %s3959_s6 = scalar_lea.sflag [#allocation5], %s3958_s5 }
0x2039   : > { %p4280_p0 = pnand %p4283_p13, %p4675_p6 }
0x203b   : > { %p4281_p1 = pneg %p4280_p0 }
0x203d   : > { %4483 = dma.done.wait (%p4281_p1), %s3959_s6, 32  }
0x203e   : > { %4485 = vsyncadd (%p4281_p1), %s3959_s6, 4294967264  ;;  %s5753_s4 = sld [smem:[#allocation7_spill]]  ;;  %p32_p2 = scmp.ge.s32.totalorder %s4658_s27, 4  }
0x203f   : > { %s5754_s3 = sld [smem:[#allocation8_spill]]  ;;  %s5755_s2 = smov %s4492_s25 }
0x2040   : > { %s5757_s26 = smov %s4658_s27  ;;  %34 = sbr.rel (!%p32_p2) target bundleno = 13 (0xd), region = 135 }
0x2044   : > { %s5756_s25 = smov %s5753_s4 }
0x2045   :  { %3964 = vsyncpa [#allocation5], 1 }
0x2046   :  { %3966 = vsyncpa [#allocation5 + $0x1], 1 }

</bundles_post_ra>
